<compile_context>
chip_gen: v7x
topology: tpu7x:2x2x1
jax: 0.10.0
libtpu: 0.0.40
codegen_flags: <defaults>
</compile_context>

<pallas_src>
import math
import numpy as np
import jax
import jax.numpy as jnp
from jax.experimental import pallas as pl
from jax.experimental.pallas import tpu as pltpu

PAD = 0  # SRCVocab.PAD


# ------------------------------ fused linear ------------------------------- #

def _linear_kernel(x_ref, wt_ref, b_ref, o_ref):
    # o = x @ W^T + b  (weights pre-transposed/fused host-side; bf16 MXU, f32 accumulate)
    o_ref[...] = (
        jnp.dot(x_ref[...], wt_ref[...], preferred_element_type=jnp.float32)
        + b_ref[...]
    )


def linear(x, wt, b2):
    """x: [M, K] f32, wt: [K, N] bf16 (pre-transposed), b2: [1, N] f32 -> [M, N] f32."""
    M, K = x.shape
    N = wt.shape[1]
    tm = 512
    while tm > max(M, 8):
        tm //= 2
    tm = max(tm, 8)
    Mp = ((M + tm - 1) // tm) * tm
    xp = x if Mp == M else jnp.pad(x, ((0, Mp - M), (0, 0)))
    # TODO(synk): for production K/N (v7x) add an N-tile or K-reduction grid axis so the
    #             resident weight + double-buffered tiles stay inside the scoped VMEM limit.
    out = pl.pallas_call(
        _linear_kernel,
        grid=(Mp // tm,),
        in_specs=[
            pl.BlockSpec((tm, K), lambda i: (i, 0)),
            pl.BlockSpec((K, N), lambda i: (0, 0)),   # weights resident across row tiles
            pl.BlockSpec((1, N), lambda i: (0, 0)),
        ],
        out_specs=pl.BlockSpec((tm, N), lambda i: (i, 0)),
        out_shape=jax.ShapeDtypeStruct((Mp, N), jnp.float32),
        compiler_params=pltpu.CompilerParams(dimension_semantics=("parallel",)),
    )(xp.astype(jnp.bfloat16), wt, b2)
    return out if Mp == M else out[:M]


# ---------------- level-parallel tree-GRU (one kernel per pass) ------------- #

def _make_tree_kernel(B, W, H, mode):
    """mode='dt': bottom-up, context = sum of children hiddens (scratch S).
       mode='td': top-down,  context = parent hidden (read from the resident output)."""
    dt = (mode == "dt")
    BW = B * W

    def kernel(nodes_ref, par_ref, gx_ref, uht_ref, bh_ref, hs_ref, *scratch):
        if dt:
            s_ref, ctxb_ref = scratch
        else:
            (ctxb_ref,) = scratch
        lvl = pl.program_id(0)

        @pl.when(lvl == 0)
        def _init():
            hs_ref[...] = jnp.zeros_like(hs_ref)      # includes the dump row
            if dt:
                s_ref[...] = jnp.zeros_like(s_ref)

        # --- gather recurrent context: one direct dynamic-row load per work slot ---------
        ctx_src = s_ref if dt else hs_ref
        for b in range(B):
            for j in range(W):
                slot = b * W + j
                idx = nodes_ref[lvl, slot] if dt else par_ref[lvl, slot]
                ctxb_ref[slot:slot + 1, :] = ctx_src[idx, b:b + 1, :]

        ctx = ctxb_ref[...]                           # [BW, H]  f32
        gx = gx_ref[...]                              # [BW, 3H] f32 (pre-gathered per level)

        # GRU cell (gx already holds W_ih x + b_ih); bf16 MXU dot, f32 gate math / state.
        gh = (jnp.dot(ctx.astype(jnp.bfloat16), uht_ref[...],
                      preferred_element_type=jnp.float32) + bh_ref[...])
        r = jax.nn.sigmoid(gx[:, 0 * H:1 * H] + gh[:, 0 * H:1 * H])
        z = jax.nn.sigmoid(gx[:, 1 * H:2 * H] + gh[:, 1 * H:2 * H])
        n = jnp.tanh(gx[:, 2 * H:3 * H] + r * gh[:, 2 * H:3 * H])
        h = (1.0 - z) * n + z * ctx                   # [BW, H]

        # --- scatter: direct row stores; invalid slots target the dump row (row T) -------
        for b in range(B):
            for j in range(W):
                slot = b * W + j
                idx = nodes_ref[lvl, slot]
                hs_ref[idx, b:b + 1, :] = h[slot:slot + 1, :]
                if dt:
                    par = par_ref[lvl, slot]          # root / invalid -> dump row
                    s_ref[par, b:b + 1, :] = (s_ref[par, b:b + 1, :]
                                              + h[slot:slot + 1, :])

    return kernel


def tree_gru(gx_lvl, nodes_flat, par_flat, uht, bh, T, B, mode):
    """gx_lvl: [L, B*W, 3H] f32 (level-gathered); nodes/par: [L, B*W] int32 (dump = T).
       Returns node hiddens [T, B, H] f32."""
    L, BW, G = gx_lvl.shape
    H = uht.shape[0]
    W = BW // B
    scratch = [pltpu.VMEM((BW, H), jnp.float32)]                 # ctx gather buffer
    if mode == "dt":
        scratch = [pltpu.VMEM((T + 1, B, H), jnp.float32)] + scratch  # children-sum (+dump row)

    grid_spec = pltpu.PrefetchScalarGridSpec(
        num_scalar_prefetch=2,
        grid=(L,),
        in_specs=[
            pl.BlockSpec((None, BW, G), lambda l, *pf: (l, 0, 0)),   # per-level gx (streamed)
            pl.BlockSpec((H, G), lambda l, *pf: (0, 0)),             # U^T resident (bf16)
            pl.BlockSpec((1, G), lambda l, *pf: (0, 0)),
        ],
        out_specs=pl.BlockSpec((T + 1, B, H), lambda l, *pf: (0, 0, 0)),  # resident node state
        scratch_shapes=scratch,
    )
    hs = pl.pallas_call(
        _make_tree_kernel(B, W, H, mode),
        grid_spec=grid_spec,
        out_shape=jax.ShapeDtypeStruct((T + 1, B, H), jnp.float32),
        compiler_params=pltpu.CompilerParams(dimension_semantics=("arbitrary",)),
    )(nodes_flat, par_flat, gx_lvl, uht, bh)
    return hs[:T]                                     # drop the dump row


# -------------------- fused bidirectional GRU (chunked time) ---------------- #

def _make_bigru_kernel(H, TC):
    def kernel(gxf_ref, gxb_ref, mf_ref, mb_ref, uht_ref, bh_ref,
               of_ref, ob_ref, hf_ref, hb_ref):
        @pl.when(pl.program_id(0) == 0)
        def _init():
            hf_ref[...] = jnp.zeros_like(hf_ref)
            hb_ref[...] = jnp.zeros_like(hb_ref)

        uf = uht_ref[0]                               # [H,3H] bf16, hoisted out of the loop
        ub = uht_ref[1]
        bf = bh_ref[0]                                # [1,3H] f32
        bb = bh_ref[1]

        def cell(gx, m, h_prev, u, bias):
            gh = jnp.dot(h_prev.astype(jnp.bfloat16), u,
                         preferred_element_type=jnp.float32) + bias
            r = jax.nn.sigmoid(gx[:, 0 * H:1 * H] + gh[:, 0 * H:1 * H])
            z = jax.nn.sigmoid(gx[:, 1 * H:2 * H] + gh[:, 1 * H:2 * H])
            n = jnp.tanh(gx[:, 2 * H:3 * H] + r * gh[:, 2 * H:3 * H])
            h_cand = (1.0 - z) * n + z * h_prev
            return m * h_cand + (1.0 - m) * h_prev, m * h_cand   # (carried h, output)

        # Fully-unrolled chunk loop; hidden state lives in scratch refs (no live-range blowup).
        for s in range(TC):
            hf, outf = cell(gxf_ref[s, :, 0:3 * H], mf_ref[s], hf_ref[...], uf, bf)
            hf_ref[...] = hf
            of_ref[s] = outf
            sb = TC - 1 - s                            # backward walks its chunk in reverse
            hb, outb = cell(gxb_ref[sb, :, 3 * H:6 * H], mb_ref[sb], hb_ref[...], ub, bb)
            hb_ref[...] = hb
            ob_ref[sb] = outb

    return kernel


def bigru(gru_gx, uht_bi, bh_bi, step_mask):
    """gru_gx: [T,B,6H] f32 (fwd gates | bwd gates); returns (out_fwd, out_bwd) [T,B,H] f32."""
    T, B, G6 = gru_gx.shape
    H = uht_bi.shape[1]
    TC = math.gcd(T, 8)                               # chunk size (amortize per-step overhead)
    nc = T // TC

    outs = pl.pallas_call(
        _make_bigru_kernel(H, TC),
        grid=(nc,),
        in_specs=[
            pl.BlockSpec((TC, B, G6), lambda c: (c, 0, 0)),            # fwd chunk of gx
            pl.BlockSpec((TC, B, G6), lambda c: (nc - 1 - c, 0, 0)),   # bwd chunk of gx
            pl.BlockSpec((TC, B, 1), lambda c: (c, 0, 0)),             # fwd chunk of mask
            pl.BlockSpec((TC, B, 1), lambda c: (nc - 1 - c, 0, 0)),    # bwd chunk of mask
            pl.BlockSpec((2, H, 3 * H), lambda c: (0, 0, 0)),          # recurrent weights (bf16)
            pl.BlockSpec((2, 1, 3 * H), lambda c: (0, 0, 0)),
        ],
        out_specs=(
            pl.BlockSpec((TC, B, H), lambda c: (c, 0, 0)),
            pl.BlockSpec((TC, B, H), lambda c: (nc - 1 - c, 0, 0)),
        ),
        out_shape=(jax.ShapeDtypeStruct((T, B, H), jnp.float32),
                   jax.ShapeDtypeStruct((T, B, H), jnp.float32)),
        scratch_shapes=[pltpu.VMEM((B, H), jnp.float32),
                        pltpu.VMEM((B, H), jnp.float32)],
        compiler_params=pltpu.CompilerParams(dimension_semantics=("arbitrary",)),
    )(gru_gx, gru_gx, step_mask, step_mask, uht_bi, bh_bi)
    return outs


# ------------------------------ host-side tree ------------------------------ #

def build_tree_tables(heads, T):
    """heads[b][i] = parent of node i (-1 = root).  Builds level-grouped tables:
       nodes/par: [n_levels, B, W] int32 with invalid slots = T (dump row), parent of root = T.
       DT processes levels deepest-first; TD processes root-first."""
    B = len(heads)
    depths = []
    for head in heads:
        L = len(head)
        d = np.zeros(L, np.int64)
        for i in range(L):
            j = i
            while head[j] != -1:
                j = head[j]
                d[i] += 1
        depths.append(d)
    n_levels = max(int(d.max()) + 1 for d in depths)
    W = max(int(np.max(np.bincount(d))) for d in depths)
    while (B * W) % 8 != 0:           # pad work slots so B*W fills vreg sublanes
        W += 1

    DUMP = T
    dt_nodes = np.full((n_levels, B, W), DUMP, np.int32)
    dt_par = np.full((n_levels, B, W), DUMP, np.int32)
    td_nodes = np.full((n_levels, B, W), DUMP, np.int32)
    td_par = np.full((n_levels, B, W), DUMP, np.int32)
    lengths = np.zeros((B,), np.int32)
    for b, head in enumerate(heads):
        lengths[b] = len(head)
        harr = np.asarray(head, np.int64)
        d = depths[b]
        for lvl in range(int(d.max()) + 1):
            nodes_at = np.nonzero(d == lvl)[0]
            dt_step = n_levels - 1 - lvl              # bottom-up: deepest level first
            for j, nd in enumerate(nodes_at):
                par = harr[nd] if harr[nd] != -1 else DUMP
                td_nodes[lvl, b, j] = nd
                td_par[lvl, b, j] = par
                dt_nodes[dt_step, b, j] = nd
                dt_par[dt_step, b, j] = par
    return (jnp.asarray(dt_nodes), jnp.asarray(dt_par),
            jnp.asarray(td_nodes), jnp.asarray(td_par), jnp.asarray(lengths))


# ------------------------------ Encoder forward ----------------------------- #

def encoder_forward(params, xs, rels, dt_nodes, dt_par, td_nodes, td_par, lengths):
    B, T = xs.shape
    H = params["dt_uht"].shape[0]
    L, _, W = dt_nodes.shape

    x_mask = (xs == PAD)

    emb = params["emb"][xs]                                   # [B,T,D] (pad row is zero)
    rel_emb = params["rel_emb"][rels]                         # [B,T,D]
    outputs_tb = jnp.swapaxes(jnp.concatenate([emb, rel_emb], axis=2), 0, 1)   # [T,B,2D]
    flat = outputs_tb.reshape(T * B, -1)

    # Fused DT+TD input-gate projection: one [2D,6H] matmul instead of two [2D,3H] ones.
    tree_gx = linear(flat, params["tree_w_ih_t"], params["tree_b_ih"]).reshape(T, B, 6 * H)
    dt_gx, td_gx = tree_gx[..., :3 * H], tree_gx[..., 3 * H:]

    # Pre-gather the input gates into level order (removes the in-kernel gx gather).
    bidx = jnp.arange(B)[None, :, None]

    def level_gather(gx, nodes):
        idx = jnp.minimum(nodes, T - 1)               # clamp dump slots (results are discarded)
        return gx[idx, bidx, :].reshape(L, B * W, 3 * H)

    dt_out = tree_gru(level_gather(dt_gx, dt_nodes), dt_nodes.reshape(L, B * W),
                      dt_par.reshape(L, B * W), params["dt_uht"], params["dt_bh"],
                      T, B, mode="dt")                                          # [T,B,H]
    td_out = tree_gru(level_gather(td_gx, td_nodes), td_nodes.reshape(L, B * W),
                      td_par.reshape(L, B * W), params["td_uht"], params["td_bh"],
                      T, B, mode="td")                                          # [T,B,H]

    tree_outputs = jnp.concatenate([dt_out, td_out], axis=2)                    # [T,B,2H]
    tree_hidden = linear(tree_outputs.reshape(T * B, 2 * H),
                         params["tr_wt"], params["tr_b"])                       # [T*B,H]

    # Fused fwd+bwd input projection for the bidirectional GRU, consumed directly as [T,B,6H].
    gru_gx = linear(tree_hidden, params["gru_w_ih_t"], params["gru_b_ih"]).reshape(T, B, 6 * H)
    step_mask = (jnp.arange(T)[:, None] < lengths[None, :]).astype(jnp.float32)[:, :, None]

    out_f, out_b = bigru(gru_gx, params["gru_uht_bi"], params["gru_bh_bi"], step_mask)
    ctx = jnp.swapaxes(jnp.concatenate([out_f, out_b], axis=2), 0, 1)           # [B,T,2H]
    return ctx, x_mask


# ----------------------------------- init ----------------------------------- #

def init_params(key, n_words, n_rels, input_size, hidden_size):
    D, H = input_size, hidden_size
    ks = jax.random.split(key, 16)
    s = 0.1

    def rnd(k, shape):
        return (s * jax.random.normal(k, shape)).astype(jnp.float32)

    emb = rnd(ks[0], (n_words, D)).at[PAD].set(0.0)           # padding_idx -> zero row
    rel_emb = rnd(ks[1], (n_rels, D)).at[PAD].set(0.0)

    # Tree-GRU input projections, fused (dt | td) and pre-transposed: [2D, 6H] bf16 for the MXU.
    dt_w_ih = rnd(ks[2], (3 * H, 2 * D))
    td_w_ih = rnd(ks[6], (3 * H, 2 * D))
    tree_w_ih_t = jnp.concatenate([dt_w_ih.T, td_w_ih.T], axis=1).astype(jnp.bfloat16)
    tree_b_ih = jnp.concatenate([rnd(ks[3], (3 * H,)),
                                 rnd(ks[7], (3 * H,))]).reshape(1, 6 * H)

    # Recurrent weights in bf16 (MXU-native; f32 accumulation keeps GRU numerics).
    dt_uht = rnd(ks[4], (3 * H, H)).T.astype(jnp.bfloat16)    # [H,3H]
    dt_bh = rnd(ks[5], (3 * H,)).reshape(1, 3 * H)
    td_uht = rnd(ks[8], (3 * H, H)).T.astype(jnp.bfloat16)
    td_bh = rnd(ks[9], (3 * H,)).reshape(1, 3 * H)

    tr_wt = rnd(ks[10], (H, 2 * H)).T.astype(jnp.bfloat16)    # [2H,H]
    tr_b = rnd(ks[11], (H,)).reshape(1, H)

    # Bidirectional GRU: fused (fwd | bwd) input projection, stacked recurrent weights (bf16).
    gf_w_ih = rnd(ks[12], (3 * H, H))
    gb_w_ih = rnd(ks[14], (3 * H, H))
    gru_w_ih_t = jnp.concatenate([gf_w_ih.T, gb_w_ih.T], axis=1).astype(jnp.bfloat16)  # [H,6H]
    gru_b_ih = jnp.zeros((1, 6 * H), jnp.float32)
    gru_uht_bi = jnp.stack([rnd(ks[13], (3 * H, H)).T,
                            rnd(ks[15], (3 * H, H)).T], axis=0).astype(jnp.bfloat16)   # [2,H,3H]
    gru_bh_bi = jnp.zeros((2, 1, 3 * H), jnp.float32)

    return dict(emb=emb, rel_emb=rel_emb,
                tree_w_ih_t=tree_w_ih_t, tree_b_ih=tree_b_ih,
                dt_uht=dt_uht, dt_bh=dt_bh, td_uht=td_uht, td_bh=td_bh,
                tr_wt=tr_wt, tr_b=tr_b,
                gru_w_ih_t=gru_w_ih_t, gru_b_ih=gru_b_ih,
                gru_uht_bi=gru_uht_bi, gru_bh_bi=gru_bh_bi)


# ----------------------------------- main ----------------------------------- #

if __name__ == "__main__":
    n_words, n_rels = 20, 10
    D, H = 16, 32            # input_size, hidden_size
    B, T = 2, 8              # batch, seq_len

    key = jax.random.PRNGKey(0)
    kp, kx, kr = jax.random.split(key, 3)
    params = init_params(kp, n_words, n_rels, D, H)

    # Synthetic batch: lengths [8, 6], dependency heads (-1 = root).
    heads = [
        [-1, 0, 0, 1, 1, 2, 2, 3],       # length 8
        [-1, 0, 1, 1, 0, 2],             # length 6
    ]
    dt_nodes, dt_par, td_nodes, td_par, lengths = build_tree_tables(heads, T)

    xs = jax.random.randint(kx, (B, T), 1, n_words).astype(jnp.int32)
    rels = jax.random.randint(kr, (B, T), 1, n_rels).astype(jnp.int32)
    seq_valid = jnp.arange(T)[None, :] < lengths[:, None]
    xs = jnp.where(seq_valid, xs, PAD)
    rels = jnp.where(seq_valid, rels, PAD)

    fwd = jax.jit(encoder_forward)
    ctx, x_mask = fwd(params, xs, rels, dt_nodes, dt_par, td_nodes, td_par, lengths)
    jax.block_until_ready(ctx)
    jax.block_until_ready(x_mask)

    assert ctx.shape == (B, T, 2 * H) and ctx.dtype == jnp.float32
    assert x_mask.shape == (B, T) and x_mask.dtype == jnp.bool_
    assert bool(jnp.all(jnp.isfinite(ctx)))
    print("KERNEL_OK")
</pallas_src>

<mosaic_0001>
module attributes {stable_mosaic.version = 11 : i64} {
  func.func @_linear_kernel(%arg0: i32, %arg1: memref<16x32xbf16, #tpu.memory_space<vmem>>, %arg2: memref<32x192xbf16, #tpu.memory_space<vmem>>, %arg3: memref<1x192xf32, #tpu.memory_space<vmem>>, %arg4: memref<16x192xf32, #tpu.memory_space<vmem>>) attributes {dimension_semantics = [#tpu.dimension_semantics<parallel>], iteration_bounds = array<i64: 1>, scalar_prefetch = 0 : i64, scratch_operands = 0 : i64, tpu.core_type = #tpu.core_type<tc>, window_params = [{transform_indices = @transform_0, window_bounds = array<i64: 16, 32>}, {pipeline_mode = #tpu.pipeline_mode<synchronous>, transform_indices = @transform_1, window_bounds = array<i64: 32, 192>}, {pipeline_mode = #tpu.pipeline_mode<synchronous>, transform_indices = @transform_2, window_bounds = array<i64: 1, 192>}, {transform_indices = @transform_3, window_bounds = array<i64: 16, 192>}]} {
    %c0 = arith.constant 0 : index
    %c0_0 = arith.constant 0 : index
    %0 = vector.load %arg1[%c0, %c0_0] : memref<16x32xbf16, #tpu.memory_space<vmem>>, vector<16x32xbf16>
    %c0_1 = arith.constant 0 : index
    %c0_2 = arith.constant 0 : index
    %1 = vector.load %arg2[%c0_1, %c0_2] : memref<32x192xbf16, #tpu.memory_space<vmem>>, vector<32x192xbf16>
    %cst = arith.constant dense<0.000000e+00> : vector<16x192xf32>
    %2 = tpu.matmul %0, %1, %cst {dimension_numbers = #tpu.dot_dimension_numbers<[1], [0], [0], [1], [0, 0, 1, 1], [], []>} : vector<16x32xbf16>, vector<32x192xbf16>, vector<16x192xf32> -> vector<16x192xf32>
    %c0_3 = arith.constant 0 : index
    %c0_4 = arith.constant 0 : index
    %3 = vector.load %arg3[%c0_3, %c0_4] : memref<1x192xf32, #tpu.memory_space<vmem>>, vector<1x192xf32>
    %4 = vector.broadcast %3 : vector<1x192xf32> to vector<16x192xf32>
    %5 = arith.addf %2, %4 : vector<16x192xf32>
    %c0_5 = arith.constant 0 : index
    %c0_6 = arith.constant 0 : index
    %6 = vector.load %arg4[%c0_5, %c0_6] : memref<16x192xf32, #tpu.memory_space<vmem>>, vector<16x192xf32>
    tpu.vector_store %arg4[%c0_5, %c0_6], %5 {strides = array<i32>} : memref<16x192xf32, #tpu.memory_space<vmem>>, vector<16x192xf32>,
    return
  }
  func.func @transform_0(%arg0: i32) -> (i32, i32) {
    %c0_i32 = arith.constant 0 : i32
    %c0_i32_0 = arith.constant 0 : i32
    return %arg0, %c0_i32 : i32, i32
  }
  func.func @transform_1(%arg0: i32) -> (i32, i32) {
    %c0_i32 = arith.constant 0 : i32
    %c0_i32_0 = arith.constant 0 : i32
    %c0_i32_1 = arith.constant 0 : i32
    return %c0_i32, %c0_i32_0 : i32, i32
  }
  func.func @transform_2(%arg0: i32) -> (i32, i32) {
    %c0_i32 = arith.constant 0 : i32
    %c0_i32_0 = arith.constant 0 : i32
    %c0_i32_1 = arith.constant 0 : i32
    return %c0_i32, %c0_i32_0 : i32, i32
  }
  func.func @transform_3(%arg0: i32) -> (i32, i32) {
    %c0_i32 = arith.constant 0 : i32
    %c0_i32_0 = arith.constant 0 : i32
    return %arg0, %c0_i32 : i32, i32
  }
}

module attributes {stable_mosaic.version = 11 : i64} {
  func.func @kernel(%arg0: i32, %arg1: memref<4x8xi32, #tpu.memory_space<smem>>, %arg2: memref<4x8xi32, #tpu.memory_space<smem>>, %arg3: memref<1x8x96xf32, #tpu.memory_space<vmem>>, %arg4: memref<32x96xbf16, #tpu.memory_space<vmem>>, %arg5: memref<1x96xf32, #tpu.memory_space<vmem>>, %arg6: memref<9x2x32xf32, #tpu.memory_space<vmem>>, %arg7: memref<8x32xf32, #tpu.memory_space<vmem>>) attributes {dimension_semantics = [#tpu.dimension_semantics<arbitrary>], iteration_bounds = array<i64: 4>, scalar_prefetch = 2 : i64, scratch_operands = 1 : i64, tpu.core_type = #tpu.core_type<tc>, window_params = [{transform_indices = @transform_0, window_bounds = array<i64: 1, 8, 96>}, {pipeline_mode = #tpu.pipeline_mode<synchronous>, transform_indices = @transform_1, window_bounds = array<i64: 32, 96>}, {pipeline_mode = #tpu.pipeline_mode<synchronous>, transform_indices = @transform_2, window_bounds = array<i64: 1, 96>}, {pipeline_mode = #tpu.pipeline_mode<synchronous>, transform_indices = @transform_3, window_bounds = array<i64: 9, 2, 32>}]} {
    %c0_i32 = arith.constant 0 : i32
    %0 = arith.cmpi eq, %arg0, %c0_i32 : i32
    %1 = arith.extui %0 : i1 to i32
    %c0_i32_0 = arith.constant 0 : i32
    %2 = arith.cmpi ne, %1, %c0_i32_0 : i32
    scf.if %2 {
      %cst_69 = arith.constant 0.000000e+00 : f32
      %142 = vector.broadcast %cst_69 : f32 to vector<9x2x32xf32>
      %c0_70 = arith.constant 0 : index
      %c0_71 = arith.constant 0 : index
      %c0_72 = arith.constant 0 : index
      %143 = vector.load %arg6[%c0_70, %c0_71, %c0_72] : memref<9x2x32xf32, #tpu.memory_space<vmem>>, vector<9x2x32xf32>
      tpu.vector_store %arg6[%c0_70, %c0_71, %c0_72], %142 {strides = array<i32>} : memref<9x2x32xf32, #tpu.memory_space<vmem>>, vector<9x2x32xf32>,
    } else {
    }
    %3 = arith.index_cast %arg0 : i32 to index
    %c0 = arith.constant 0 : index
    %4 = memref.load %arg2[%3, %c0] : memref<4x8xi32, #tpu.memory_space<smem>>
    %5 = arith.index_cast %4 : i32 to index
    %c0_1 = arith.constant 0 : index
    %c0_2 = arith.constant 0 : index
    %6 = vector.load %arg6[%5, %c0_1, %c0_2] : memref<9x2x32xf32, #tpu.memory_space<vmem>>, vector<1x1x32xf32>
    %7 = vector.shape_cast %6 : vector<1x1x32xf32> to vector<1x32xf32>
    %c0_3 = arith.constant 0 : index
    %c0_4 = arith.constant 0 : index
    %8 = vector.load %arg7[%c0_3, %c0_4] : memref<8x32xf32, #tpu.memory_space<vmem>>, vector<1x32xf32>
    tpu.vector_store %arg7[%c0_3, %c0_4], %7 {strides = array<i32>} : memref<8x32xf32, #tpu.memory_space<vmem>>, vector<1x32xf32>,
    %9 = arith.index_cast %arg0 : i32 to index
    %c1 = arith.constant 1 : index
    %10 = memref.load %arg2[%9, %c1] : memref<4x8xi32, #tpu.memory_space<smem>>
    %11 = arith.index_cast %10 : i32 to index
    %c0_5 = arith.constant 0 : index
    %c0_6 = arith.constant 0 : index
    %12 = vector.load %arg6[%11, %c0_5, %c0_6] : memref<9x2x32xf32, #tpu.memory_space<vmem>>, vector<1x1x32xf32>
    %13 = vector.shape_cast %12 : vector<1x1x32xf32> to vector<1x32xf32>
    %c1_7 = arith.constant 1 : index
    %c0_8 = arith.constant 0 : index
    %14 = vector.load %arg7[%c1_7, %c0_8] : memref<8x32xf32, #tpu.memory_space<vmem>>, vector<1x32xf32>
    tpu.vector_store %arg7[%c1_7, %c0_8], %13 {strides = array<i32>} : memref<8x32xf32, #tpu.memory_space<vmem>>, vector<1x32xf32>,
    %15 = arith.index_cast %arg0 : i32 to index
    %c2 = arith.constant 2 : index
    %16 = memref.load %arg2[%15, %c2] : memref<4x8xi32, #tpu.memory_space<smem>>
    %17 = arith.index_cast %16 : i32 to index
    %c0_9 = arith.constant 0 : index
    %c0_10 = arith.constant 0 : index
    %18 = vector.load %arg6[%17, %c0_9, %c0_10] : memref<9x2x32xf32, #tpu.memory_space<vmem>>, vector<1x1x32xf32>
    %19 = vector.shape_cast %18 : vector<1x1x32xf32> to vector<1x32xf32>
    %c2_11 = arith.constant 2 : index
    %c0_12 = arith.constant 0 : index
    %20 = vector.load %arg7[%c2_11, %c0_12] : memref<8x32xf32, #tpu.memory_space<vmem>>, vector<1x32xf32>
    tpu.vector_store %arg7[%c2_11, %c0_12], %19 {strides = array<i32>} : memref<8x32xf32, #tpu.memory_space<vmem>>, vector<1x32xf32>,
    %21 = arith.index_cast %arg0 : i32 to index
    %c3 = arith.constant 3 : index
    %22 = memref.load %arg2[%21, %c3] : memref<4x8xi32, #tpu.memory_space<smem>>
    %23 = arith.index_cast %22 : i32 to index
    %c0_13 = arith.constant 0 : index
    %c0_14 = arith.constant 0 : index
    %24 = vector.load %arg6[%23, %c0_13, %c0_14] : memref<9x2x32xf32, #tpu.memory_space<vmem>>, vector<1x1x32xf32>
    %25 = vector.shape_cast %24 : vector<1x1x32xf32> to vector<1x32xf32>
    %c3_15 = arith.constant 3 : index
    %c0_16 = arith.constant 0 : index
    %26 = vector.load %arg7[%c3_15, %c0_16] : memref<8x32xf32, #tpu.memory_space<vmem>>, vector<1x32xf32>
    tpu.vector_store %arg7[%c3_15, %c0_16], %25 {strides = array<i32>} : memref<8x32xf32, #tpu.memory_space<vmem>>, vector<1x32xf32>,
    %27 = arith.index_cast %arg0 : i32 to index
    %c4 = arith.constant 4 : index
    %28 = memref.load %arg2[%27, %c4] : memref<4x8xi32, #tpu.memory_space<smem>>
    %29 = arith.index_cast %28 : i32 to index
    %c1_17 = arith.constant 1 : index
    %c0_18 = arith.constant 0 : index
    %30 = vector.load %arg6[%29, %c1_17, %c0_18] : memref<9x2x32xf32, #tpu.memory_space<vmem>>, vector<1x1x32xf32>
    %31 = vector.shape_cast %30 : vector<1x1x32xf32> to vector<1x32xf32>
    %c4_19 = arith.constant 4 : index
    %c0_20 = arith.constant 0 : index
    %32 = vector.load %arg7[%c4_19, %c0_20] : memref<8x32xf32, #tpu.memory_space<vmem>>, vector<1x32xf32>
    tpu.vector_store %arg7[%c4_19, %c0_20], %31 {strides = array<i32>} : memref<8x32xf32, #tpu.memory_space<vmem>>, vector<1x32xf32>,
    %33 = arith.index_cast %arg0 : i32 to index
    %c5 = arith.constant 5 : index
    %34 = memref.load %arg2[%33, %c5] : memref<4x8xi32, #tpu.memory_space<smem>>
    %35 = arith.index_cast %34 : i32 to index
    %c1_21 = arith.constant 1 : index
    %c0_22 = arith.constant 0 : index
    %36 = vector.load %arg6[%35, %c1_21, %c0_22] : memref<9x2x32xf32, #tpu.memory_space<vmem>>, vector<1x1x32xf32>
    %37 = vector.shape_cast %36 : vector<1x1x32xf32> to vector<1x32xf32>
    %c5_23 = arith.constant 5 : index
    %c0_24 = arith.constant 0 : index
    %38 = vector.load %arg7[%c5_23, %c0_24] : memref<8x32xf32, #tpu.memory_space<vmem>>, vector<1x32xf32>
    tpu.vector_store %arg7[%c5_23, %c0_24], %37 {strides = array<i32>} : memref<8x32xf32, #tpu.memory_space<vmem>>, vector<1x32xf32>,
    %39 = arith.index_cast %arg0 : i32 to index
    %c6 = arith.constant 6 : index
    %40 = memref.load %arg2[%39, %c6] : memref<4x8xi32, #tpu.memory_space<smem>>
    %41 = arith.index_cast %40 : i32 to index
    %c1_25 = arith.constant 1 : index
    %c0_26 = arith.constant 0 : index
    %42 = vector.load %arg6[%41, %c1_25, %c0_26] : memref<9x2x32xf32, #tpu.memory_space<vmem>>, vector<1x1x32xf32>
    %43 = vector.shape_cast %42 : vector<1x1x32xf32> to vector<1x32xf32>
    %c6_27 = arith.constant 6 : index
    %c0_28 = arith.constant 0 : index
    %44 = vector.load %arg7[%c6_27, %c0_28] : memref<8x32xf32, #tpu.memory_space<vmem>>, vector<1x32xf32>
    tpu.vector_store %arg7[%c6_27, %c0_28], %43 {strides = array<i32>} : memref<8x32xf32, #tpu.memory_space<vmem>>, vector<1x32xf32>,
    %45 = arith.index_cast %arg0 : i32 to index
    %c7 = arith.constant 7 : index
    %46 = memref.load %arg2[%45, %c7] : memref<4x8xi32, #tpu.memory_space<smem>>
    %47 = arith.index_cast %46 : i32 to index
    %c1_29 = arith.constant 1 : index
    %c0_30 = arith.constant 0 : index
    %48 = vector.load %arg6[%47, %c1_29, %c0_30] : memref<9x2x32xf32, #tpu.memory_space<vmem>>, vector<1x1x32xf32>
    %49 = vector.shape_cast %48 : vector<1x1x32xf32> to vector<1x32xf32>
    %c7_31 = arith.constant 7 : index
    %c0_32 = arith.constant 0 : index
    %50 = vector.load %arg7[%c7_31, %c0_32] : memref<8x32xf32, #tpu.memory_space<vmem>>, vector<1x32xf32>
    tpu.vector_store %arg7[%c7_31, %c0_32], %49 {strides = array<i32>} : memref<8x32xf32, #tpu.memory_space<vmem>>, vector<1x32xf32>,
    %c0_33 = arith.constant 0 : index
    %c0_34 = arith.constant 0 : index
    %51 = vector.load %arg7[%c0_33, %c0_34] : memref<8x32xf32, #tpu.memory_space<vmem>>, vector<8x32xf32>
    %c0_35 = arith.constant 0 : index
    %c0_36 = arith.constant 0 : index
    %c0_37 = arith.constant 0 : index
    %52 = vector.load %arg3[%c0_35, %c0_36, %c0_37] : memref<1x8x96xf32, #tpu.memory_space<vmem>>, vector<1x8x96xf32>
    %53 = vector.shape_cast %52 : vector<1x8x96xf32> to vector<8x96xf32>
    %54 = arith.truncf %51 : vector<8x32xf32> to vector<8x32xbf16>
    %c0_38 = arith.constant 0 : index
    %c0_39 = arith.constant 0 : index
    %55 = vector.load %arg4[%c0_38, %c0_39] : memref<32x96xbf16, #tpu.memory_space<vmem>>, vector<32x96xbf16>
    %cst = arith.constant dense<0.000000e+00> : vector<8x96xf32>
    %56 = tpu.matmul %54, %55, %cst {dimension_numbers = #tpu.dot_dimension_numbers<[1], [0], [0], [1], [0, 0, 1, 1], [], []>} : vector<8x32xbf16>, vector<32x96xbf16>, vector<8x96xf32> -> vector<8x96xf32>
    %c0_40 = arith.constant 0 : index
    %c0_41 = arith.constant 0 : index
    %57 = vector.load %arg5[%c0_40, %c0_41] : memref<1x96xf32, #tpu.memory_space<vmem>>, vector<1x96xf32>
    %58 = vector.broadcast %57 : vector<1x96xf32> to vector<8x96xf32>
    %59 = arith.addf %56, %58 : vector<8x96xf32>
    %60 = vector.extract_strided_slice %53 {offsets = [0, 0], sizes = [8, 32], strides = [1, 1]} : vector<8x96xf32> to vector<8x32xf32>
    %61 = vector.extract_strided_slice %59 {offsets = [0, 0], sizes = [8, 32], strides = [1, 1]} : vector<8x96xf32> to vector<8x32xf32>
    %62 = arith.addf %60, %61 : vector<8x32xf32>
    %63 = arith.negf %62 : vector<8x32xf32>
    %64 = math.exp %63 : vector<8x32xf32>
    %cst_42 = arith.constant 1.000000e+00 : f32
    %65 = vector.broadcast %cst_42 : f32 to vector<8x32xf32>
    %66 = arith.addf %65, %64 : vector<8x32xf32>
    %67 = arith.divf %65, %66 : vector<8x32xf32>
    %68 = vector.extract_strided_slice %53 {offsets = [0, 32], sizes = [8, 32], strides = [1, 1]} : vector<8x96xf32> to vector<8x32xf32>
    %69 = vector.extract_strided_slice %59 {offsets = [0, 32], sizes = [8, 32], strides = [1, 1]} : vector<8x96xf32> to vector<8x32xf32>
    %70 = arith.addf %68, %69 : vector<8x32xf32>
    %71 = arith.negf %70 : vector<8x32xf32>
    %72 = math.exp %71 : vector<8x32xf32>
    %cst_43 = arith.constant 1.000000e+00 : f32
    %73 = vector.broadcast %cst_43 : f32 to vector<8x32xf32>
    %74 = arith.addf %73, %72 : vector<8x32xf32>
    %75 = arith.divf %73, %74 : vector<8x32xf32>
    %76 = vector.extract_strided_slice %53 {offsets = [0, 64], sizes = [8, 32], strides = [1, 1]} : vector<8x96xf32> to vector<8x32xf32>
    %77 = vector.extract_strided_slice %59 {offsets = [0, 64], sizes = [8, 32], strides = [1, 1]} : vector<8x96xf32> to vector<8x32xf32>
    %78 = arith.mulf %67, %77 : vector<8x32xf32>
    %79 = arith.addf %76, %78 : vector<8x32xf32>
    %80 = math.tanh %79 : vector<8x32xf32>
    %cst_44 = arith.constant 1.000000e+00 : f32
    %81 = vector.broadcast %cst_44 : f32 to vector<8x32xf32>
    %82 = arith.subf %81, %75 : vector<8x32xf32>
    %83 = arith.mulf %82, %80 : vector<8x32xf32>
    %84 = arith.mulf %75, %51 : vector<8x32xf32>
    %85 = arith.addf %83, %84 : vector<8x32xf32>
    %86 = arith.index_cast %arg0 : i32 to index
    %c0_45 = arith.constant 0 : index
    %87 = memref.load %arg1[%86, %c0_45] : memref<4x8xi32, #tpu.memory_space<smem>>
    %88 = vector.extract_strided_slice %85 {offsets = [0, 0], sizes = [1, 32], strides = [1, 1]} : vector<8x32xf32> to vector<1x32xf32>
    %89 = arith.index_cast %87 : i32 to index
    %c0_46 = arith.constant 0 : index
    %c0_47 = arith.constant 0 : index
    %90 = vector.load %arg6[%89, %c0_46, %c0_47] : memref<9x2x32xf32, #tpu.memory_space<vmem>>, vector<1x1x32xf32>
    %91 = vector.shape_cast %90 : vector<1x1x32xf32> to vector<1x32xf32>
    %92 = vector.shape_cast %88 : vector<1x32xf32> to vector<1x1x32xf32>
    tpu.vector_store %arg6[%89, %c0_46, %c0_47], %92 {strides = array<i32>} : memref<9x2x32xf32, #tpu.memory_space<vmem>>, vector<1x1x32xf32>,
    %93 = arith.index_cast %arg0 : i32 to index
    %c1_48 = arith.constant 1 : index
    %94 = memref.load %arg1[%93, %c1_48] : memref<4x8xi32, #tpu.memory_space<smem>>
    %95 = vector.extract_strided_slice %85 {offsets = [1, 0], sizes = [1, 32], strides = [1, 1]} : vector<8x32xf32> to vector<1x32xf32>
    %96 = arith.index_cast %94 : i32 to index
    %c0_49 = arith.constant 0 : index
    %c0_50 = arith.constant 0 : index
    %97 = vector.load %arg6[%96, %c0_49, %c0_50] : memref<9x2x32xf32, #tpu.memory_space<vmem>>, vector<1x1x32xf32>
    %98 = vector.shape_cast %97 : vector<1x1x32xf32> to vector<1x32xf32>
    %99 = vector.shape_cast %95 : vector<1x32xf32> to vector<1x1x32xf32>
    tpu.vector_store %arg6[%96, %c0_49, %c0_50], %99 {strides = array<i32>} : memref<9x2x32xf32, #tpu.memory_space<vmem>>, vector<1x1x32xf32>,
    %100 = arith.index_cast %arg0 : i32 to index
    %c2_51 = arith.constant 2 : index
    %101 = memref.load %arg1[%100, %c2_51] : memref<4x8xi32, #tpu.memory_space<smem>>
    %102 = vector.extract_strided_slice %85 {offsets = [2, 0], sizes = [1, 32], strides = [1, 1]} : vector<8x32xf32> to vector<1x32xf32>
    %103 = arith.index_cast %101 : i32 to index
    %c0_52 = arith.constant 0 : index
    %c0_53 = arith.constant 0 : index
    %104 = vector.load %arg6[%103, %c0_52, %c0_53] : memref<9x2x32xf32, #tpu.memory_space<vmem>>, vector<1x1x32xf32>
    %105 = vector.shape_cast %104 : vector<1x1x32xf32> to vector<1x32xf32>
    %106 = vector.shape_cast %102 : vector<1x32xf32> to vector<1x1x32xf32>
    tpu.vector_store %arg6[%103, %c0_52, %c0_53], %106 {strides = array<i32>} : memref<9x2x32xf32, #tpu.memory_space<vmem>>, vector<1x1x32xf32>,
    %107 = arith.index_cast %arg0 : i32 to index
    %c3_54 = arith.constant 3 : index
    %108 = memref.load %arg1[%107, %c3_54] : memref<4x8xi32, #tpu.memory_space<smem>>
    %109 = vector.extract_strided_slice %85 {offsets = [3, 0], sizes = [1, 32], strides = [1, 1]} : vector<8x32xf32> to vector<1x32xf32>
    %110 = arith.index_cast %108 : i32 to index
    %c0_55 = arith.constant 0 : index
    %c0_56 = arith.constant 0 : index
    %111 = vector.load %arg6[%110, %c0_55, %c0_56] : memref<9x2x32xf32, #tpu.memory_space<vmem>>, vector<1x1x32xf32>
    %112 = vector.shape_cast %111 : vector<1x1x32xf32> to vector<1x32xf32>
    %113 = vector.shape_cast %109 : vector<1x32xf32> to vector<1x1x32xf32>
    tpu.vector_store %arg6[%110, %c0_55, %c0_56], %113 {strides = array<i32>} : memref<9x2x32xf32, #tpu.memory_space<vmem>>, vector<1x1x32xf32>,
    %114 = arith.index_cast %arg0 : i32 to index
    %c4_57 = arith.constant 4 : index
    %115 = memref.load %arg1[%114, %c4_57] : memref<4x8xi32, #tpu.memory_space<smem>>
    %116 = vector.extract_strided_slice %85 {offsets = [4, 0], sizes = [1, 32], strides = [1, 1]} : vector<8x32xf32> to vector<1x32xf32>
    %117 = arith.index_cast %115 : i32 to index
    %c1_58 = arith.constant 1 : index
    %c0_59 = arith.constant 0 : index
    %118 = vector.load %arg6[%117, %c1_58, %c0_59] : memref<9x2x32xf32, #tpu.memory_space<vmem>>, vector<1x1x32xf32>
    %119 = vector.shape_cast %118 : vector<1x1x32xf32> to vector<1x32xf32>
    %120 = vector.shape_cast %116 : vector<1x32xf32> to vector<1x1x32xf32>
    tpu.vector_store %arg6[%117, %c1_58, %c0_59], %120 {strides = array<i32>} : memref<9x2x32xf32, #tpu.memory_space<vmem>>, vector<1x1x32xf32>,
    %121 = arith.index_cast %arg0 : i32 to index
    %c5_60 = arith.constant 5 : index
    %122 = memref.load %arg1[%121, %c5_60] : memref<4x8xi32, #tpu.memory_space<smem>>
    %123 = vector.extract_strided_slice %85 {offsets = [5, 0], sizes = [1, 32], strides = [1, 1]} : vector<8x32xf32> to vector<1x32xf32>
    %124 = arith.index_cast %122 : i32 to index
    %c1_61 = arith.constant 1 : index
    %c0_62 = arith.constant 0 : index
    %125 = vector.load %arg6[%124, %c1_61, %c0_62] : memref<9x2x32xf32, #tpu.memory_space<vmem>>, vector<1x1x32xf32>
    %126 = vector.shape_cast %125 : vector<1x1x32xf32> to vector<1x32xf32>
    %127 = vector.shape_cast %123 : vector<1x32xf32> to vector<1x1x32xf32>
    tpu.vector_store %arg6[%124, %c1_61, %c0_62], %127 {strides = array<i32>} : memref<9x2x32xf32, #tpu.memory_space<vmem>>, vector<1x1x32xf32>,
    %128 = arith.index_cast %arg0 : i32 to index
    %c6_63 = arith.constant 6 : index
    %129 = memref.load %arg1[%128, %c6_63] : memref<4x8xi32, #tpu.memory_space<smem>>
    %130 = vector.extract_strided_slice %85 {offsets = [6, 0], sizes = [1, 32], strides = [1, 1]} : vector<8x32xf32> to vector<1x32xf32>
    %131 = arith.index_cast %129 : i32 to index
    %c1_64 = arith.constant 1 : index
    %c0_65 = arith.constant 0 : index
    %132 = vector.load %arg6[%131, %c1_64, %c0_65] : memref<9x2x32xf32, #tpu.memory_space<vmem>>, vector<1x1x32xf32>
    %133 = vector.shape_cast %132 : vector<1x1x32xf32> to vector<1x32xf32>
    %134 = vector.shape_cast %130 : vector<1x32xf32> to vector<1x1x32xf32>
    tpu.vector_store %arg6[%131, %c1_64, %c0_65], %134 {strides = array<i32>} : memref<9x2x32xf32, #tpu.memory_space<vmem>>, vector<1x1x32xf32>,
    %135 = arith.index_cast %arg0 : i32 to index
    %c7_66 = arith.constant 7 : index
    %136 = memref.load %arg1[%135, %c7_66] : memref<4x8xi32, #tpu.memory_space<smem>>
    %137 = vector.extract_strided_slice %85 {offsets = [7, 0], sizes = [1, 32], strides = [1, 1]} : vector<8x32xf32> to vector<1x32xf32>
    %138 = arith.index_cast %136 : i32 to index
    %c1_67 = arith.constant 1 : index
    %c0_68 = arith.constant 0 : index
    %139 = vector.load %arg6[%138, %c1_67, %c0_68] : memref<9x2x32xf32, #tpu.memory_space<vmem>>, vector<1x1x32xf32>
    %140 = vector.shape_cast %139 : vector<1x1x32xf32> to vector<1x32xf32>
    %141 = vector.shape_cast %137 : vector<1x32xf32> to vector<1x1x32xf32>
    tpu.vector_store %arg6[%138, %c1_67, %c0_68], %141 {strides = array<i32>} : memref<9x2x32xf32, #tpu.memory_space<vmem>>, vector<1x1x32xf32>,
    return
  }
  func.func @transform_0(%arg0: i32, %arg1: memref<4x8xi32, #tpu.memory_space<smem>>, %arg2: memref<4x8xi32, #tpu.memory_space<smem>>) -> (i32, i32, i32) {
    %c0_i32 = arith.constant 0 : i32
    %c0_i32_0 = arith.constant 0 : i32
    %c0_i32_1 = arith.constant 0 : i32
    return %arg0, %c0_i32, %c0_i32_0 : i32, i32, i32
  }
  func.func @transform_1(%arg0: i32, %arg1: memref<4x8xi32, #tpu.memory_space<smem>>, %arg2: memref<4x8xi32, #tpu.memory_space<smem>>) -> (i32, i32) {
    %c0_i32 = arith.constant 0 : i32
    %c0_i32_0 = arith.constant 0 : i32
    %c0_i32_1 = arith.constant 0 : i32
    return %c0_i32, %c0_i32_0 : i32, i32
  }
  func.func @transform_2(%arg0: i32, %arg1: memref<4x8xi32, #tpu.memory_space<smem>>, %arg2: memref<4x8xi32, #tpu.memory_space<smem>>) -> (i32, i32) {
    %c0_i32 = arith.constant 0 : i32
    %c0_i32_0 = arith.constant 0 : i32
    %c0_i32_1 = arith.constant 0 : i32
    return %c0_i32, %c0_i32_0 : i32, i32
  }
  func.func @transform_3(%arg0: i32, %arg1: memref<4x8xi32, #tpu.memory_space<smem>>, %arg2: memref<4x8xi32, #tpu.memory_space<smem>>) -> (i32, i32, i32) {
    %c0_i32 = arith.constant 0 : i32
    %c0_i32_0 = arith.constant 0 : i32
    %c0_i32_1 = arith.constant 0 : i32
    %c0_i32_2 = arith.constant 0 : i32
    return %c0_i32, %c0_i32_0, %c0_i32_1 : i32, i32, i32
  }
}

module attributes {stable_mosaic.version = 11 : i64} {
  func.func @kernel(%arg0: i32, %arg1: memref<4x8xi32, #tpu.memory_space<smem>>, %arg2: memref<4x8xi32, #tpu.memory_space<smem>>, %arg3: memref<1x8x96xf32, #tpu.memory_space<vmem>>, %arg4: memref<32x96xbf16, #tpu.memory_space<vmem>>, %arg5: memref<1x96xf32, #tpu.memory_space<vmem>>, %arg6: memref<9x2x32xf32, #tpu.memory_space<vmem>>, %arg7: memref<9x2x32xf32, #tpu.memory_space<vmem>>, %arg8: memref<8x32xf32, #tpu.memory_space<vmem>>) attributes {dimension_semantics = [#tpu.dimension_semantics<arbitrary>], iteration_bounds = array<i64: 4>, scalar_prefetch = 2 : i64, scratch_operands = 2 : i64, tpu.core_type = #tpu.core_type<tc>, window_params = [{transform_indices = @transform_0, window_bounds = array<i64: 1, 8, 96>}, {pipeline_mode = #tpu.pipeline_mode<synchronous>, transform_indices = @transform_1, window_bounds = array<i64: 32, 96>}, {pipeline_mode = #tpu.pipeline_mode<synchronous>, transform_indices = @transform_2, window_bounds = array<i64: 1, 96>}, {pipeline_mode = #tpu.pipeline_mode<synchronous>, transform_indices = @transform_3, window_bounds = array<i64: 9, 2, 32>}]} {
    %c0_i32 = arith.constant 0 : i32
    %0 = arith.cmpi eq, %arg0, %c0_i32 : i32
    %1 = arith.extui %0 : i1 to i32
    %c0_i32_0 = arith.constant 0 : i32
    %2 = arith.cmpi ne, %1, %c0_i32_0 : i32
    scf.if %2 {
      %cst_109 = arith.constant 0.000000e+00 : f32
      %230 = vector.broadcast %cst_109 : f32 to vector<9x2x32xf32>
      %c0_110 = arith.constant 0 : index
      %c0_111 = arith.constant 0 : index
      %c0_112 = arith.constant 0 : index
      %231 = vector.load %arg6[%c0_110, %c0_111, %c0_112] : memref<9x2x32xf32, #tpu.memory_space<vmem>>, vector<9x2x32xf32>
      tpu.vector_store %arg6[%c0_110, %c0_111, %c0_112], %230 {strides = array<i32>} : memref<9x2x32xf32, #tpu.memory_space<vmem>>, vector<9x2x32xf32>,
      %cst_113 = arith.constant 0.000000e+00 : f32
      %232 = vector.broadcast %cst_113 : f32 to vector<9x2x32xf32>
      %c0_114 = arith.constant 0 : index
      %c0_115 = arith.constant 0 : index
      %c0_116 = arith.constant 0 : index
      %233 = vector.load %arg7[%c0_114, %c0_115, %c0_116] : memref<9x2x32xf32, #tpu.memory_space<vmem>>, vector<9x2x32xf32>
      tpu.vector_store %arg7[%c0_114, %c0_115, %c0_116], %232 {strides = array<i32>} : memref<9x2x32xf32, #tpu.memory_space<vmem>>, vector<9x2x32xf32>,
    } else {
    }
    %3 = arith.index_cast %arg0 : i32 to index
    %c0 = arith.constant 0 : index
    %4 = memref.load %arg1[%3, %c0] : memref<4x8xi32, #tpu.memory_space<smem>>
    %5 = arith.index_cast %4 : i32 to index
    %c0_1 = arith.constant 0 : index
    %c0_2 = arith.constant 0 : index
    %6 = vector.load %arg7[%5, %c0_1, %c0_2] : memref<9x2x32xf32, #tpu.memory_space<vmem>>, vector<1x1x32xf32>
    %7 = vector.shape_cast %6 : vector<1x1x32xf32> to vector<1x32xf32>
    %c0_3 = arith.constant 0 : index
    %c0_4 = arith.constant 0 : index
    %8 = vector.load %arg8[%c0_3, %c0_4] : memref<8x32xf32, #tpu.memory_space<vmem>>, vector<1x32xf32>
    tpu.vector_store %arg8[%c0_3, %c0_4], %7 {strides = array<i32>} : memref<8x32xf32, #tpu.memory_space<vmem>>, vector<1x32xf32>,
    %9 = arith.index_cast %arg0 : i32 to index
    %c1 = arith.constant 1 : index
    %10 = memref.load %arg1[%9, %c1] : memref<4x8xi32, #tpu.memory_space<smem>>
    %11 = arith.index_cast %10 : i32 to index
    %c0_5 = arith.constant 0 : index
    %c0_6 = arith.constant 0 : index
    %12 = vector.load %arg7[%11, %c0_5, %c0_6] : memref<9x2x32xf32, #tpu.memory_space<vmem>>, vector<1x1x32xf32>
    %13 = vector.shape_cast %12 : vector<1x1x32xf32> to vector<1x32xf32>
    %c1_7 = arith.constant 1 : index
    %c0_8 = arith.constant 0 : index
    %14 = vector.load %arg8[%c1_7, %c0_8] : memref<8x32xf32, #tpu.memory_space<vmem>>, vector<1x32xf32>
    tpu.vector_store %arg8[%c1_7, %c0_8], %13 {strides = array<i32>} : memref<8x32xf32, #tpu.memory_space<vmem>>, vector<1x32xf32>,
    %15 = arith.index_cast %arg0 : i32 to index
    %c2 = arith.constant 2 : index
    %16 = memref.load %arg1[%15, %c2] : memref<4x8xi32, #tpu.memory_space<smem>>
    %17 = arith.index_cast %16 : i32 to index
    %c0_9 = arith.constant 0 : index
    %c0_10 = arith.constant 0 : index
    %18 = vector.load %arg7[%17, %c0_9, %c0_10] : memref<9x2x32xf32, #tpu.memory_space<vmem>>, vector<1x1x32xf32>
    %19 = vector.shape_cast %18 : vector<1x1x32xf32> to vector<1x32xf32>
    %c2_11 = arith.constant 2 : index
    %c0_12 = arith.constant 0 : index
    %20 = vector.load %arg8[%c2_11, %c0_12] : memref<8x32xf32, #tpu.memory_space<vmem>>, vector<1x32xf32>
    tpu.vector_store %arg8[%c2_11, %c0_12], %19 {strides = array<i32>} : memref<8x32xf32, #tpu.memory_space<vmem>>, vector<1x32xf32>,
    %21 = arith.index_cast %arg0 : i32 to index
    %c3 = arith.constant 3 : index
    %22 = memref.load %arg1[%21, %c3] : memref<4x8xi32, #tpu.memory_space<smem>>
    %23 = arith.index_cast %22 : i32 to index
    %c0_13 = arith.constant 0 : index
    %c0_14 = arith.constant 0 : index
    %24 = vector.load %arg7[%23, %c0_13, %c0_14] : memref<9x2x32xf32, #tpu.memory_space<vmem>>, vector<1x1x32xf32>
    %25 = vector.shape_cast %24 : vector<1x1x32xf32> to vector<1x32xf32>
    %c3_15 = arith.constant 3 : index
    %c0_16 = arith.constant 0 : index
    %26 = vector.load %arg8[%c3_15, %c0_16] : memref<8x32xf32, #tpu.memory_space<vmem>>, vector<1x32xf32>
    tpu.vector_store %arg8[%c3_15, %c0_16], %25 {strides = array<i32>} : memref<8x32xf32, #tpu.memory_space<vmem>>, vector<1x32xf32>,
    %27 = arith.index_cast %arg0 : i32 to index
    %c4 = arith.constant 4 : index
    %28 = memref.load %arg1[%27, %c4] : memref<4x8xi32, #tpu.memory_space<smem>>
    %29 = arith.index_cast %28 : i32 to index
    %c1_17 = arith.constant 1 : index
    %c0_18 = arith.constant 0 : index
    %30 = vector.load %arg7[%29, %c1_17, %c0_18] : memref<9x2x32xf32, #tpu.memory_space<vmem>>, vector<1x1x32xf32>
    %31 = vector.shape_cast %30 : vector<1x1x32xf32> to vector<1x32xf32>
    %c4_19 = arith.constant 4 : index
    %c0_20 = arith.constant 0 : index
    %32 = vector.load %arg8[%c4_19, %c0_20] : memref<8x32xf32, #tpu.memory_space<vmem>>, vector<1x32xf32>
    tpu.vector_store %arg8[%c4_19, %c0_20], %31 {strides = array<i32>} : memref<8x32xf32, #tpu.memory_space<vmem>>, vector<1x32xf32>,
    %33 = arith.index_cast %arg0 : i32 to index
    %c5 = arith.constant 5 : index
    %34 = memref.load %arg1[%33, %c5] : memref<4x8xi32, #tpu.memory_space<smem>>
    %35 = arith.index_cast %34 : i32 to index
    %c1_21 = arith.constant 1 : index
    %c0_22 = arith.constant 0 : index
    %36 = vector.load %arg7[%35, %c1_21, %c0_22] : memref<9x2x32xf32, #tpu.memory_space<vmem>>, vector<1x1x32xf32>
    %37 = vector.shape_cast %36 : vector<1x1x32xf32> to vector<1x32xf32>
    %c5_23 = arith.constant 5 : index
    %c0_24 = arith.constant 0 : index
    %38 = vector.load %arg8[%c5_23, %c0_24] : memref<8x32xf32, #tpu.memory_space<vmem>>, vector<1x32xf32>
    tpu.vector_store %arg8[%c5_23, %c0_24], %37 {strides = array<i32>} : memref<8x32xf32, #tpu.memory_space<vmem>>, vector<1x32xf32>,
    %39 = arith.index_cast %arg0 : i32 to index
    %c6 = arith.constant 6 : index
    %40 = memref.load %arg1[%39, %c6] : memref<4x8xi32, #tpu.memory_space<smem>>
    %41 = arith.index_cast %40 : i32 to index
    %c1_25 = arith.constant 1 : index
    %c0_26 = arith.constant 0 : index
    %42 = vector.load %arg7[%41, %c1_25, %c0_26] : memref<9x2x32xf32, #tpu.memory_space<vmem>>, vector<1x1x32xf32>
    %43 = vector.shape_cast %42 : vector<1x1x32xf32> to vector<1x32xf32>
    %c6_27 = arith.constant 6 : index
    %c0_28 = arith.constant 0 : index
    %44 = vector.load %arg8[%c6_27, %c0_28] : memref<8x32xf32, #tpu.memory_space<vmem>>, vector<1x32xf32>
    tpu.vector_store %arg8[%c6_27, %c0_28], %43 {strides = array<i32>} : memref<8x32xf32, #tpu.memory_space<vmem>>, vector<1x32xf32>,
    %45 = arith.index_cast %arg0 : i32 to index
    %c7 = arith.constant 7 : index
    %46 = memref.load %arg1[%45, %c7] : memref<4x8xi32, #tpu.memory_space<smem>>
    %47 = arith.index_cast %46 : i32 to index
    %c1_29 = arith.constant 1 : index
    %c0_30 = arith.constant 0 : index
    %48 = vector.load %arg7[%47, %c1_29, %c0_30] : memref<9x2x32xf32, #tpu.memory_space<vmem>>, vector<1x1x32xf32>
    %49 = vector.shape_cast %48 : vector<1x1x32xf32> to vector<1x32xf32>
    %c7_31 = arith.constant 7 : index
    %c0_32 = arith.constant 0 : index
    %50 = vector.load %arg8[%c7_31, %c0_32] : memref<8x32xf32, #tpu.memory_space<vmem>>, vector<1x32xf32>
    tpu.vector_store %arg8[%c7_31, %c0_32], %49 {strides = array<i32>} : memref<8x32xf32, #tpu.memory_space<vmem>>, vector<1x32xf32>,
    %c0_33 = arith.constant 0 : index
    %c0_34 = arith.constant 0 : index
    %51 = vector.load %arg8[%c0_33, %c0_34] : memref<8x32xf32, #tpu.memory_space<vmem>>, vector<8x32xf32>
    %c0_35 = arith.constant 0 : index
    %c0_36 = arith.constant 0 : index
    %c0_37 = arith.constant 0 : index
    %52 = vector.load %arg3[%c0_35, %c0_36, %c0_37] : memref<1x8x96xf32, #tpu.memory_space<vmem>>, vector<1x8x96xf32>
    %53 = vector.shape_cast %52 : vector<1x8x96xf32> to vector<8x96xf32>
    %54 = arith.truncf %51 : vector<8x32xf32> to vector<8x32xbf16>
    %c0_38 = arith.constant 0 : index
    %c0_39 = arith.constant 0 : index
    %55 = vector.load %arg4[%c0_38, %c0_39] : memref<32x96xbf16, #tpu.memory_space<vmem>>, vector<32x96xbf16>
    %cst = arith.constant dense<0.000000e+00> : vector<8x96xf32>
    %56 = tpu.matmul %54, %55, %cst {dimension_numbers = #tpu.dot_dimension_numbers<[1], [0], [0], [1], [0, 0, 1, 1], [], []>} : vector<8x32xbf16>, vector<32x96xbf16>, vector<8x96xf32> -> vector<8x96xf32>
    %c0_40 = arith.constant 0 : index
    %c0_41 = arith.constant 0 : index
    %57 = vector.load %arg5[%c0_40, %c0_41] : memref<1x96xf32, #tpu.memory_space<vmem>>, vector<1x96xf32>
    %58 = vector.broadcast %57 : vector<1x96xf32> to vector<8x96xf32>
    %59 = arith.addf %56, %58 : vector<8x96xf32>
    %60 = vector.extract_strided_slice %53 {offsets = [0, 0], sizes = [8, 32], strides = [1, 1]} : vector<8x96xf32> to vector<8x32xf32>
    %61 = vector.extract_strided_slice %59 {offsets = [0, 0], sizes = [8, 32], strides = [1, 1]} : vector<8x96xf32> to vector<8x32xf32>
    %62 = arith.addf %60, %61 : vector<8x32xf32>
    %63 = arith.negf %62 : vector<8x32xf32>
    %64 = math.exp %63 : vector<8x32xf32>
    %cst_42 = arith.constant 1.000000e+00 : f32
    %65 = vector.broadcast %cst_42 : f32 to vector<8x32xf32>
    %66 = arith.addf %65, %64 : vector<8x32xf32>
    %67 = arith.divf %65, %66 : vector<8x32xf32>
    %68 = vector.extract_strided_slice %53 {offsets = [0, 32], sizes = [8, 32], strides = [1, 1]} : vector<8x96xf32> to vector<8x32xf32>
    %69 = vector.extract_strided_slice %59 {offsets = [0, 32], sizes = [8, 32], strides = [1, 1]} : vector<8x96xf32> to vector<8x32xf32>
    %70 = arith.addf %68, %69 : vector<8x32xf32>
    %71 = arith.negf %70 : vector<8x32xf32>
    %72 = math.exp %71 : vector<8x32xf32>
    %cst_43 = arith.constant 1.000000e+00 : f32
    %73 = vector.broadcast %cst_43 : f32 to vector<8x32xf32>
    %74 = arith.addf %73, %72 : vector<8x32xf32>
    %75 = arith.divf %73, %74 : vector<8x32xf32>
    %76 = vector.extract_strided_slice %53 {offsets = [0, 64], sizes = [8, 32], strides = [1, 1]} : vector<8x96xf32> to vector<8x32xf32>
    %77 = vector.extract_strided_slice %59 {offsets = [0, 64], sizes = [8, 32], strides = [1, 1]} : vector<8x96xf32> to vector<8x32xf32>
    %78 = arith.mulf %67, %77 : vector<8x32xf32>
    %79 = arith.addf %76, %78 : vector<8x32xf32>
    %80 = math.tanh %79 : vector<8x32xf32>
    %cst_44 = arith.constant 1.000000e+00 : f32
    %81 = vector.broadcast %cst_44 : f32 to vector<8x32xf32>
    %82 = arith.subf %81, %75 : vector<8x32xf32>
    %83 = arith.mulf %82, %80 : vector<8x32xf32>
    %84 = arith.mulf %75, %51 : vector<8x32xf32>
    %85 = arith.addf %83, %84 : vector<8x32xf32>
    %86 = arith.index_cast %arg0 : i32 to index
    %c0_45 = arith.constant 0 : index
    %87 = memref.load %arg1[%86, %c0_45] : memref<4x8xi32, #tpu.memory_space<smem>>
    %88 = vector.extract_strided_slice %85 {offsets = [0, 0], sizes = [1, 32], strides = [1, 1]} : vector<8x32xf32> to vector<1x32xf32>
    %89 = arith.index_cast %87 : i32 to index
    %c0_46 = arith.constant 0 : index
    %c0_47 = arith.constant 0 : index
    %90 = vector.load %arg6[%89, %c0_46, %c0_47] : memref<9x2x32xf32, #tpu.memory_space<vmem>>, vector<1x1x32xf32>
    %91 = vector.shape_cast %90 : vector<1x1x32xf32> to vector<1x32xf32>
    %92 = vector.shape_cast %88 : vector<1x32xf32> to vector<1x1x32xf32>
    tpu.vector_store %arg6[%89, %c0_46, %c0_47], %92 {strides = array<i32>} : memref<9x2x32xf32, #tpu.memory_space<vmem>>, vector<1x1x32xf32>,
    %93 = arith.index_cast %arg0 : i32 to index
    %c0_48 = arith.constant 0 : index
    %94 = memref.load %arg2[%93, %c0_48] : memref<4x8xi32, #tpu.memory_space<smem>>
    %95 = arith.index_cast %94 : i32 to index
    %c0_49 = arith.constant 0 : index
    %c0_50 = arith.constant 0 : index
    %96 = vector.load %arg7[%95, %c0_49, %c0_50] : memref<9x2x32xf32, #tpu.memory_space<vmem>>, vector<1x1x32xf32>
    %97 = vector.shape_cast %96 : vector<1x1x32xf32> to vector<1x32xf32>
    %98 = vector.extract_strided_slice %85 {offsets = [0, 0], sizes = [1, 32], strides = [1, 1]} : vector<8x32xf32> to vector<1x32xf32>
    %99 = arith.addf %97, %98 : vector<1x32xf32>
    %100 = arith.index_cast %94 : i32 to index
    %c0_51 = arith.constant 0 : index
    %c0_52 = arith.constant 0 : index
    %101 = vector.load %arg7[%100, %c0_51, %c0_52] : memref<9x2x32xf32, #tpu.memory_space<vmem>>, vector<1x1x32xf32>
    %102 = vector.shape_cast %101 : vector<1x1x32xf32> to vector<1x32xf32>
    %103 = vector.shape_cast %99 : vector<1x32xf32> to vector<1x1x32xf32>
    tpu.vector_store %arg7[%100, %c0_51, %c0_52], %103 {strides = array<i32>} : memref<9x2x32xf32, #tpu.memory_space<vmem>>, vector<1x1x32xf32>,
    %104 = arith.index_cast %arg0 : i32 to index
    %c1_53 = arith.constant 1 : index
    %105 = memref.load %arg1[%104, %c1_53] : memref<4x8xi32, #tpu.memory_space<smem>>
    %106 = vector.extract_strided_slice %85 {offsets = [1, 0], sizes = [1, 32], strides = [1, 1]} : vector<8x32xf32> to vector<1x32xf32>
    %107 = arith.index_cast %105 : i32 to index
    %c0_54 = arith.constant 0 : index
    %c0_55 = arith.constant 0 : index
    %108 = vector.load %arg6[%107, %c0_54, %c0_55] : memref<9x2x32xf32, #tpu.memory_space<vmem>>, vector<1x1x32xf32>
    %109 = vector.shape_cast %108 : vector<1x1x32xf32> to vector<1x32xf32>
    %110 = vector.shape_cast %106 : vector<1x32xf32> to vector<1x1x32xf32>
    tpu.vector_store %arg6[%107, %c0_54, %c0_55], %110 {strides = array<i32>} : memref<9x2x32xf32, #tpu.memory_space<vmem>>, vector<1x1x32xf32>,
    %111 = arith.index_cast %arg0 : i32 to index
    %c1_56 = arith.constant 1 : index
    %112 = memref.load %arg2[%111, %c1_56] : memref<4x8xi32, #tpu.memory_space<smem>>
    %113 = arith.index_cast %112 : i32 to index
    %c0_57 = arith.constant 0 : index
    %c0_58 = arith.constant 0 : index
    %114 = vector.load %arg7[%113, %c0_57, %c0_58] : memref<9x2x32xf32, #tpu.memory_space<vmem>>, vector<1x1x32xf32>
    %115 = vector.shape_cast %114 : vector<1x1x32xf32> to vector<1x32xf32>
    %116 = vector.extract_strided_slice %85 {offsets = [1, 0], sizes = [1, 32], strides = [1, 1]} : vector<8x32xf32> to vector<1x32xf32>
    %117 = arith.addf %115, %116 : vector<1x32xf32>
    %118 = arith.index_cast %112 : i32 to index
    %c0_59 = arith.constant 0 : index
    %c0_60 = arith.constant 0 : index
    %119 = vector.load %arg7[%118, %c0_59, %c0_60] : memref<9x2x32xf32, #tpu.memory_space<vmem>>, vector<1x1x32xf32>
    %120 = vector.shape_cast %119 : vector<1x1x32xf32> to vector<1x32xf32>
    %121 = vector.shape_cast %117 : vector<1x32xf32> to vector<1x1x32xf32>
    tpu.vector_store %arg7[%118, %c0_59, %c0_60], %121 {strides = array<i32>} : memref<9x2x32xf32, #tpu.memory_space<vmem>>, vector<1x1x32xf32>,
    %122 = arith.index_cast %arg0 : i32 to index
    %c2_61 = arith.constant 2 : index
    %123 = memref.load %arg1[%122, %c2_61] : memref<4x8xi32, #tpu.memory_space<smem>>
    %124 = vector.extract_strided_slice %85 {offsets = [2, 0], sizes = [1, 32], strides = [1, 1]} : vector<8x32xf32> to vector<1x32xf32>
    %125 = arith.index_cast %123 : i32 to index
    %c0_62 = arith.constant 0 : index
    %c0_63 = arith.constant 0 : index
    %126 = vector.load %arg6[%125, %c0_62, %c0_63] : memref<9x2x32xf32, #tpu.memory_space<vmem>>, vector<1x1x32xf32>
    %127 = vector.shape_cast %126 : vector<1x1x32xf32> to vector<1x32xf32>
    %128 = vector.shape_cast %124 : vector<1x32xf32> to vector<1x1x32xf32>
    tpu.vector_store %arg6[%125, %c0_62, %c0_63], %128 {strides = array<i32>} : memref<9x2x32xf32, #tpu.memory_space<vmem>>, vector<1x1x32xf32>,
    %129 = arith.index_cast %arg0 : i32 to index
    %c2_64 = arith.constant 2 : index
    %130 = memref.load %arg2[%129, %c2_64] : memref<4x8xi32, #tpu.memory_space<smem>>
    %131 = arith.index_cast %130 : i32 to index
    %c0_65 = arith.constant 0 : index
    %c0_66 = arith.constant 0 : index
    %132 = vector.load %arg7[%131, %c0_65, %c0_66] : memref<9x2x32xf32, #tpu.memory_space<vmem>>, vector<1x1x32xf32>
    %133 = vector.shape_cast %132 : vector<1x1x32xf32> to vector<1x32xf32>
    %134 = vector.extract_strided_slice %85 {offsets = [2, 0], sizes = [1, 32], strides = [1, 1]} : vector<8x32xf32> to vector<1x32xf32>
    %135 = arith.addf %133, %134 : vector<1x32xf32>
    %136 = arith.index_cast %130 : i32 to index
    %c0_67 = arith.constant 0 : index
    %c0_68 = arith.constant 0 : index
    %137 = vector.load %arg7[%136, %c0_67, %c0_68] : memref<9x2x32xf32, #tpu.memory_space<vmem>>, vector<1x1x32xf32>
    %138 = vector.shape_cast %137 : vector<1x1x32xf32> to vector<1x32xf32>
    %139 = vector.shape_cast %135 : vector<1x32xf32> to vector<1x1x32xf32>
    tpu.vector_store %arg7[%136, %c0_67, %c0_68], %139 {strides = array<i32>} : memref<9x2x32xf32, #tpu.memory_space<vmem>>, vector<1x1x32xf32>,
    %140 = arith.index_cast %arg0 : i32 to index
    %c3_69 = arith.constant 3 : index
    %141 = memref.load %arg1[%140, %c3_69] : memref<4x8xi32, #tpu.memory_space<smem>>
    %142 = vector.extract_strided_slice %85 {offsets = [3, 0], sizes = [1, 32], strides = [1, 1]} : vector<8x32xf32> to vector<1x32xf32>
    %143 = arith.index_cast %141 : i32 to index
    %c0_70 = arith.constant 0 : index
    %c0_71 = arith.constant 0 : index
    %144 = vector.load %arg6[%143, %c0_70, %c0_71] : memref<9x2x32xf32, #tpu.memory_space<vmem>>, vector<1x1x32xf32>
    %145 = vector.shape_cast %144 : vector<1x1x32xf32> to vector<1x32xf32>
    %146 = vector.shape_cast %142 : vector<1x32xf32> to vector<1x1x32xf32>
    tpu.vector_store %arg6[%143, %c0_70, %c0_71], %146 {strides = array<i32>} : memref<9x2x32xf32, #tpu.memory_space<vmem>>, vector<1x1x32xf32>,
    %147 = arith.index_cast %arg0 : i32 to index
    %c3_72 = arith.constant 3 : index
    %148 = memref.load %arg2[%147, %c3_72] : memref<4x8xi32, #tpu.memory_space<smem>>
    %149 = arith.index_cast %148 : i32 to index
    %c0_73 = arith.constant 0 : index
    %c0_74 = arith.constant 0 : index
    %150 = vector.load %arg7[%149, %c0_73, %c0_74] : memref<9x2x32xf32, #tpu.memory_space<vmem>>, vector<1x1x32xf32>
    %151 = vector.shape_cast %150 : vector<1x1x32xf32> to vector<1x32xf32>
    %152 = vector.extract_strided_slice %85 {offsets = [3, 0], sizes = [1, 32], strides = [1, 1]} : vector<8x32xf32> to vector<1x32xf32>
    %153 = arith.addf %151, %152 : vector<1x32xf32>
    %154 = arith.index_cast %148 : i32 to index
    %c0_75 = arith.constant 0 : index
    %c0_76 = arith.constant 0 : index
    %155 = vector.load %arg7[%154, %c0_75, %c0_76] : memref<9x2x32xf32, #tpu.memory_space<vmem>>, vector<1x1x32xf32>
    %156 = vector.shape_cast %155 : vector<1x1x32xf32> to vector<1x32xf32>
    %157 = vector.shape_cast %153 : vector<1x32xf32> to vector<1x1x32xf32>
    tpu.vector_store %arg7[%154, %c0_75, %c0_76], %157 {strides = array<i32>} : memref<9x2x32xf32, #tpu.memory_space<vmem>>, vector<1x1x32xf32>,
    %158 = arith.index_cast %arg0 : i32 to index
    %c4_77 = arith.constant 4 : index
    %159 = memref.load %arg1[%158, %c4_77] : memref<4x8xi32, #tpu.memory_space<smem>>
    %160 = vector.extract_strided_slice %85 {offsets = [4, 0], sizes = [1, 32], strides = [1, 1]} : vector<8x32xf32> to vector<1x32xf32>
    %161 = arith.index_cast %159 : i32 to index
    %c1_78 = arith.constant 1 : index
    %c0_79 = arith.constant 0 : index
    %162 = vector.load %arg6[%161, %c1_78, %c0_79] : memref<9x2x32xf32, #tpu.memory_space<vmem>>, vector<1x1x32xf32>
    %163 = vector.shape_cast %162 : vector<1x1x32xf32> to vector<1x32xf32>
    %164 = vector.shape_cast %160 : vector<1x32xf32> to vector<1x1x32xf32>
    tpu.vector_store %arg6[%161, %c1_78, %c0_79], %164 {strides = array<i32>} : memref<9x2x32xf32, #tpu.memory_space<vmem>>, vector<1x1x32xf32>,
    %165 = arith.index_cast %arg0 : i32 to index
    %c4_80 = arith.constant 4 : index
    %166 = memref.load %arg2[%165, %c4_80] : memref<4x8xi32, #tpu.memory_space<smem>>
    %167 = arith.index_cast %166 : i32 to index
    %c1_81 = arith.constant 1 : index
    %c0_82 = arith.constant 0 : index
    %168 = vector.load %arg7[%167, %c1_81, %c0_82] : memref<9x2x32xf32, #tpu.memory_space<vmem>>, vector<1x1x32xf32>
    %169 = vector.shape_cast %168 : vector<1x1x32xf32> to vector<1x32xf32>
    %170 = vector.extract_strided_slice %85 {offsets = [4, 0], sizes = [1, 32], strides = [1, 1]} : vector<8x32xf32> to vector<1x32xf32>
    %171 = arith.addf %169, %170 : vector<1x32xf32>
    %172 = arith.index_cast %166 : i32 to index
    %c1_83 = arith.constant 1 : index
    %c0_84 = arith.constant 0 : index
    %173 = vector.load %arg7[%172, %c1_83, %c0_84] : memref<9x2x32xf32, #tpu.memory_space<vmem>>, vector<1x1x32xf32>
    %174 = vector.shape_cast %173 : vector<1x1x32xf32> to vector<1x32xf32>
    %175 = vector.shape_cast %171 : vector<1x32xf32> to vector<1x1x32xf32>
    tpu.vector_store %arg7[%172, %c1_83, %c0_84], %175 {strides = array<i32>} : memref<9x2x32xf32, #tpu.memory_space<vmem>>, vector<1x1x32xf32>,
    %176 = arith.index_cast %arg0 : i32 to index
    %c5_85 = arith.constant 5 : index
    %177 = memref.load %arg1[%176, %c5_85] : memref<4x8xi32, #tpu.memory_space<smem>>
    %178 = vector.extract_strided_slice %85 {offsets = [5, 0], sizes = [1, 32], strides = [1, 1]} : vector<8x32xf32> to vector<1x32xf32>
    %179 = arith.index_cast %177 : i32 to index
    %c1_86 = arith.constant 1 : index
    %c0_87 = arith.constant 0 : index
    %180 = vector.load %arg6[%179, %c1_86, %c0_87] : memref<9x2x32xf32, #tpu.memory_space<vmem>>, vector<1x1x32xf32>
    %181 = vector.shape_cast %180 : vector<1x1x32xf32> to vector<1x32xf32>
    %182 = vector.shape_cast %178 : vector<1x32xf32> to vector<1x1x32xf32>
    tpu.vector_store %arg6[%179, %c1_86, %c0_87], %182 {strides = array<i32>} : memref<9x2x32xf32, #tpu.memory_space<vmem>>, vector<1x1x32xf32>,
    %183 = arith.index_cast %arg0 : i32 to index
    %c5_88 = arith.constant 5 : index
    %184 = memref.load %arg2[%183, %c5_88] : memref<4x8xi32, #tpu.memory_space<smem>>
    %185 = arith.index_cast %184 : i32 to index
    %c1_89 = arith.constant 1 : index
    %c0_90 = arith.constant 0 : index
    %186 = vector.load %arg7[%185, %c1_89, %c0_90] : memref<9x2x32xf32, #tpu.memory_space<vmem>>, vector<1x1x32xf32>
    %187 = vector.shape_cast %186 : vector<1x1x32xf32> to vector<1x32xf32>
    %188 = vector.extract_strided_slice %85 {offsets = [5, 0], sizes = [1, 32], strides = [1, 1]} : vector<8x32xf32> to vector<1x32xf32>
    %189 = arith.addf %187, %188 : vector<1x32xf32>
    %190 = arith.index_cast %184 : i32 to index
    %c1_91 = arith.constant 1 : index
    %c0_92 = arith.constant 0 : index
    %191 = vector.load %arg7[%190, %c1_91, %c0_92] : memref<9x2x32xf32, #tpu.memory_space<vmem>>, vector<1x1x32xf32>
    %192 = vector.shape_cast %191 : vector<1x1x32xf32> to vector<1x32xf32>
    %193 = vector.shape_cast %189 : vector<1x32xf32> to vector<1x1x32xf32>
    tpu.vector_store %arg7[%190, %c1_91, %c0_92], %193 {strides = array<i32>} : memref<9x2x32xf32, #tpu.memory_space<vmem>>, vector<1x1x32xf32>,
    %194 = arith.index_cast %arg0 : i32 to index
    %c6_93 = arith.constant 6 : index
    %195 = memref.load %arg1[%194, %c6_93] : memref<4x8xi32, #tpu.memory_space<smem>>
    %196 = vector.extract_strided_slice %85 {offsets = [6, 0], sizes = [1, 32], strides = [1, 1]} : vector<8x32xf32> to vector<1x32xf32>
    %197 = arith.index_cast %195 : i32 to index
    %c1_94 = arith.constant 1 : index
    %c0_95 = arith.constant 0 : index
    %198 = vector.load %arg6[%197, %c1_94, %c0_95] : memref<9x2x32xf32, #tpu.memory_space<vmem>>, vector<1x1x32xf32>
    %199 = vector.shape_cast %198 : vector<1x1x32xf32> to vector<1x32xf32>
    %200 = vector.shape_cast %196 : vector<1x32xf32> to vector<1x1x32xf32>
    tpu.vector_store %arg6[%197, %c1_94, %c0_95], %200 {strides = array<i32>} : memref<9x2x32xf32, #tpu.memory_space<vmem>>, vector<1x1x32xf32>,
    %201 = arith.index_cast %arg0 : i32 to index
    %c6_96 = arith.constant 6 : index
    %202 = memref.load %arg2[%201, %c6_96] : memref<4x8xi32, #tpu.memory_space<smem>>
    %203 = arith.index_cast %202 : i32 to index
    %c1_97 = arith.constant 1 : index
    %c0_98 = arith.constant 0 : index
    %204 = vector.load %arg7[%203, %c1_97, %c0_98] : memref<9x2x32xf32, #tpu.memory_space<vmem>>, vector<1x1x32xf32>
    %205 = vector.shape_cast %204 : vector<1x1x32xf32> to vector<1x32xf32>
    %206 = vector.extract_strided_slice %85 {offsets = [6, 0], sizes = [1, 32], strides = [1, 1]} : vector<8x32xf32> to vector<1x32xf32>
    %207 = arith.addf %205, %206 : vector<1x32xf32>
    %208 = arith.index_cast %202 : i32 to index
    %c1_99 = arith.constant 1 : index
    %c0_100 = arith.constant 0 : index
    %209 = vector.load %arg7[%208, %c1_99, %c0_100] : memref<9x2x32xf32, #tpu.memory_space<vmem>>, vector<1x1x32xf32>
    %210 = vector.shape_cast %209 : vector<1x1x32xf32> to vector<1x32xf32>
    %211 = vector.shape_cast %207 : vector<1x32xf32> to vector<1x1x32xf32>
    tpu.vector_store %arg7[%208, %c1_99, %c0_100], %211 {strides = array<i32>} : memref<9x2x32xf32, #tpu.memory_space<vmem>>, vector<1x1x32xf32>,
    %212 = arith.index_cast %arg0 : i32 to index
    %c7_101 = arith.constant 7 : index
    %213 = memref.load %arg1[%212, %c7_101] : memref<4x8xi32, #tpu.memory_space<smem>>
    %214 = vector.extract_strided_slice %85 {offsets = [7, 0], sizes = [1, 32], strides = [1, 1]} : vector<8x32xf32> to vector<1x32xf32>
    %215 = arith.index_cast %213 : i32 to index
    %c1_102 = arith.constant 1 : index
    %c0_103 = arith.constant 0 : index
    %216 = vector.load %arg6[%215, %c1_102, %c0_103] : memref<9x2x32xf32, #tpu.memory_space<vmem>>, vector<1x1x32xf32>
    %217 = vector.shape_cast %216 : vector<1x1x32xf32> to vector<1x32xf32>
    %218 = vector.shape_cast %214 : vector<1x32xf32> to vector<1x1x32xf32>
    tpu.vector_store %arg6[%215, %c1_102, %c0_103], %218 {strides = array<i32>} : memref<9x2x32xf32, #tpu.memory_space<vmem>>, vector<1x1x32xf32>,
    %219 = arith.index_cast %arg0 : i32 to index
    %c7_104 = arith.constant 7 : index
    %220 = memref.load %arg2[%219, %c7_104] : memref<4x8xi32, #tpu.memory_space<smem>>
    %221 = arith.index_cast %220 : i32 to index
    %c1_105 = arith.constant 1 : index
    %c0_106 = arith.constant 0 : index
    %222 = vector.load %arg7[%221, %c1_105, %c0_106] : memref<9x2x32xf32, #tpu.memory_space<vmem>>, vector<1x1x32xf32>
    %223 = vector.shape_cast %222 : vector<1x1x32xf32> to vector<1x32xf32>
    %224 = vector.extract_strided_slice %85 {offsets = [7, 0], sizes = [1, 32], strides = [1, 1]} : vector<8x32xf32> to vector<1x32xf32>
    %225 = arith.addf %223, %224 : vector<1x32xf32>
    %226 = arith.index_cast %220 : i32 to index
    %c1_107 = arith.constant 1 : index
    %c0_108 = arith.constant 0 : index
    %227 = vector.load %arg7[%226, %c1_107, %c0_108] : memref<9x2x32xf32, #tpu.memory_space<vmem>>, vector<1x1x32xf32>
    %228 = vector.shape_cast %227 : vector<1x1x32xf32> to vector<1x32xf32>
    %229 = vector.shape_cast %225 : vector<1x32xf32> to vector<1x1x32xf32>
    tpu.vector_store %arg7[%226, %c1_107, %c0_108], %229 {strides = array<i32>} : memref<9x2x32xf32, #tpu.memory_space<vmem>>, vector<1x1x32xf32>,
    return
  }
  func.func @transform_0(%arg0: i32, %arg1: memref<4x8xi32, #tpu.memory_space<smem>>, %arg2: memref<4x8xi32, #tpu.memory_space<smem>>) -> (i32, i32, i32) {
    %c0_i32 = arith.constant 0 : i32
    %c0_i32_0 = arith.constant 0 : i32
    %c0_i32_1 = arith.constant 0 : i32
    return %arg0, %c0_i32, %c0_i32_0 : i32, i32, i32
  }
  func.func @transform_1(%arg0: i32, %arg1: memref<4x8xi32, #tpu.memory_space<smem>>, %arg2: memref<4x8xi32, #tpu.memory_space<smem>>) -> (i32, i32) {
    %c0_i32 = arith.constant 0 : i32
    %c0_i32_0 = arith.constant 0 : i32
    %c0_i32_1 = arith.constant 0 : i32
    return %c0_i32, %c0_i32_0 : i32, i32
  }
  func.func @transform_2(%arg0: i32, %arg1: memref<4x8xi32, #tpu.memory_space<smem>>, %arg2: memref<4x8xi32, #tpu.memory_space<smem>>) -> (i32, i32) {
    %c0_i32 = arith.constant 0 : i32
    %c0_i32_0 = arith.constant 0 : i32
    %c0_i32_1 = arith.constant 0 : i32
    return %c0_i32, %c0_i32_0 : i32, i32
  }
  func.func @transform_3(%arg0: i32, %arg1: memref<4x8xi32, #tpu.memory_space<smem>>, %arg2: memref<4x8xi32, #tpu.memory_space<smem>>) -> (i32, i32, i32) {
    %c0_i32 = arith.constant 0 : i32
    %c0_i32_0 = arith.constant 0 : i32
    %c0_i32_1 = arith.constant 0 : i32
    %c0_i32_2 = arith.constant 0 : i32
    return %c0_i32, %c0_i32_0, %c0_i32_1 : i32, i32, i32
  }
}

module attributes {stable_mosaic.version = 11 : i64} {
  func.func @_linear_kernel(%arg0: i32, %arg1: memref<16x64xbf16, #tpu.memory_space<vmem>>, %arg2: memref<64x32xbf16, #tpu.memory_space<vmem>>, %arg3: memref<1x32xf32, #tpu.memory_space<vmem>>, %arg4: memref<16x32xf32, #tpu.memory_space<vmem>>) attributes {dimension_semantics = [#tpu.dimension_semantics<parallel>], iteration_bounds = array<i64: 1>, scalar_prefetch = 0 : i64, scratch_operands = 0 : i64, tpu.core_type = #tpu.core_type<tc>, window_params = [{transform_indices = @transform_0, window_bounds = array<i64: 16, 64>}, {pipeline_mode = #tpu.pipeline_mode<synchronous>, transform_indices = @transform_1, window_bounds = array<i64: 64, 32>}, {pipeline_mode = #tpu.pipeline_mode<synchronous>, transform_indices = @transform_2, window_bounds = array<i64: 1, 32>}, {transform_indices = @transform_3, window_bounds = array<i64: 16, 32>}]} {
    %c0 = arith.constant 0 : index
    %c0_0 = arith.constant 0 : index
    %0 = vector.load %arg1[%c0, %c0_0] : memref<16x64xbf16, #tpu.memory_space<vmem>>, vector<16x64xbf16>
    %c0_1 = arith.constant 0 : index
    %c0_2 = arith.constant 0 : index
    %1 = vector.load %arg2[%c0_1, %c0_2] : memref<64x32xbf16, #tpu.memory_space<vmem>>, vector<64x32xbf16>
    %cst = arith.constant dense<0.000000e+00> : vector<16x32xf32>
    %2 = tpu.matmul %0, %1, %cst {dimension_numbers = #tpu.dot_dimension_numbers<[1], [0], [0], [1], [0, 0, 1, 1], [], []>} : vector<16x64xbf16>, vector<64x32xbf16>, vector<16x32xf32> -> vector<16x32xf32>
    %c0_3 = arith.constant 0 : index
    %c0_4 = arith.constant 0 : index
    %3 = vector.load %arg3[%c0_3, %c0_4] : memref<1x32xf32, #tpu.memory_space<vmem>>, vector<1x32xf32>
    %4 = vector.broadcast %3 : vector<1x32xf32> to vector<16x32xf32>
    %5 = arith.addf %2, %4 : vector<16x32xf32>
    %c0_5 = arith.constant 0 : index
    %c0_6 = arith.constant 0 : index
    %6 = vector.load %arg4[%c0_5, %c0_6] : memref<16x32xf32, #tpu.memory_space<vmem>>, vector<16x32xf32>
    tpu.vector_store %arg4[%c0_5, %c0_6], %5 {strides = array<i32>} : memref<16x32xf32, #tpu.memory_space<vmem>>, vector<16x32xf32>,
    return
  }
  func.func @transform_0(%arg0: i32) -> (i32, i32) {
    %c0_i32 = arith.constant 0 : i32
    %c0_i32_0 = arith.constant 0 : i32
    return %arg0, %c0_i32 : i32, i32
  }
  func.func @transform_1(%arg0: i32) -> (i32, i32) {
    %c0_i32 = arith.constant 0 : i32
    %c0_i32_0 = arith.constant 0 : i32
    %c0_i32_1 = arith.constant 0 : i32
    return %c0_i32, %c0_i32_0 : i32, i32
  }
  func.func @transform_2(%arg0: i32) -> (i32, i32) {
    %c0_i32 = arith.constant 0 : i32
    %c0_i32_0 = arith.constant 0 : i32
    %c0_i32_1 = arith.constant 0 : i32
    return %c0_i32, %c0_i32_0 : i32, i32
  }
  func.func @transform_3(%arg0: i32) -> (i32, i32) {
    %c0_i32 = arith.constant 0 : i32
    %c0_i32_0 = arith.constant 0 : i32
    return %arg0, %c0_i32 : i32, i32
  }
}

module attributes {stable_mosaic.version = 11 : i64} {
  func.func @kernel(%arg0: i32, %arg1: memref<8x2x192xf32, #tpu.memory_space<vmem>>, %arg2: memref<8x2x192xf32, #tpu.memory_space<vmem>>, %arg3: memref<8x2x1xf32, #tpu.memory_space<vmem>>, %arg4: memref<8x2x1xf32, #tpu.memory_space<vmem>>, %arg5: memref<2x32x96xbf16, #tpu.memory_space<vmem>>, %arg6: memref<2x1x96xf32, #tpu.memory_space<vmem>>, %arg7: memref<8x2x32xf32, #tpu.memory_space<vmem>>, %arg8: memref<8x2x32xf32, #tpu.memory_space<vmem>>, %arg9: memref<2x32xf32, #tpu.memory_space<vmem>>, %arg10: memref<2x32xf32, #tpu.memory_space<vmem>>) attributes {dimension_semantics = [#tpu.dimension_semantics<arbitrary>], iteration_bounds = array<i64: 1>, scalar_prefetch = 0 : i64, scratch_operands = 2 : i64, tpu.core_type = #tpu.core_type<tc>, window_params = [{transform_indices = @transform_0, window_bounds = array<i64: 8, 2, 192>}, {transform_indices = @transform_1, window_bounds = array<i64: 8, 2, 192>}, {transform_indices = @transform_2, window_bounds = array<i64: 8, 2, 1>}, {transform_indices = @transform_3, window_bounds = array<i64: 8, 2, 1>}, {pipeline_mode = #tpu.pipeline_mode<synchronous>, transform_indices = @transform_4, window_bounds = array<i64: 2, 32, 96>}, {pipeline_mode = #tpu.pipeline_mode<synchronous>, transform_indices = @transform_5, window_bounds = array<i64: 2, 1, 96>}, {transform_indices = @transform_6, window_bounds = array<i64: 8, 2, 32>}, {transform_indices = @transform_7, window_bounds = array<i64: 8, 2, 32>}]} {
    %c0_i32 = arith.constant 0 : i32
    %0 = arith.cmpi eq, %arg0, %c0_i32 : i32
    %1 = arith.extui %0 : i1 to i32
    %c0_i32_0 = arith.constant 0 : i32
    %2 = arith.cmpi ne, %1, %c0_i32_0 : i32
    scf.if %2 {
      %cst_291 = arith.constant 0.000000e+00 : f32
      %779 = vector.broadcast %cst_291 : f32 to vector<2x32xf32>
      %c0_292 = arith.constant 0 : index
      %c0_293 = arith.constant 0 : index
      %780 = vector.load %arg9[%c0_292, %c0_293] : memref<2x32xf32, #tpu.memory_space<vmem>>, vector<2x32xf32>
      tpu.vector_store %arg9[%c0_292, %c0_293], %779 {strides = array<i32>} : memref<2x32xf32, #tpu.memory_space<vmem>>, vector<2x32xf32>,
      %cst_294 = arith.constant 0.000000e+00 : f32
      %781 = vector.broadcast %cst_294 : f32 to vector<2x32xf32>
      %c0_295 = arith.constant 0 : index
      %c0_296 = arith.constant 0 : index
      %782 = vector.load %arg10[%c0_295, %c0_296] : memref<2x32xf32, #tpu.memory_space<vmem>>, vector<2x32xf32>
      tpu.vector_store %arg10[%c0_295, %c0_296], %781 {strides = array<i32>} : memref<2x32xf32, #tpu.memory_space<vmem>>, vector<2x32xf32>,
    } else {
    }
    %c0 = arith.constant 0 : index
    %c0_1 = arith.constant 0 : index
    %c0_2 = arith.constant 0 : index
    %3 = vector.load %arg5[%c0, %c0_1, %c0_2] : memref<2x32x96xbf16, #tpu.memory_space<vmem>>, vector<1x32x96xbf16>
    %4 = vector.shape_cast %3 : vector<1x32x96xbf16> to vector<32x96xbf16>
    %c1 = arith.constant 1 : index
    %c0_3 = arith.constant 0 : index
    %c0_4 = arith.constant 0 : index
    %5 = vector.load %arg5[%c1, %c0_3, %c0_4] : memref<2x32x96xbf16, #tpu.memory_space<vmem>>, vector<1x32x96xbf16>
    %6 = vector.shape_cast %5 : vector<1x32x96xbf16> to vector<32x96xbf16>
    %c0_5 = arith.constant 0 : index
    %c0_6 = arith.constant 0 : index
    %c0_7 = arith.constant 0 : index
    %7 = vector.load %arg6[%c0_5, %c0_6, %c0_7] : memref<2x1x96xf32, #tpu.memory_space<vmem>>, vector<1x1x96xf32>
    %8 = vector.shape_cast %7 : vector<1x1x96xf32> to vector<1x96xf32>
    %c1_8 = arith.constant 1 : index
    %c0_9 = arith.constant 0 : index
    %c0_10 = arith.constant 0 : index
    %9 = vector.load %arg6[%c1_8, %c0_9, %c0_10] : memref<2x1x96xf32, #tpu.memory_space<vmem>>, vector<1x1x96xf32>
    %10 = vector.shape_cast %9 : vector<1x1x96xf32> to vector<1x96xf32>
    %c0_11 = arith.constant 0 : index
    %c0_12 = arith.constant 0 : index
    %c0_13 = arith.constant 0 : index
    %11 = vector.load %arg1[%c0_11, %c0_12, %c0_13] : memref<8x2x192xf32, #tpu.memory_space<vmem>>, vector<1x2x96xf32>
    %12 = vector.shape_cast %11 : vector<1x2x96xf32> to vector<2x96xf32>
    %c0_14 = arith.constant 0 : index
    %c0_15 = arith.constant 0 : index
    %c0_16 = arith.constant 0 : index
    %13 = vector.load %arg3[%c0_14, %c0_15, %c0_16] : memref<8x2x1xf32, #tpu.memory_space<vmem>>, vector<1x2x1xf32>
    %14 = vector.shape_cast %13 : vector<1x2x1xf32> to vector<2x1xf32>
    %c0_17 = arith.constant 0 : index
    %c0_18 = arith.constant 0 : index
    %15 = vector.load %arg9[%c0_17, %c0_18] : memref<2x32xf32, #tpu.memory_space<vmem>>, vector<2x32xf32>
    %16 = arith.truncf %15 : vector<2x32xf32> to vector<2x32xbf16>
    %cst = arith.constant dense<0.000000e+00> : vector<2x96xf32>
    %17 = tpu.matmul %16, %4, %cst {dimension_numbers = #tpu.dot_dimension_numbers<[1], [0], [0], [1], [0, 0, 1, 1], [], []>} : vector<2x32xbf16>, vector<32x96xbf16>, vector<2x96xf32> -> vector<2x96xf32>
    %18 = vector.broadcast %8 : vector<1x96xf32> to vector<2x96xf32>
    %19 = arith.addf %17, %18 : vector<2x96xf32>
    %20 = vector.extract_strided_slice %12 {offsets = [0, 0], sizes = [2, 32], strides = [1, 1]} : vector<2x96xf32> to vector<2x32xf32>
    %21 = vector.extract_strided_slice %19 {offsets = [0, 0], sizes = [2, 32], strides = [1, 1]} : vector<2x96xf32> to vector<2x32xf32>
    %22 = arith.addf %20, %21 : vector<2x32xf32>
    %23 = arith.negf %22 : vector<2x32xf32>
    %24 = math.exp %23 : vector<2x32xf32>
    %cst_19 = arith.constant 1.000000e+00 : f32
    %25 = vector.broadcast %cst_19 : f32 to vector<2x32xf32>
    %26 = arith.addf %25, %24 : vector<2x32xf32>
    %27 = arith.divf %25, %26 : vector<2x32xf32>
    %28 = vector.extract_strided_slice %12 {offsets = [0, 32], sizes = [2, 32], strides = [1, 1]} : vector<2x96xf32> to vector<2x32xf32>
    %29 = vector.extract_strided_slice %19 {offsets = [0, 32], sizes = [2, 32], strides = [1, 1]} : vector<2x96xf32> to vector<2x32xf32>
    %30 = arith.addf %28, %29 : vector<2x32xf32>
    %31 = arith.negf %30 : vector<2x32xf32>
    %32 = math.exp %31 : vector<2x32xf32>
    %cst_20 = arith.constant 1.000000e+00 : f32
    %33 = vector.broadcast %cst_20 : f32 to vector<2x32xf32>
    %34 = arith.addf %33, %32 : vector<2x32xf32>
    %35 = arith.divf %33, %34 : vector<2x32xf32>
    %36 = vector.extract_strided_slice %12 {offsets = [0, 64], sizes = [2, 32], strides = [1, 1]} : vector<2x96xf32> to vector<2x32xf32>
    %37 = vector.extract_strided_slice %19 {offsets = [0, 64], sizes = [2, 32], strides = [1, 1]} : vector<2x96xf32> to vector<2x32xf32>
    %38 = arith.mulf %27, %37 : vector<2x32xf32>
    %39 = arith.addf %36, %38 : vector<2x32xf32>
    %40 = math.tanh %39 : vector<2x32xf32>
    %cst_21 = arith.constant 1.000000e+00 : f32
    %41 = vector.broadcast %cst_21 : f32 to vector<2x32xf32>
    %42 = arith.subf %41, %35 : vector<2x32xf32>
    %43 = arith.mulf %42, %40 : vector<2x32xf32>
    %44 = arith.mulf %35, %15 : vector<2x32xf32>
    %45 = arith.addf %43, %44 : vector<2x32xf32>
    %46 = vector.broadcast %14 : vector<2x1xf32> to vector<2x32xf32>
    %47 = arith.mulf %46, %45 : vector<2x32xf32>
    %cst_22 = arith.constant 1.000000e+00 : f32
    %48 = vector.broadcast %cst_22 : f32 to vector<2x1xf32>
    %49 = arith.subf %48, %14 : vector<2x1xf32>
    %50 = vector.broadcast %49 : vector<2x1xf32> to vector<2x32xf32>
    %51 = arith.mulf %50, %15 : vector<2x32xf32>
    %52 = arith.addf %47, %51 : vector<2x32xf32>
    %53 = vector.broadcast %14 : vector<2x1xf32> to vector<2x32xf32>
    %54 = arith.mulf %53, %45 : vector<2x32xf32>
    %c0_23 = arith.constant 0 : index
    %c0_24 = arith.constant 0 : index
    %55 = vector.load %arg9[%c0_23, %c0_24] : memref<2x32xf32, #tpu.memory_space<vmem>>, vector<2x32xf32>
    tpu.vector_store %arg9[%c0_23, %c0_24], %52 {strides = array<i32>} : memref<2x32xf32, #tpu.memory_space<vmem>>, vector<2x32xf32>,
    %c0_25 = arith.constant 0 : index
    %c0_26 = arith.constant 0 : index
    %c0_27 = arith.constant 0 : index
    %56 = vector.load %arg7[%c0_25, %c0_26, %c0_27] : memref<8x2x32xf32, #tpu.memory_space<vmem>>, vector<1x2x32xf32>
    %57 = vector.shape_cast %56 : vector<1x2x32xf32> to vector<2x32xf32>
    %58 = vector.shape_cast %54 : vector<2x32xf32> to vector<1x2x32xf32>
    tpu.vector_store %arg7[%c0_25, %c0_26, %c0_27], %58 {strides = array<i32>} : memref<8x2x32xf32, #tpu.memory_space<vmem>>, vector<1x2x32xf32>,
    %c7 = arith.constant 7 : index
    %c0_28 = arith.constant 0 : index
    %c96 = arith.constant 96 : index
    %59 = vector.load %arg2[%c7, %c0_28, %c96] : memref<8x2x192xf32, #tpu.memory_space<vmem>>, vector<1x2x96xf32>
    %60 = vector.shape_cast %59 : vector<1x2x96xf32> to vector<2x96xf32>
    %c7_29 = arith.constant 7 : index
    %c0_30 = arith.constant 0 : index
    %c0_31 = arith.constant 0 : index
    %61 = vector.load %arg4[%c7_29, %c0_30, %c0_31] : memref<8x2x1xf32, #tpu.memory_space<vmem>>, vector<1x2x1xf32>
    %62 = vector.shape_cast %61 : vector<1x2x1xf32> to vector<2x1xf32>
    %c0_32 = arith.constant 0 : index
    %c0_33 = arith.constant 0 : index
    %63 = vector.load %arg10[%c0_32, %c0_33] : memref<2x32xf32, #tpu.memory_space<vmem>>, vector<2x32xf32>
    %64 = arith.truncf %63 : vector<2x32xf32> to vector<2x32xbf16>
    %cst_34 = arith.constant dense<0.000000e+00> : vector<2x96xf32>
    %65 = tpu.matmul %64, %6, %cst_34 {dimension_numbers = #tpu.dot_dimension_numbers<[1], [0], [0], [1], [0, 0, 1, 1], [], []>} : vector<2x32xbf16>, vector<32x96xbf16>, vector<2x96xf32> -> vector<2x96xf32>
    %66 = vector.broadcast %10 : vector<1x96xf32> to vector<2x96xf32>
    %67 = arith.addf %65, %66 : vector<2x96xf32>
    %68 = vector.extract_strided_slice %60 {offsets = [0, 0], sizes = [2, 32], strides = [1, 1]} : vector<2x96xf32> to vector<2x32xf32>
    %69 = vector.extract_strided_slice %67 {offsets = [0, 0], sizes = [2, 32], strides = [1, 1]} : vector<2x96xf32> to vector<2x32xf32>
    %70 = arith.addf %68, %69 : vector<2x32xf32>
    %71 = arith.negf %70 : vector<2x32xf32>
    %72 = math.exp %71 : vector<2x32xf32>
    %cst_35 = arith.constant 1.000000e+00 : f32
    %73 = vector.broadcast %cst_35 : f32 to vector<2x32xf32>
    %74 = arith.addf %73, %72 : vector<2x32xf32>
    %75 = arith.divf %73, %74 : vector<2x32xf32>
    %76 = vector.extract_strided_slice %60 {offsets = [0, 32], sizes = [2, 32], strides = [1, 1]} : vector<2x96xf32> to vector<2x32xf32>
    %77 = vector.extract_strided_slice %67 {offsets = [0, 32], sizes = [2, 32], strides = [1, 1]} : vector<2x96xf32> to vector<2x32xf32>
    %78 = arith.addf %76, %77 : vector<2x32xf32>
    %79 = arith.negf %78 : vector<2x32xf32>
    %80 = math.exp %79 : vector<2x32xf32>
    %cst_36 = arith.constant 1.000000e+00 : f32
    %81 = vector.broadcast %cst_36 : f32 to vector<2x32xf32>
    %82 = arith.addf %81, %80 : vector<2x32xf32>
    %83 = arith.divf %81, %82 : vector<2x32xf32>
    %84 = vector.extract_strided_slice %60 {offsets = [0, 64], sizes = [2, 32], strides = [1, 1]} : vector<2x96xf32> to vector<2x32xf32>
    %85 = vector.extract_strided_slice %67 {offsets = [0, 64], sizes = [2, 32], strides = [1, 1]} : vector<2x96xf32> to vector<2x32xf32>
    %86 = arith.mulf %75, %85 : vector<2x32xf32>
    %87 = arith.addf %84, %86 : vector<2x32xf32>
    %88 = math.tanh %87 : vector<2x32xf32>
    %cst_37 = arith.constant 1.000000e+00 : f32
    %89 = vector.broadcast %cst_37 : f32 to vector<2x32xf32>
    %90 = arith.subf %89, %83 : vector<2x32xf32>
    %91 = arith.mulf %90, %88 : vector<2x32xf32>
    %92 = arith.mulf %83, %63 : vector<2x32xf32>
    %93 = arith.addf %91, %92 : vector<2x32xf32>
    %94 = vector.broadcast %62 : vector<2x1xf32> to vector<2x32xf32>
    %95 = arith.mulf %94, %93 : vector<2x32xf32>
    %cst_38 = arith.constant 1.000000e+00 : f32
    %96 = vector.broadcast %cst_38 : f32 to vector<2x1xf32>
    %97 = arith.subf %96, %62 : vector<2x1xf32>
    %98 = vector.broadcast %97 : vector<2x1xf32> to vector<2x32xf32>
    %99 = arith.mulf %98, %63 : vector<2x32xf32>
    %100 = arith.addf %95, %99 : vector<2x32xf32>
    %101 = vector.broadcast %62 : vector<2x1xf32> to vector<2x32xf32>
    %102 = arith.mulf %101, %93 : vector<2x32xf32>
    %c0_39 = arith.constant 0 : index
    %c0_40 = arith.constant 0 : index
    %103 = vector.load %arg10[%c0_39, %c0_40] : memref<2x32xf32, #tpu.memory_space<vmem>>, vector<2x32xf32>
    tpu.vector_store %arg10[%c0_39, %c0_40], %100 {strides = array<i32>} : memref<2x32xf32, #tpu.memory_space<vmem>>, vector<2x32xf32>,
    %c7_41 = arith.constant 7 : index
    %c0_42 = arith.constant 0 : index
    %c0_43 = arith.constant 0 : index
    %104 = vector.load %arg8[%c7_41, %c0_42, %c0_43] : memref<8x2x32xf32, #tpu.memory_space<vmem>>, vector<1x2x32xf32>
    %105 = vector.shape_cast %104 : vector<1x2x32xf32> to vector<2x32xf32>
    %106 = vector.shape_cast %102 : vector<2x32xf32> to vector<1x2x32xf32>
    tpu.vector_store %arg8[%c7_41, %c0_42, %c0_43], %106 {strides = array<i32>} : memref<8x2x32xf32, #tpu.memory_space<vmem>>, vector<1x2x32xf32>,
    %c1_44 = arith.constant 1 : index
    %c0_45 = arith.constant 0 : index
    %c0_46 = arith.constant 0 : index
    %107 = vector.load %arg1[%c1_44, %c0_45, %c0_46] : memref<8x2x192xf32, #tpu.memory_space<vmem>>, vector<1x2x96xf32>
    %108 = vector.shape_cast %107 : vector<1x2x96xf32> to vector<2x96xf32>
    %c1_47 = arith.constant 1 : index
    %c0_48 = arith.constant 0 : index
    %c0_49 = arith.constant 0 : index
    %109 = vector.load %arg3[%c1_47, %c0_48, %c0_49] : memref<8x2x1xf32, #tpu.memory_space<vmem>>, vector<1x2x1xf32>
    %110 = vector.shape_cast %109 : vector<1x2x1xf32> to vector<2x1xf32>
    %c0_50 = arith.constant 0 : index
    %c0_51 = arith.constant 0 : index
    %111 = vector.load %arg9[%c0_50, %c0_51] : memref<2x32xf32, #tpu.memory_space<vmem>>, vector<2x32xf32>
    %112 = arith.truncf %111 : vector<2x32xf32> to vector<2x32xbf16>
    %cst_52 = arith.constant dense<0.000000e+00> : vector<2x96xf32>
    %113 = tpu.matmul %112, %4, %cst_52 {dimension_numbers = #tpu.dot_dimension_numbers<[1], [0], [0], [1], [0, 0, 1, 1], [], []>} : vector<2x32xbf16>, vector<32x96xbf16>, vector<2x96xf32> -> vector<2x96xf32>
    %114 = vector.broadcast %8 : vector<1x96xf32> to vector<2x96xf32>
    %115 = arith.addf %113, %114 : vector<2x96xf32>
    %116 = vector.extract_strided_slice %108 {offsets = [0, 0], sizes = [2, 32], strides = [1, 1]} : vector<2x96xf32> to vector<2x32xf32>
    %117 = vector.extract_strided_slice %115 {offsets = [0, 0], sizes = [2, 32], strides = [1, 1]} : vector<2x96xf32> to vector<2x32xf32>
    %118 = arith.addf %116, %117 : vector<2x32xf32>
    %119 = arith.negf %118 : vector<2x32xf32>
    %120 = math.exp %119 : vector<2x32xf32>
    %cst_53 = arith.constant 1.000000e+00 : f32
    %121 = vector.broadcast %cst_53 : f32 to vector<2x32xf32>
    %122 = arith.addf %121, %120 : vector<2x32xf32>
    %123 = arith.divf %121, %122 : vector<2x32xf32>
    %124 = vector.extract_strided_slice %108 {offsets = [0, 32], sizes = [2, 32], strides = [1, 1]} : vector<2x96xf32> to vector<2x32xf32>
    %125 = vector.extract_strided_slice %115 {offsets = [0, 32], sizes = [2, 32], strides = [1, 1]} : vector<2x96xf32> to vector<2x32xf32>
    %126 = arith.addf %124, %125 : vector<2x32xf32>
    %127 = arith.negf %126 : vector<2x32xf32>
    %128 = math.exp %127 : vector<2x32xf32>
    %cst_54 = arith.constant 1.000000e+00 : f32
    %129 = vector.broadcast %cst_54 : f32 to vector<2x32xf32>
    %130 = arith.addf %129, %128 : vector<2x32xf32>
    %131 = arith.divf %129, %130 : vector<2x32xf32>
    %132 = vector.extract_strided_slice %108 {offsets = [0, 64], sizes = [2, 32], strides = [1, 1]} : vector<2x96xf32> to vector<2x32xf32>
    %133 = vector.extract_strided_slice %115 {offsets = [0, 64], sizes = [2, 32], strides = [1, 1]} : vector<2x96xf32> to vector<2x32xf32>
    %134 = arith.mulf %123, %133 : vector<2x32xf32>
    %135 = arith.addf %132, %134 : vector<2x32xf32>
    %136 = math.tanh %135 : vector<2x32xf32>
    %cst_55 = arith.constant 1.000000e+00 : f32
    %137 = vector.broadcast %cst_55 : f32 to vector<2x32xf32>
    %138 = arith.subf %137, %131 : vector<2x32xf32>
    %139 = arith.mulf %138, %136 : vector<2x32xf32>
    %140 = arith.mulf %131, %111 : vector<2x32xf32>
    %141 = arith.addf %139, %140 : vector<2x32xf32>
    %142 = vector.broadcast %110 : vector<2x1xf32> to vector<2x32xf32>
    %143 = arith.mulf %142, %141 : vector<2x32xf32>
    %cst_56 = arith.constant 1.000000e+00 : f32
    %144 = vector.broadcast %cst_56 : f32 to vector<2x1xf32>
    %145 = arith.subf %144, %110 : vector<2x1xf32>
    %146 = vector.broadcast %145 : vector<2x1xf32> to vector<2x32xf32>
    %147 = arith.mulf %146, %111 : vector<2x32xf32>
    %148 = arith.addf %143, %147 : vector<2x32xf32>
    %149 = vector.broadcast %110 : vector<2x1xf32> to vector<2x32xf32>
    %150 = arith.mulf %149, %141 : vector<2x32xf32>
    %c0_57 = arith.constant 0 : index
    %c0_58 = arith.constant 0 : index
    %151 = vector.load %arg9[%c0_57, %c0_58] : memref<2x32xf32, #tpu.memory_space<vmem>>, vector<2x32xf32>
    tpu.vector_store %arg9[%c0_57, %c0_58], %148 {strides = array<i32>} : memref<2x32xf32, #tpu.memory_space<vmem>>, vector<2x32xf32>,
    %c1_59 = arith.constant 1 : index
    %c0_60 = arith.constant 0 : index
    %c0_61 = arith.constant 0 : index
    %152 = vector.load %arg7[%c1_59, %c0_60, %c0_61] : memref<8x2x32xf32, #tpu.memory_space<vmem>>, vector<1x2x32xf32>
    %153 = vector.shape_cast %152 : vector<1x2x32xf32> to vector<2x32xf32>
    %154 = vector.shape_cast %150 : vector<2x32xf32> to vector<1x2x32xf32>
    tpu.vector_store %arg7[%c1_59, %c0_60, %c0_61], %154 {strides = array<i32>} : memref<8x2x32xf32, #tpu.memory_space<vmem>>, vector<1x2x32xf32>,
    %c6 = arith.constant 6 : index
    %c0_62 = arith.constant 0 : index
    %c96_63 = arith.constant 96 : index
    %155 = vector.load %arg2[%c6, %c0_62, %c96_63] : memref<8x2x192xf32, #tpu.memory_space<vmem>>, vector<1x2x96xf32>
    %156 = vector.shape_cast %155 : vector<1x2x96xf32> to vector<2x96xf32>
    %c6_64 = arith.constant 6 : index
    %c0_65 = arith.constant 0 : index
    %c0_66 = arith.constant 0 : index
    %157 = vector.load %arg4[%c6_64, %c0_65, %c0_66] : memref<8x2x1xf32, #tpu.memory_space<vmem>>, vector<1x2x1xf32>
    %158 = vector.shape_cast %157 : vector<1x2x1xf32> to vector<2x1xf32>
    %c0_67 = arith.constant 0 : index
    %c0_68 = arith.constant 0 : index
    %159 = vector.load %arg10[%c0_67, %c0_68] : memref<2x32xf32, #tpu.memory_space<vmem>>, vector<2x32xf32>
    %160 = arith.truncf %159 : vector<2x32xf32> to vector<2x32xbf16>
    %cst_69 = arith.constant dense<0.000000e+00> : vector<2x96xf32>
    %161 = tpu.matmul %160, %6, %cst_69 {dimension_numbers = #tpu.dot_dimension_numbers<[1], [0], [0], [1], [0, 0, 1, 1], [], []>} : vector<2x32xbf16>, vector<32x96xbf16>, vector<2x96xf32> -> vector<2x96xf32>
    %162 = vector.broadcast %10 : vector<1x96xf32> to vector<2x96xf32>
    %163 = arith.addf %161, %162 : vector<2x96xf32>
    %164 = vector.extract_strided_slice %156 {offsets = [0, 0], sizes = [2, 32], strides = [1, 1]} : vector<2x96xf32> to vector<2x32xf32>
    %165 = vector.extract_strided_slice %163 {offsets = [0, 0], sizes = [2, 32], strides = [1, 1]} : vector<2x96xf32> to vector<2x32xf32>
    %166 = arith.addf %164, %165 : vector<2x32xf32>
    %167 = arith.negf %166 : vector<2x32xf32>
    %168 = math.exp %167 : vector<2x32xf32>
    %cst_70 = arith.constant 1.000000e+00 : f32
    %169 = vector.broadcast %cst_70 : f32 to vector<2x32xf32>
    %170 = arith.addf %169, %168 : vector<2x32xf32>
    %171 = arith.divf %169, %170 : vector<2x32xf32>
    %172 = vector.extract_strided_slice %156 {offsets = [0, 32], sizes = [2, 32], strides = [1, 1]} : vector<2x96xf32> to vector<2x32xf32>
    %173 = vector.extract_strided_slice %163 {offsets = [0, 32], sizes = [2, 32], strides = [1, 1]} : vector<2x96xf32> to vector<2x32xf32>
    %174 = arith.addf %172, %173 : vector<2x32xf32>
    %175 = arith.negf %174 : vector<2x32xf32>
    %176 = math.exp %175 : vector<2x32xf32>
    %cst_71 = arith.constant 1.000000e+00 : f32
    %177 = vector.broadcast %cst_71 : f32 to vector<2x32xf32>
    %178 = arith.addf %177, %176 : vector<2x32xf32>
    %179 = arith.divf %177, %178 : vector<2x32xf32>
    %180 = vector.extract_strided_slice %156 {offsets = [0, 64], sizes = [2, 32], strides = [1, 1]} : vector<2x96xf32> to vector<2x32xf32>
    %181 = vector.extract_strided_slice %163 {offsets = [0, 64], sizes = [2, 32], strides = [1, 1]} : vector<2x96xf32> to vector<2x32xf32>
    %182 = arith.mulf %171, %181 : vector<2x32xf32>
    %183 = arith.addf %180, %182 : vector<2x32xf32>
    %184 = math.tanh %183 : vector<2x32xf32>
    %cst_72 = arith.constant 1.000000e+00 : f32
    %185 = vector.broadcast %cst_72 : f32 to vector<2x32xf32>
    %186 = arith.subf %185, %179 : vector<2x32xf32>
    %187 = arith.mulf %186, %184 : vector<2x32xf32>
    %188 = arith.mulf %179, %159 : vector<2x32xf32>
    %189 = arith.addf %187, %188 : vector<2x32xf32>
    %190 = vector.broadcast %158 : vector<2x1xf32> to vector<2x32xf32>
    %191 = arith.mulf %190, %189 : vector<2x32xf32>
    %cst_73 = arith.constant 1.000000e+00 : f32
    %192 = vector.broadcast %cst_73 : f32 to vector<2x1xf32>
    %193 = arith.subf %192, %158 : vector<2x1xf32>
    %194 = vector.broadcast %193 : vector<2x1xf32> to vector<2x32xf32>
    %195 = arith.mulf %194, %159 : vector<2x32xf32>
    %196 = arith.addf %191, %195 : vector<2x32xf32>
    %197 = vector.broadcast %158 : vector<2x1xf32> to vector<2x32xf32>
    %198 = arith.mulf %197, %189 : vector<2x32xf32>
    %c0_74 = arith.constant 0 : index
    %c0_75 = arith.constant 0 : index
    %199 = vector.load %arg10[%c0_74, %c0_75] : memref<2x32xf32, #tpu.memory_space<vmem>>, vector<2x32xf32>
    tpu.vector_store %arg10[%c0_74, %c0_75], %196 {strides = array<i32>} : memref<2x32xf32, #tpu.memory_space<vmem>>, vector<2x32xf32>,
    %c6_76 = arith.constant 6 : index
    %c0_77 = arith.constant 0 : index
    %c0_78 = arith.constant 0 : index
    %200 = vector.load %arg8[%c6_76, %c0_77, %c0_78] : memref<8x2x32xf32, #tpu.memory_space<vmem>>, vector<1x2x32xf32>
    %201 = vector.shape_cast %200 : vector<1x2x32xf32> to vector<2x32xf32>
    %202 = vector.shape_cast %198 : vector<2x32xf32> to vector<1x2x32xf32>
    tpu.vector_store %arg8[%c6_76, %c0_77, %c0_78], %202 {strides = array<i32>} : memref<8x2x32xf32, #tpu.memory_space<vmem>>, vector<1x2x32xf32>,
    %c2 = arith.constant 2 : index
    %c0_79 = arith.constant 0 : index
    %c0_80 = arith.constant 0 : index
    %203 = vector.load %arg1[%c2, %c0_79, %c0_80] : memref<8x2x192xf32, #tpu.memory_space<vmem>>, vector<1x2x96xf32>
    %204 = vector.shape_cast %203 : vector<1x2x96xf32> to vector<2x96xf32>
    %c2_81 = arith.constant 2 : index
    %c0_82 = arith.constant 0 : index
    %c0_83 = arith.constant 0 : index
    %205 = vector.load %arg3[%c2_81, %c0_82, %c0_83] : memref<8x2x1xf32, #tpu.memory_space<vmem>>, vector<1x2x1xf32>
    %206 = vector.shape_cast %205 : vector<1x2x1xf32> to vector<2x1xf32>
    %c0_84 = arith.constant 0 : index
    %c0_85 = arith.constant 0 : index
    %207 = vector.load %arg9[%c0_84, %c0_85] : memref<2x32xf32, #tpu.memory_space<vmem>>, vector<2x32xf32>
    %208 = arith.truncf %207 : vector<2x32xf32> to vector<2x32xbf16>
    %cst_86 = arith.constant dense<0.000000e+00> : vector<2x96xf32>
    %209 = tpu.matmul %208, %4, %cst_86 {dimension_numbers = #tpu.dot_dimension_numbers<[1], [0], [0], [1], [0, 0, 1, 1], [], []>} : vector<2x32xbf16>, vector<32x96xbf16>, vector<2x96xf32> -> vector<2x96xf32>
    %210 = vector.broadcast %8 : vector<1x96xf32> to vector<2x96xf32>
    %211 = arith.addf %209, %210 : vector<2x96xf32>
    %212 = vector.extract_strided_slice %204 {offsets = [0, 0], sizes = [2, 32], strides = [1, 1]} : vector<2x96xf32> to vector<2x32xf32>
    %213 = vector.extract_strided_slice %211 {offsets = [0, 0], sizes = [2, 32], strides = [1, 1]} : vector<2x96xf32> to vector<2x32xf32>
    %214 = arith.addf %212, %213 : vector<2x32xf32>
    %215 = arith.negf %214 : vector<2x32xf32>
    %216 = math.exp %215 : vector<2x32xf32>
    %cst_87 = arith.constant 1.000000e+00 : f32
    %217 = vector.broadcast %cst_87 : f32 to vector<2x32xf32>
    %218 = arith.addf %217, %216 : vector<2x32xf32>
    %219 = arith.divf %217, %218 : vector<2x32xf32>
    %220 = vector.extract_strided_slice %204 {offsets = [0, 32], sizes = [2, 32], strides = [1, 1]} : vector<2x96xf32> to vector<2x32xf32>
    %221 = vector.extract_strided_slice %211 {offsets = [0, 32], sizes = [2, 32], strides = [1, 1]} : vector<2x96xf32> to vector<2x32xf32>
    %222 = arith.addf %220, %221 : vector<2x32xf32>
    %223 = arith.negf %222 : vector<2x32xf32>
    %224 = math.exp %223 : vector<2x32xf32>
    %cst_88 = arith.constant 1.000000e+00 : f32
    %225 = vector.broadcast %cst_88 : f32 to vector<2x32xf32>
    %226 = arith.addf %225, %224 : vector<2x32xf32>
    %227 = arith.divf %225, %226 : vector<2x32xf32>
    %228 = vector.extract_strided_slice %204 {offsets = [0, 64], sizes = [2, 32], strides = [1, 1]} : vector<2x96xf32> to vector<2x32xf32>
    %229 = vector.extract_strided_slice %211 {offsets = [0, 64], sizes = [2, 32], strides = [1, 1]} : vector<2x96xf32> to vector<2x32xf32>
    %230 = arith.mulf %219, %229 : vector<2x32xf32>
    %231 = arith.addf %228, %230 : vector<2x32xf32>
    %232 = math.tanh %231 : vector<2x32xf32>
    %cst_89 = arith.constant 1.000000e+00 : f32
    %233 = vector.broadcast %cst_89 : f32 to vector<2x32xf32>
    %234 = arith.subf %233, %227 : vector<2x32xf32>
    %235 = arith.mulf %234, %232 : vector<2x32xf32>
    %236 = arith.mulf %227, %207 : vector<2x32xf32>
    %237 = arith.addf %235, %236 : vector<2x32xf32>
    %238 = vector.broadcast %206 : vector<2x1xf32> to vector<2x32xf32>
    %239 = arith.mulf %238, %237 : vector<2x32xf32>
    %cst_90 = arith.constant 1.000000e+00 : f32
    %240 = vector.broadcast %cst_90 : f32 to vector<2x1xf32>
    %241 = arith.subf %240, %206 : vector<2x1xf32>
    %242 = vector.broadcast %241 : vector<2x1xf32> to vector<2x32xf32>
    %243 = arith.mulf %242, %207 : vector<2x32xf32>
    %244 = arith.addf %239, %243 : vector<2x32xf32>
    %245 = vector.broadcast %206 : vector<2x1xf32> to vector<2x32xf32>
    %246 = arith.mulf %245, %237 : vector<2x32xf32>
    %c0_91 = arith.constant 0 : index
    %c0_92 = arith.constant 0 : index
    %247 = vector.load %arg9[%c0_91, %c0_92] : memref<2x32xf32, #tpu.memory_space<vmem>>, vector<2x32xf32>
    tpu.vector_store %arg9[%c0_91, %c0_92], %244 {strides = array<i32>} : memref<2x32xf32, #tpu.memory_space<vmem>>, vector<2x32xf32>,
    %c2_93 = arith.constant 2 : index
    %c0_94 = arith.constant 0 : index
    %c0_95 = arith.constant 0 : index
    %248 = vector.load %arg7[%c2_93, %c0_94, %c0_95] : memref<8x2x32xf32, #tpu.memory_space<vmem>>, vector<1x2x32xf32>
    %249 = vector.shape_cast %248 : vector<1x2x32xf32> to vector<2x32xf32>
    %250 = vector.shape_cast %246 : vector<2x32xf32> to vector<1x2x32xf32>
    tpu.vector_store %arg7[%c2_93, %c0_94, %c0_95], %250 {strides = array<i32>} : memref<8x2x32xf32, #tpu.memory_space<vmem>>, vector<1x2x32xf32>,
    %c5 = arith.constant 5 : index
    %c0_96 = arith.constant 0 : index
    %c96_97 = arith.constant 96 : index
    %251 = vector.load %arg2[%c5, %c0_96, %c96_97] : memref<8x2x192xf32, #tpu.memory_space<vmem>>, vector<1x2x96xf32>
    %252 = vector.shape_cast %251 : vector<1x2x96xf32> to vector<2x96xf32>
    %c5_98 = arith.constant 5 : index
    %c0_99 = arith.constant 0 : index
    %c0_100 = arith.constant 0 : index
    %253 = vector.load %arg4[%c5_98, %c0_99, %c0_100] : memref<8x2x1xf32, #tpu.memory_space<vmem>>, vector<1x2x1xf32>
    %254 = vector.shape_cast %253 : vector<1x2x1xf32> to vector<2x1xf32>
    %c0_101 = arith.constant 0 : index
    %c0_102 = arith.constant 0 : index
    %255 = vector.load %arg10[%c0_101, %c0_102] : memref<2x32xf32, #tpu.memory_space<vmem>>, vector<2x32xf32>
    %256 = arith.truncf %255 : vector<2x32xf32> to vector<2x32xbf16>
    %cst_103 = arith.constant dense<0.000000e+00> : vector<2x96xf32>
    %257 = tpu.matmul %256, %6, %cst_103 {dimension_numbers = #tpu.dot_dimension_numbers<[1], [0], [0], [1], [0, 0, 1, 1], [], []>} : vector<2x32xbf16>, vector<32x96xbf16>, vector<2x96xf32> -> vector<2x96xf32>
    %258 = vector.broadcast %10 : vector<1x96xf32> to vector<2x96xf32>
    %259 = arith.addf %257, %258 : vector<2x96xf32>
    %260 = vector.extract_strided_slice %252 {offsets = [0, 0], sizes = [2, 32], strides = [1, 1]} : vector<2x96xf32> to vector<2x32xf32>
    %261 = vector.extract_strided_slice %259 {offsets = [0, 0], sizes = [2, 32], strides = [1, 1]} : vector<2x96xf32> to vector<2x32xf32>
    %262 = arith.addf %260, %261 : vector<2x32xf32>
    %263 = arith.negf %262 : vector<2x32xf32>
    %264 = math.exp %263 : vector<2x32xf32>
    %cst_104 = arith.constant 1.000000e+00 : f32
    %265 = vector.broadcast %cst_104 : f32 to vector<2x32xf32>
    %266 = arith.addf %265, %264 : vector<2x32xf32>
    %267 = arith.divf %265, %266 : vector<2x32xf32>
    %268 = vector.extract_strided_slice %252 {offsets = [0, 32], sizes = [2, 32], strides = [1, 1]} : vector<2x96xf32> to vector<2x32xf32>
    %269 = vector.extract_strided_slice %259 {offsets = [0, 32], sizes = [2, 32], strides = [1, 1]} : vector<2x96xf32> to vector<2x32xf32>
    %270 = arith.addf %268, %269 : vector<2x32xf32>
    %271 = arith.negf %270 : vector<2x32xf32>
    %272 = math.exp %271 : vector<2x32xf32>
    %cst_105 = arith.constant 1.000000e+00 : f32
    %273 = vector.broadcast %cst_105 : f32 to vector<2x32xf32>
    %274 = arith.addf %273, %272 : vector<2x32xf32>
    %275 = arith.divf %273, %274 : vector<2x32xf32>
    %276 = vector.extract_strided_slice %252 {offsets = [0, 64], sizes = [2, 32], strides = [1, 1]} : vector<2x96xf32> to vector<2x32xf32>
    %277 = vector.extract_strided_slice %259 {offsets = [0, 64], sizes = [2, 32], strides = [1, 1]} : vector<2x96xf32> to vector<2x32xf32>
    %278 = arith.mulf %267, %277 : vector<2x32xf32>
    %279 = arith.addf %276, %278 : vector<2x32xf32>
    %280 = math.tanh %279 : vector<2x32xf32>
    %cst_106 = arith.constant 1.000000e+00 : f32
    %281 = vector.broadcast %cst_106 : f32 to vector<2x32xf32>
    %282 = arith.subf %281, %275 : vector<2x32xf32>
    %283 = arith.mulf %282, %280 : vector<2x32xf32>
    %284 = arith.mulf %275, %255 : vector<2x32xf32>
    %285 = arith.addf %283, %284 : vector<2x32xf32>
    %286 = vector.broadcast %254 : vector<2x1xf32> to vector<2x32xf32>
    %287 = arith.mulf %286, %285 : vector<2x32xf32>
    %cst_107 = arith.constant 1.000000e+00 : f32
    %288 = vector.broadcast %cst_107 : f32 to vector<2x1xf32>
    %289 = arith.subf %288, %254 : vector<2x1xf32>
    %290 = vector.broadcast %289 : vector<2x1xf32> to vector<2x32xf32>
    %291 = arith.mulf %290, %255 : vector<2x32xf32>
    %292 = arith.addf %287, %291 : vector<2x32xf32>
    %293 = vector.broadcast %254 : vector<2x1xf32> to vector<2x32xf32>
    %294 = arith.mulf %293, %285 : vector<2x32xf32>
    %c0_108 = arith.constant 0 : index
    %c0_109 = arith.constant 0 : index
    %295 = vector.load %arg10[%c0_108, %c0_109] : memref<2x32xf32, #tpu.memory_space<vmem>>, vector<2x32xf32>
    tpu.vector_store %arg10[%c0_108, %c0_109], %292 {strides = array<i32>} : memref<2x32xf32, #tpu.memory_space<vmem>>, vector<2x32xf32>,
    %c5_110 = arith.constant 5 : index
    %c0_111 = arith.constant 0 : index
    %c0_112 = arith.constant 0 : index
    %296 = vector.load %arg8[%c5_110, %c0_111, %c0_112] : memref<8x2x32xf32, #tpu.memory_space<vmem>>, vector<1x2x32xf32>
    %297 = vector.shape_cast %296 : vector<1x2x32xf32> to vector<2x32xf32>
    %298 = vector.shape_cast %294 : vector<2x32xf32> to vector<1x2x32xf32>
    tpu.vector_store %arg8[%c5_110, %c0_111, %c0_112], %298 {strides = array<i32>} : memref<8x2x32xf32, #tpu.memory_space<vmem>>, vector<1x2x32xf32>,
    %c3 = arith.constant 3 : index
    %c0_113 = arith.constant 0 : index
    %c0_114 = arith.constant 0 : index
    %299 = vector.load %arg1[%c3, %c0_113, %c0_114] : memref<8x2x192xf32, #tpu.memory_space<vmem>>, vector<1x2x96xf32>
    %300 = vector.shape_cast %299 : vector<1x2x96xf32> to vector<2x96xf32>
    %c3_115 = arith.constant 3 : index
    %c0_116 = arith.constant 0 : index
    %c0_117 = arith.constant 0 : index
    %301 = vector.load %arg3[%c3_115, %c0_116, %c0_117] : memref<8x2x1xf32, #tpu.memory_space<vmem>>, vector<1x2x1xf32>
    %302 = vector.shape_cast %301 : vector<1x2x1xf32> to vector<2x1xf32>
    %c0_118 = arith.constant 0 : index
    %c0_119 = arith.constant 0 : index
    %303 = vector.load %arg9[%c0_118, %c0_119] : memref<2x32xf32, #tpu.memory_space<vmem>>, vector<2x32xf32>
    %304 = arith.truncf %303 : vector<2x32xf32> to vector<2x32xbf16>
    %cst_120 = arith.constant dense<0.000000e+00> : vector<2x96xf32>
    %305 = tpu.matmul %304, %4, %cst_120 {dimension_numbers = #tpu.dot_dimension_numbers<[1], [0], [0], [1], [0, 0, 1, 1], [], []>} : vector<2x32xbf16>, vector<32x96xbf16>, vector<2x96xf32> -> vector<2x96xf32>
    %306 = vector.broadcast %8 : vector<1x96xf32> to vector<2x96xf32>
    %307 = arith.addf %305, %306 : vector<2x96xf32>
    %308 = vector.extract_strided_slice %300 {offsets = [0, 0], sizes = [2, 32], strides = [1, 1]} : vector<2x96xf32> to vector<2x32xf32>
    %309 = vector.extract_strided_slice %307 {offsets = [0, 0], sizes = [2, 32], strides = [1, 1]} : vector<2x96xf32> to vector<2x32xf32>
    %310 = arith.addf %308, %309 : vector<2x32xf32>
    %311 = arith.negf %310 : vector<2x32xf32>
    %312 = math.exp %311 : vector<2x32xf32>
    %cst_121 = arith.constant 1.000000e+00 : f32
    %313 = vector.broadcast %cst_121 : f32 to vector<2x32xf32>
    %314 = arith.addf %313, %312 : vector<2x32xf32>
    %315 = arith.divf %313, %314 : vector<2x32xf32>
    %316 = vector.extract_strided_slice %300 {offsets = [0, 32], sizes = [2, 32], strides = [1, 1]} : vector<2x96xf32> to vector<2x32xf32>
    %317 = vector.extract_strided_slice %307 {offsets = [0, 32], sizes = [2, 32], strides = [1, 1]} : vector<2x96xf32> to vector<2x32xf32>
    %318 = arith.addf %316, %317 : vector<2x32xf32>
    %319 = arith.negf %318 : vector<2x32xf32>
    %320 = math.exp %319 : vector<2x32xf32>
    %cst_122 = arith.constant 1.000000e+00 : f32
    %321 = vector.broadcast %cst_122 : f32 to vector<2x32xf32>
    %322 = arith.addf %321, %320 : vector<2x32xf32>
    %323 = arith.divf %321, %322 : vector<2x32xf32>
    %324 = vector.extract_strided_slice %300 {offsets = [0, 64], sizes = [2, 32], strides = [1, 1]} : vector<2x96xf32> to vector<2x32xf32>
    %325 = vector.extract_strided_slice %307 {offsets = [0, 64], sizes = [2, 32], strides = [1, 1]} : vector<2x96xf32> to vector<2x32xf32>
    %326 = arith.mulf %315, %325 : vector<2x32xf32>
    %327 = arith.addf %324, %326 : vector<2x32xf32>
    %328 = math.tanh %327 : vector<2x32xf32>
    %cst_123 = arith.constant 1.000000e+00 : f32
    %329 = vector.broadcast %cst_123 : f32 to vector<2x32xf32>
    %330 = arith.subf %329, %323 : vector<2x32xf32>
    %331 = arith.mulf %330, %328 : vector<2x32xf32>
    %332 = arith.mulf %323, %303 : vector<2x32xf32>
    %333 = arith.addf %331, %332 : vector<2x32xf32>
    %334 = vector.broadcast %302 : vector<2x1xf32> to vector<2x32xf32>
    %335 = arith.mulf %334, %333 : vector<2x32xf32>
    %cst_124 = arith.constant 1.000000e+00 : f32
    %336 = vector.broadcast %cst_124 : f32 to vector<2x1xf32>
    %337 = arith.subf %336, %302 : vector<2x1xf32>
    %338 = vector.broadcast %337 : vector<2x1xf32> to vector<2x32xf32>
    %339 = arith.mulf %338, %303 : vector<2x32xf32>
    %340 = arith.addf %335, %339 : vector<2x32xf32>
    %341 = vector.broadcast %302 : vector<2x1xf32> to vector<2x32xf32>
    %342 = arith.mulf %341, %333 : vector<2x32xf32>
    %c0_125 = arith.constant 0 : index
    %c0_126 = arith.constant 0 : index
    %343 = vector.load %arg9[%c0_125, %c0_126] : memref<2x32xf32, #tpu.memory_space<vmem>>, vector<2x32xf32>
    tpu.vector_store %arg9[%c0_125, %c0_126], %340 {strides = array<i32>} : memref<2x32xf32, #tpu.memory_space<vmem>>, vector<2x32xf32>,
    %c3_127 = arith.constant 3 : index
    %c0_128 = arith.constant 0 : index
    %c0_129 = arith.constant 0 : index
    %344 = vector.load %arg7[%c3_127, %c0_128, %c0_129] : memref<8x2x32xf32, #tpu.memory_space<vmem>>, vector<1x2x32xf32>
    %345 = vector.shape_cast %344 : vector<1x2x32xf32> to vector<2x32xf32>
    %346 = vector.shape_cast %342 : vector<2x32xf32> to vector<1x2x32xf32>
    tpu.vector_store %arg7[%c3_127, %c0_128, %c0_129], %346 {strides = array<i32>} : memref<8x2x32xf32, #tpu.memory_space<vmem>>, vector<1x2x32xf32>,
    %c4 = arith.constant 4 : index
    %c0_130 = arith.constant 0 : index
    %c96_131 = arith.constant 96 : index
    %347 = vector.load %arg2[%c4, %c0_130, %c96_131] : memref<8x2x192xf32, #tpu.memory_space<vmem>>, vector<1x2x96xf32>
    %348 = vector.shape_cast %347 : vector<1x2x96xf32> to vector<2x96xf32>
    %c4_132 = arith.constant 4 : index
    %c0_133 = arith.constant 0 : index
    %c0_134 = arith.constant 0 : index
    %349 = vector.load %arg4[%c4_132, %c0_133, %c0_134] : memref<8x2x1xf32, #tpu.memory_space<vmem>>, vector<1x2x1xf32>
    %350 = vector.shape_cast %349 : vector<1x2x1xf32> to vector<2x1xf32>
    %c0_135 = arith.constant 0 : index
    %c0_136 = arith.constant 0 : index
    %351 = vector.load %arg10[%c0_135, %c0_136] : memref<2x32xf32, #tpu.memory_space<vmem>>, vector<2x32xf32>
    %352 = arith.truncf %351 : vector<2x32xf32> to vector<2x32xbf16>
    %cst_137 = arith.constant dense<0.000000e+00> : vector<2x96xf32>
    %353 = tpu.matmul %352, %6, %cst_137 {dimension_numbers = #tpu.dot_dimension_numbers<[1], [0], [0], [1], [0, 0, 1, 1], [], []>} : vector<2x32xbf16>, vector<32x96xbf16>, vector<2x96xf32> -> vector<2x96xf32>
    %354 = vector.broadcast %10 : vector<1x96xf32> to vector<2x96xf32>
    %355 = arith.addf %353, %354 : vector<2x96xf32>
    %356 = vector.extract_strided_slice %348 {offsets = [0, 0], sizes = [2, 32], strides = [1, 1]} : vector<2x96xf32> to vector<2x32xf32>
    %357 = vector.extract_strided_slice %355 {offsets = [0, 0], sizes = [2, 32], strides = [1, 1]} : vector<2x96xf32> to vector<2x32xf32>
    %358 = arith.addf %356, %357 : vector<2x32xf32>
    %359 = arith.negf %358 : vector<2x32xf32>
    %360 = math.exp %359 : vector<2x32xf32>
    %cst_138 = arith.constant 1.000000e+00 : f32
    %361 = vector.broadcast %cst_138 : f32 to vector<2x32xf32>
    %362 = arith.addf %361, %360 : vector<2x32xf32>
    %363 = arith.divf %361, %362 : vector<2x32xf32>
    %364 = vector.extract_strided_slice %348 {offsets = [0, 32], sizes = [2, 32], strides = [1, 1]} : vector<2x96xf32> to vector<2x32xf32>
    %365 = vector.extract_strided_slice %355 {offsets = [0, 32], sizes = [2, 32], strides = [1, 1]} : vector<2x96xf32> to vector<2x32xf32>
    %366 = arith.addf %364, %365 : vector<2x32xf32>
    %367 = arith.negf %366 : vector<2x32xf32>
    %368 = math.exp %367 : vector<2x32xf32>
    %cst_139 = arith.constant 1.000000e+00 : f32
    %369 = vector.broadcast %cst_139 : f32 to vector<2x32xf32>
    %370 = arith.addf %369, %368 : vector<2x32xf32>
    %371 = arith.divf %369, %370 : vector<2x32xf32>
    %372 = vector.extract_strided_slice %348 {offsets = [0, 64], sizes = [2, 32], strides = [1, 1]} : vector<2x96xf32> to vector<2x32xf32>
    %373 = vector.extract_strided_slice %355 {offsets = [0, 64], sizes = [2, 32], strides = [1, 1]} : vector<2x96xf32> to vector<2x32xf32>
    %374 = arith.mulf %363, %373 : vector<2x32xf32>
    %375 = arith.addf %372, %374 : vector<2x32xf32>
    %376 = math.tanh %375 : vector<2x32xf32>
    %cst_140 = arith.constant 1.000000e+00 : f32
    %377 = vector.broadcast %cst_140 : f32 to vector<2x32xf32>
    %378 = arith.subf %377, %371 : vector<2x32xf32>
    %379 = arith.mulf %378, %376 : vector<2x32xf32>
    %380 = arith.mulf %371, %351 : vector<2x32xf32>
    %381 = arith.addf %379, %380 : vector<2x32xf32>
    %382 = vector.broadcast %350 : vector<2x1xf32> to vector<2x32xf32>
    %383 = arith.mulf %382, %381 : vector<2x32xf32>
    %cst_141 = arith.constant 1.000000e+00 : f32
    %384 = vector.broadcast %cst_141 : f32 to vector<2x1xf32>
    %385 = arith.subf %384, %350 : vector<2x1xf32>
    %386 = vector.broadcast %385 : vector<2x1xf32> to vector<2x32xf32>
    %387 = arith.mulf %386, %351 : vector<2x32xf32>
    %388 = arith.addf %383, %387 : vector<2x32xf32>
    %389 = vector.broadcast %350 : vector<2x1xf32> to vector<2x32xf32>
    %390 = arith.mulf %389, %381 : vector<2x32xf32>
    %c0_142 = arith.constant 0 : index
    %c0_143 = arith.constant 0 : index
    %391 = vector.load %arg10[%c0_142, %c0_143] : memref<2x32xf32, #tpu.memory_space<vmem>>, vector<2x32xf32>
    tpu.vector_store %arg10[%c0_142, %c0_143], %388 {strides = array<i32>} : memref<2x32xf32, #tpu.memory_space<vmem>>, vector<2x32xf32>,
    %c4_144 = arith.constant 4 : index
    %c0_145 = arith.constant 0 : index
    %c0_146 = arith.constant 0 : index
    %392 = vector.load %arg8[%c4_144, %c0_145, %c0_146] : memref<8x2x32xf32, #tpu.memory_space<vmem>>, vector<1x2x32xf32>
    %393 = vector.shape_cast %392 : vector<1x2x32xf32> to vector<2x32xf32>
    %394 = vector.shape_cast %390 : vector<2x32xf32> to vector<1x2x32xf32>
    tpu.vector_store %arg8[%c4_144, %c0_145, %c0_146], %394 {strides = array<i32>} : memref<8x2x32xf32, #tpu.memory_space<vmem>>, vector<1x2x32xf32>,
    %c4_147 = arith.constant 4 : index
    %c0_148 = arith.constant 0 : index
    %c0_149 = arith.constant 0 : index
    %395 = vector.load %arg1[%c4_147, %c0_148, %c0_149] : memref<8x2x192xf32, #tpu.memory_space<vmem>>, vector<1x2x96xf32>
    %396 = vector.shape_cast %395 : vector<1x2x96xf32> to vector<2x96xf32>
    %c4_150 = arith.constant 4 : index
    %c0_151 = arith.constant 0 : index
    %c0_152 = arith.constant 0 : index
    %397 = vector.load %arg3[%c4_150, %c0_151, %c0_152] : memref<8x2x1xf32, #tpu.memory_space<vmem>>, vector<1x2x1xf32>
    %398 = vector.shape_cast %397 : vector<1x2x1xf32> to vector<2x1xf32>
    %c0_153 = arith.constant 0 : index
    %c0_154 = arith.constant 0 : index
    %399 = vector.load %arg9[%c0_153, %c0_154] : memref<2x32xf32, #tpu.memory_space<vmem>>, vector<2x32xf32>
    %400 = arith.truncf %399 : vector<2x32xf32> to vector<2x32xbf16>
    %cst_155 = arith.constant dense<0.000000e+00> : vector<2x96xf32>
    %401 = tpu.matmul %400, %4, %cst_155 {dimension_numbers = #tpu.dot_dimension_numbers<[1], [0], [0], [1], [0, 0, 1, 1], [], []>} : vector<2x32xbf16>, vector<32x96xbf16>, vector<2x96xf32> -> vector<2x96xf32>
    %402 = vector.broadcast %8 : vector<1x96xf32> to vector<2x96xf32>
    %403 = arith.addf %401, %402 : vector<2x96xf32>
    %404 = vector.extract_strided_slice %396 {offsets = [0, 0], sizes = [2, 32], strides = [1, 1]} : vector<2x96xf32> to vector<2x32xf32>
    %405 = vector.extract_strided_slice %403 {offsets = [0, 0], sizes = [2, 32], strides = [1, 1]} : vector<2x96xf32> to vector<2x32xf32>
    %406 = arith.addf %404, %405 : vector<2x32xf32>
    %407 = arith.negf %406 : vector<2x32xf32>
    %408 = math.exp %407 : vector<2x32xf32>
    %cst_156 = arith.constant 1.000000e+00 : f32
    %409 = vector.broadcast %cst_156 : f32 to vector<2x32xf32>
    %410 = arith.addf %409, %408 : vector<2x32xf32>
    %411 = arith.divf %409, %410 : vector<2x32xf32>
    %412 = vector.extract_strided_slice %396 {offsets = [0, 32], sizes = [2, 32], strides = [1, 1]} : vector<2x96xf32> to vector<2x32xf32>
    %413 = vector.extract_strided_slice %403 {offsets = [0, 32], sizes = [2, 32], strides = [1, 1]} : vector<2x96xf32> to vector<2x32xf32>
    %414 = arith.addf %412, %413 : vector<2x32xf32>
    %415 = arith.negf %414 : vector<2x32xf32>
    %416 = math.exp %415 : vector<2x32xf32>
    %cst_157 = arith.constant 1.000000e+00 : f32
    %417 = vector.broadcast %cst_157 : f32 to vector<2x32xf32>
    %418 = arith.addf %417, %416 : vector<2x32xf32>
    %419 = arith.divf %417, %418 : vector<2x32xf32>
    %420 = vector.extract_strided_slice %396 {offsets = [0, 64], sizes = [2, 32], strides = [1, 1]} : vector<2x96xf32> to vector<2x32xf32>
    %421 = vector.extract_strided_slice %403 {offsets = [0, 64], sizes = [2, 32], strides = [1, 1]} : vector<2x96xf32> to vector<2x32xf32>
    %422 = arith.mulf %411, %421 : vector<2x32xf32>
    %423 = arith.addf %420, %422 : vector<2x32xf32>
    %424 = math.tanh %423 : vector<2x32xf32>
    %cst_158 = arith.constant 1.000000e+00 : f32
    %425 = vector.broadcast %cst_158 : f32 to vector<2x32xf32>
    %426 = arith.subf %425, %419 : vector<2x32xf32>
    %427 = arith.mulf %426, %424 : vector<2x32xf32>
    %428 = arith.mulf %419, %399 : vector<2x32xf32>
    %429 = arith.addf %427, %428 : vector<2x32xf32>
    %430 = vector.broadcast %398 : vector<2x1xf32> to vector<2x32xf32>
    %431 = arith.mulf %430, %429 : vector<2x32xf32>
    %cst_159 = arith.constant 1.000000e+00 : f32
    %432 = vector.broadcast %cst_159 : f32 to vector<2x1xf32>
    %433 = arith.subf %432, %398 : vector<2x1xf32>
    %434 = vector.broadcast %433 : vector<2x1xf32> to vector<2x32xf32>
    %435 = arith.mulf %434, %399 : vector<2x32xf32>
    %436 = arith.addf %431, %435 : vector<2x32xf32>
    %437 = vector.broadcast %398 : vector<2x1xf32> to vector<2x32xf32>
    %438 = arith.mulf %437, %429 : vector<2x32xf32>
    %c0_160 = arith.constant 0 : index
    %c0_161 = arith.constant 0 : index
    %439 = vector.load %arg9[%c0_160, %c0_161] : memref<2x32xf32, #tpu.memory_space<vmem>>, vector<2x32xf32>
    tpu.vector_store %arg9[%c0_160, %c0_161], %436 {strides = array<i32>} : memref<2x32xf32, #tpu.memory_space<vmem>>, vector<2x32xf32>,
    %c4_162 = arith.constant 4 : index
    %c0_163 = arith.constant 0 : index
    %c0_164 = arith.constant 0 : index
    %440 = vector.load %arg7[%c4_162, %c0_163, %c0_164] : memref<8x2x32xf32, #tpu.memory_space<vmem>>, vector<1x2x32xf32>
    %441 = vector.shape_cast %440 : vector<1x2x32xf32> to vector<2x32xf32>
    %442 = vector.shape_cast %438 : vector<2x32xf32> to vector<1x2x32xf32>
    tpu.vector_store %arg7[%c4_162, %c0_163, %c0_164], %442 {strides = array<i32>} : memref<8x2x32xf32, #tpu.memory_space<vmem>>, vector<1x2x32xf32>,
    %c3_165 = arith.constant 3 : index
    %c0_166 = arith.constant 0 : index
    %c96_167 = arith.constant 96 : index
    %443 = vector.load %arg2[%c3_165, %c0_166, %c96_167] : memref<8x2x192xf32, #tpu.memory_space<vmem>>, vector<1x2x96xf32>
    %444 = vector.shape_cast %443 : vector<1x2x96xf32> to vector<2x96xf32>
    %c3_168 = arith.constant 3 : index
    %c0_169 = arith.constant 0 : index
    %c0_170 = arith.constant 0 : index
    %445 = vector.load %arg4[%c3_168, %c0_169, %c0_170] : memref<8x2x1xf32, #tpu.memory_space<vmem>>, vector<1x2x1xf32>
    %446 = vector.shape_cast %445 : vector<1x2x1xf32> to vector<2x1xf32>
    %c0_171 = arith.constant 0 : index
    %c0_172 = arith.constant 0 : index
    %447 = vector.load %arg10[%c0_171, %c0_172] : memref<2x32xf32, #tpu.memory_space<vmem>>, vector<2x32xf32>
    %448 = arith.truncf %447 : vector<2x32xf32> to vector<2x32xbf16>
    %cst_173 = arith.constant dense<0.000000e+00> : vector<2x96xf32>
    %449 = tpu.matmul %448, %6, %cst_173 {dimension_numbers = #tpu.dot_dimension_numbers<[1], [0], [0], [1], [0, 0, 1, 1], [], []>} : vector<2x32xbf16>, vector<32x96xbf16>, vector<2x96xf32> -> vector<2x96xf32>
    %450 = vector.broadcast %10 : vector<1x96xf32> to vector<2x96xf32>
    %451 = arith.addf %449, %450 : vector<2x96xf32>
    %452 = vector.extract_strided_slice %444 {offsets = [0, 0], sizes = [2, 32], strides = [1, 1]} : vector<2x96xf32> to vector<2x32xf32>
    %453 = vector.extract_strided_slice %451 {offsets = [0, 0], sizes = [2, 32], strides = [1, 1]} : vector<2x96xf32> to vector<2x32xf32>
    %454 = arith.addf %452, %453 : vector<2x32xf32>
    %455 = arith.negf %454 : vector<2x32xf32>
    %456 = math.exp %455 : vector<2x32xf32>
    %cst_174 = arith.constant 1.000000e+00 : f32
    %457 = vector.broadcast %cst_174 : f32 to vector<2x32xf32>
    %458 = arith.addf %457, %456 : vector<2x32xf32>
    %459 = arith.divf %457, %458 : vector<2x32xf32>
    %460 = vector.extract_strided_slice %444 {offsets = [0, 32], sizes = [2, 32], strides = [1, 1]} : vector<2x96xf32> to vector<2x32xf32>
    %461 = vector.extract_strided_slice %451 {offsets = [0, 32], sizes = [2, 32], strides = [1, 1]} : vector<2x96xf32> to vector<2x32xf32>
    %462 = arith.addf %460, %461 : vector<2x32xf32>
    %463 = arith.negf %462 : vector<2x32xf32>
    %464 = math.exp %463 : vector<2x32xf32>
    %cst_175 = arith.constant 1.000000e+00 : f32
    %465 = vector.broadcast %cst_175 : f32 to vector<2x32xf32>
    %466 = arith.addf %465, %464 : vector<2x32xf32>
    %467 = arith.divf %465, %466 : vector<2x32xf32>
    %468 = vector.extract_strided_slice %444 {offsets = [0, 64], sizes = [2, 32], strides = [1, 1]} : vector<2x96xf32> to vector<2x32xf32>
    %469 = vector.extract_strided_slice %451 {offsets = [0, 64], sizes = [2, 32], strides = [1, 1]} : vector<2x96xf32> to vector<2x32xf32>
    %470 = arith.mulf %459, %469 : vector<2x32xf32>
    %471 = arith.addf %468, %470 : vector<2x32xf32>
    %472 = math.tanh %471 : vector<2x32xf32>
    %cst_176 = arith.constant 1.000000e+00 : f32
    %473 = vector.broadcast %cst_176 : f32 to vector<2x32xf32>
    %474 = arith.subf %473, %467 : vector<2x32xf32>
    %475 = arith.mulf %474, %472 : vector<2x32xf32>
    %476 = arith.mulf %467, %447 : vector<2x32xf32>
    %477 = arith.addf %475, %476 : vector<2x32xf32>
    %478 = vector.broadcast %446 : vector<2x1xf32> to vector<2x32xf32>
    %479 = arith.mulf %478, %477 : vector<2x32xf32>
    %cst_177 = arith.constant 1.000000e+00 : f32
    %480 = vector.broadcast %cst_177 : f32 to vector<2x1xf32>
    %481 = arith.subf %480, %446 : vector<2x1xf32>
    %482 = vector.broadcast %481 : vector<2x1xf32> to vector<2x32xf32>
    %483 = arith.mulf %482, %447 : vector<2x32xf32>
    %484 = arith.addf %479, %483 : vector<2x32xf32>
    %485 = vector.broadcast %446 : vector<2x1xf32> to vector<2x32xf32>
    %486 = arith.mulf %485, %477 : vector<2x32xf32>
    %c0_178 = arith.constant 0 : index
    %c0_179 = arith.constant 0 : index
    %487 = vector.load %arg10[%c0_178, %c0_179] : memref<2x32xf32, #tpu.memory_space<vmem>>, vector<2x32xf32>
    tpu.vector_store %arg10[%c0_178, %c0_179], %484 {strides = array<i32>} : memref<2x32xf32, #tpu.memory_space<vmem>>, vector<2x32xf32>,
    %c3_180 = arith.constant 3 : index
    %c0_181 = arith.constant 0 : index
    %c0_182 = arith.constant 0 : index
    %488 = vector.load %arg8[%c3_180, %c0_181, %c0_182] : memref<8x2x32xf32, #tpu.memory_space<vmem>>, vector<1x2x32xf32>
    %489 = vector.shape_cast %488 : vector<1x2x32xf32> to vector<2x32xf32>
    %490 = vector.shape_cast %486 : vector<2x32xf32> to vector<1x2x32xf32>
    tpu.vector_store %arg8[%c3_180, %c0_181, %c0_182], %490 {strides = array<i32>} : memref<8x2x32xf32, #tpu.memory_space<vmem>>, vector<1x2x32xf32>,
    %c5_183 = arith.constant 5 : index
    %c0_184 = arith.constant 0 : index
    %c0_185 = arith.constant 0 : index
    %491 = vector.load %arg1[%c5_183, %c0_184, %c0_185] : memref<8x2x192xf32, #tpu.memory_space<vmem>>, vector<1x2x96xf32>
    %492 = vector.shape_cast %491 : vector<1x2x96xf32> to vector<2x96xf32>
    %c5_186 = arith.constant 5 : index
    %c0_187 = arith.constant 0 : index
    %c0_188 = arith.constant 0 : index
    %493 = vector.load %arg3[%c5_186, %c0_187, %c0_188] : memref<8x2x1xf32, #tpu.memory_space<vmem>>, vector<1x2x1xf32>
    %494 = vector.shape_cast %493 : vector<1x2x1xf32> to vector<2x1xf32>
    %c0_189 = arith.constant 0 : index
    %c0_190 = arith.constant 0 : index
    %495 = vector.load %arg9[%c0_189, %c0_190] : memref<2x32xf32, #tpu.memory_space<vmem>>, vector<2x32xf32>
    %496 = arith.truncf %495 : vector<2x32xf32> to vector<2x32xbf16>
    %cst_191 = arith.constant dense<0.000000e+00> : vector<2x96xf32>
    %497 = tpu.matmul %496, %4, %cst_191 {dimension_numbers = #tpu.dot_dimension_numbers<[1], [0], [0], [1], [0, 0, 1, 1], [], []>} : vector<2x32xbf16>, vector<32x96xbf16>, vector<2x96xf32> -> vector<2x96xf32>
    %498 = vector.broadcast %8 : vector<1x96xf32> to vector<2x96xf32>
    %499 = arith.addf %497, %498 : vector<2x96xf32>
    %500 = vector.extract_strided_slice %492 {offsets = [0, 0], sizes = [2, 32], strides = [1, 1]} : vector<2x96xf32> to vector<2x32xf32>
    %501 = vector.extract_strided_slice %499 {offsets = [0, 0], sizes = [2, 32], strides = [1, 1]} : vector<2x96xf32> to vector<2x32xf32>
    %502 = arith.addf %500, %501 : vector<2x32xf32>
    %503 = arith.negf %502 : vector<2x32xf32>
    %504 = math.exp %503 : vector<2x32xf32>
    %cst_192 = arith.constant 1.000000e+00 : f32
    %505 = vector.broadcast %cst_192 : f32 to vector<2x32xf32>
    %506 = arith.addf %505, %504 : vector<2x32xf32>
    %507 = arith.divf %505, %506 : vector<2x32xf32>
    %508 = vector.extract_strided_slice %492 {offsets = [0, 32], sizes = [2, 32], strides = [1, 1]} : vector<2x96xf32> to vector<2x32xf32>
    %509 = vector.extract_strided_slice %499 {offsets = [0, 32], sizes = [2, 32], strides = [1, 1]} : vector<2x96xf32> to vector<2x32xf32>
    %510 = arith.addf %508, %509 : vector<2x32xf32>
    %511 = arith.negf %510 : vector<2x32xf32>
    %512 = math.exp %511 : vector<2x32xf32>
    %cst_193 = arith.constant 1.000000e+00 : f32
    %513 = vector.broadcast %cst_193 : f32 to vector<2x32xf32>
    %514 = arith.addf %513, %512 : vector<2x32xf32>
    %515 = arith.divf %513, %514 : vector<2x32xf32>
    %516 = vector.extract_strided_slice %492 {offsets = [0, 64], sizes = [2, 32], strides = [1, 1]} : vector<2x96xf32> to vector<2x32xf32>
    %517 = vector.extract_strided_slice %499 {offsets = [0, 64], sizes = [2, 32], strides = [1, 1]} : vector<2x96xf32> to vector<2x32xf32>
    %518 = arith.mulf %507, %517 : vector<2x32xf32>
    %519 = arith.addf %516, %518 : vector<2x32xf32>
    %520 = math.tanh %519 : vector<2x32xf32>
    %cst_194 = arith.constant 1.000000e+00 : f32
    %521 = vector.broadcast %cst_194 : f32 to vector<2x32xf32>
    %522 = arith.subf %521, %515 : vector<2x32xf32>
    %523 = arith.mulf %522, %520 : vector<2x32xf32>
    %524 = arith.mulf %515, %495 : vector<2x32xf32>
    %525 = arith.addf %523, %524 : vector<2x32xf32>
    %526 = vector.broadcast %494 : vector<2x1xf32> to vector<2x32xf32>
    %527 = arith.mulf %526, %525 : vector<2x32xf32>
    %cst_195 = arith.constant 1.000000e+00 : f32
    %528 = vector.broadcast %cst_195 : f32 to vector<2x1xf32>
    %529 = arith.subf %528, %494 : vector<2x1xf32>
    %530 = vector.broadcast %529 : vector<2x1xf32> to vector<2x32xf32>
    %531 = arith.mulf %530, %495 : vector<2x32xf32>
    %532 = arith.addf %527, %531 : vector<2x32xf32>
    %533 = vector.broadcast %494 : vector<2x1xf32> to vector<2x32xf32>
    %534 = arith.mulf %533, %525 : vector<2x32xf32>
    %c0_196 = arith.constant 0 : index
    %c0_197 = arith.constant 0 : index
    %535 = vector.load %arg9[%c0_196, %c0_197] : memref<2x32xf32, #tpu.memory_space<vmem>>, vector<2x32xf32>
    tpu.vector_store %arg9[%c0_196, %c0_197], %532 {strides = array<i32>} : memref<2x32xf32, #tpu.memory_space<vmem>>, vector<2x32xf32>,
    %c5_198 = arith.constant 5 : index
    %c0_199 = arith.constant 0 : index
    %c0_200 = arith.constant 0 : index
    %536 = vector.load %arg7[%c5_198, %c0_199, %c0_200] : memref<8x2x32xf32, #tpu.memory_space<vmem>>, vector<1x2x32xf32>
    %537 = vector.shape_cast %536 : vector<1x2x32xf32> to vector<2x32xf32>
    %538 = vector.shape_cast %534 : vector<2x32xf32> to vector<1x2x32xf32>
    tpu.vector_store %arg7[%c5_198, %c0_199, %c0_200], %538 {strides = array<i32>} : memref<8x2x32xf32, #tpu.memory_space<vmem>>, vector<1x2x32xf32>,
    %c2_201 = arith.constant 2 : index
    %c0_202 = arith.constant 0 : index
    %c96_203 = arith.constant 96 : index
    %539 = vector.load %arg2[%c2_201, %c0_202, %c96_203] : memref<8x2x192xf32, #tpu.memory_space<vmem>>, vector<1x2x96xf32>
    %540 = vector.shape_cast %539 : vector<1x2x96xf32> to vector<2x96xf32>
    %c2_204 = arith.constant 2 : index
    %c0_205 = arith.constant 0 : index
    %c0_206 = arith.constant 0 : index
    %541 = vector.load %arg4[%c2_204, %c0_205, %c0_206] : memref<8x2x1xf32, #tpu.memory_space<vmem>>, vector<1x2x1xf32>
    %542 = vector.shape_cast %541 : vector<1x2x1xf32> to vector<2x1xf32>
    %c0_207 = arith.constant 0 : index
    %c0_208 = arith.constant 0 : index
    %543 = vector.load %arg10[%c0_207, %c0_208] : memref<2x32xf32, #tpu.memory_space<vmem>>, vector<2x32xf32>
    %544 = arith.truncf %543 : vector<2x32xf32> to vector<2x32xbf16>
    %cst_209 = arith.constant dense<0.000000e+00> : vector<2x96xf32>
    %545 = tpu.matmul %544, %6, %cst_209 {dimension_numbers = #tpu.dot_dimension_numbers<[1], [0], [0], [1], [0, 0, 1, 1], [], []>} : vector<2x32xbf16>, vector<32x96xbf16>, vector<2x96xf32> -> vector<2x96xf32>
    %546 = vector.broadcast %10 : vector<1x96xf32> to vector<2x96xf32>
    %547 = arith.addf %545, %546 : vector<2x96xf32>
    %548 = vector.extract_strided_slice %540 {offsets = [0, 0], sizes = [2, 32], strides = [1, 1]} : vector<2x96xf32> to vector<2x32xf32>
    %549 = vector.extract_strided_slice %547 {offsets = [0, 0], sizes = [2, 32], strides = [1, 1]} : vector<2x96xf32> to vector<2x32xf32>
    %550 = arith.addf %548, %549 : vector<2x32xf32>
    %551 = arith.negf %550 : vector<2x32xf32>
    %552 = math.exp %551 : vector<2x32xf32>
    %cst_210 = arith.constant 1.000000e+00 : f32
    %553 = vector.broadcast %cst_210 : f32 to vector<2x32xf32>
    %554 = arith.addf %553, %552 : vector<2x32xf32>
    %555 = arith.divf %553, %554 : vector<2x32xf32>
    %556 = vector.extract_strided_slice %540 {offsets = [0, 32], sizes = [2, 32], strides = [1, 1]} : vector<2x96xf32> to vector<2x32xf32>
    %557 = vector.extract_strided_slice %547 {offsets = [0, 32], sizes = [2, 32], strides = [1, 1]} : vector<2x96xf32> to vector<2x32xf32>
    %558 = arith.addf %556, %557 : vector<2x32xf32>
    %559 = arith.negf %558 : vector<2x32xf32>
    %560 = math.exp %559 : vector<2x32xf32>
    %cst_211 = arith.constant 1.000000e+00 : f32
    %561 = vector.broadcast %cst_211 : f32 to vector<2x32xf32>
    %562 = arith.addf %561, %560 : vector<2x32xf32>
    %563 = arith.divf %561, %562 : vector<2x32xf32>
    %564 = vector.extract_strided_slice %540 {offsets = [0, 64], sizes = [2, 32], strides = [1, 1]} : vector<2x96xf32> to vector<2x32xf32>
    %565 = vector.extract_strided_slice %547 {offsets = [0, 64], sizes = [2, 32], strides = [1, 1]} : vector<2x96xf32> to vector<2x32xf32>
    %566 = arith.mulf %555, %565 : vector<2x32xf32>
    %567 = arith.addf %564, %566 : vector<2x32xf32>
    %568 = math.tanh %567 : vector<2x32xf32>
    %cst_212 = arith.constant 1.000000e+00 : f32
    %569 = vector.broadcast %cst_212 : f32 to vector<2x32xf32>
    %570 = arith.subf %569, %563 : vector<2x32xf32>
    %571 = arith.mulf %570, %568 : vector<2x32xf32>
    %572 = arith.mulf %563, %543 : vector<2x32xf32>
    %573 = arith.addf %571, %572 : vector<2x32xf32>
    %574 = vector.broadcast %542 : vector<2x1xf32> to vector<2x32xf32>
    %575 = arith.mulf %574, %573 : vector<2x32xf32>
    %cst_213 = arith.constant 1.000000e+00 : f32
    %576 = vector.broadcast %cst_213 : f32 to vector<2x1xf32>
    %577 = arith.subf %576, %542 : vector<2x1xf32>
    %578 = vector.broadcast %577 : vector<2x1xf32> to vector<2x32xf32>
    %579 = arith.mulf %578, %543 : vector<2x32xf32>
    %580 = arith.addf %575, %579 : vector<2x32xf32>
    %581 = vector.broadcast %542 : vector<2x1xf32> to vector<2x32xf32>
    %582 = arith.mulf %581, %573 : vector<2x32xf32>
    %c0_214 = arith.constant 0 : index
    %c0_215 = arith.constant 0 : index
    %583 = vector.load %arg10[%c0_214, %c0_215] : memref<2x32xf32, #tpu.memory_space<vmem>>, vector<2x32xf32>
    tpu.vector_store %arg10[%c0_214, %c0_215], %580 {strides = array<i32>} : memref<2x32xf32, #tpu.memory_space<vmem>>, vector<2x32xf32>,
    %c2_216 = arith.constant 2 : index
    %c0_217 = arith.constant 0 : index
    %c0_218 = arith.constant 0 : index
    %584 = vector.load %arg8[%c2_216, %c0_217, %c0_218] : memref<8x2x32xf32, #tpu.memory_space<vmem>>, vector<1x2x32xf32>
    %585 = vector.shape_cast %584 : vector<1x2x32xf32> to vector<2x32xf32>
    %586 = vector.shape_cast %582 : vector<2x32xf32> to vector<1x2x32xf32>
    tpu.vector_store %arg8[%c2_216, %c0_217, %c0_218], %586 {strides = array<i32>} : memref<8x2x32xf32, #tpu.memory_space<vmem>>, vector<1x2x32xf32>,
    %c6_219 = arith.constant 6 : index
    %c0_220 = arith.constant 0 : index
    %c0_221 = arith.constant 0 : index
    %587 = vector.load %arg1[%c6_219, %c0_220, %c0_221] : memref<8x2x192xf32, #tpu.memory_space<vmem>>, vector<1x2x96xf32>
    %588 = vector.shape_cast %587 : vector<1x2x96xf32> to vector<2x96xf32>
    %c6_222 = arith.constant 6 : index
    %c0_223 = arith.constant 0 : index
    %c0_224 = arith.constant 0 : index
    %589 = vector.load %arg3[%c6_222, %c0_223, %c0_224] : memref<8x2x1xf32, #tpu.memory_space<vmem>>, vector<1x2x1xf32>
    %590 = vector.shape_cast %589 : vector<1x2x1xf32> to vector<2x1xf32>
    %c0_225 = arith.constant 0 : index
    %c0_226 = arith.constant 0 : index
    %591 = vector.load %arg9[%c0_225, %c0_226] : memref<2x32xf32, #tpu.memory_space<vmem>>, vector<2x32xf32>
    %592 = arith.truncf %591 : vector<2x32xf32> to vector<2x32xbf16>
    %cst_227 = arith.constant dense<0.000000e+00> : vector<2x96xf32>
    %593 = tpu.matmul %592, %4, %cst_227 {dimension_numbers = #tpu.dot_dimension_numbers<[1], [0], [0], [1], [0, 0, 1, 1], [], []>} : vector<2x32xbf16>, vector<32x96xbf16>, vector<2x96xf32> -> vector<2x96xf32>
    %594 = vector.broadcast %8 : vector<1x96xf32> to vector<2x96xf32>
    %595 = arith.addf %593, %594 : vector<2x96xf32>
    %596 = vector.extract_strided_slice %588 {offsets = [0, 0], sizes = [2, 32], strides = [1, 1]} : vector<2x96xf32> to vector<2x32xf32>
    %597 = vector.extract_strided_slice %595 {offsets = [0, 0], sizes = [2, 32], strides = [1, 1]} : vector<2x96xf32> to vector<2x32xf32>
    %598 = arith.addf %596, %597 : vector<2x32xf32>
    %599 = arith.negf %598 : vector<2x32xf32>
    %600 = math.exp %599 : vector<2x32xf32>
    %cst_228 = arith.constant 1.000000e+00 : f32
    %601 = vector.broadcast %cst_228 : f32 to vector<2x32xf32>
    %602 = arith.addf %601, %600 : vector<2x32xf32>
    %603 = arith.divf %601, %602 : vector<2x32xf32>
    %604 = vector.extract_strided_slice %588 {offsets = [0, 32], sizes = [2, 32], strides = [1, 1]} : vector<2x96xf32> to vector<2x32xf32>
    %605 = vector.extract_strided_slice %595 {offsets = [0, 32], sizes = [2, 32], strides = [1, 1]} : vector<2x96xf32> to vector<2x32xf32>
    %606 = arith.addf %604, %605 : vector<2x32xf32>
    %607 = arith.negf %606 : vector<2x32xf32>
    %608 = math.exp %607 : vector<2x32xf32>
    %cst_229 = arith.constant 1.000000e+00 : f32
    %609 = vector.broadcast %cst_229 : f32 to vector<2x32xf32>
    %610 = arith.addf %609, %608 : vector<2x32xf32>
    %611 = arith.divf %609, %610 : vector<2x32xf32>
    %612 = vector.extract_strided_slice %588 {offsets = [0, 64], sizes = [2, 32], strides = [1, 1]} : vector<2x96xf32> to vector<2x32xf32>
    %613 = vector.extract_strided_slice %595 {offsets = [0, 64], sizes = [2, 32], strides = [1, 1]} : vector<2x96xf32> to vector<2x32xf32>
    %614 = arith.mulf %603, %613 : vector<2x32xf32>
    %615 = arith.addf %612, %614 : vector<2x32xf32>
    %616 = math.tanh %615 : vector<2x32xf32>
    %cst_230 = arith.constant 1.000000e+00 : f32
    %617 = vector.broadcast %cst_230 : f32 to vector<2x32xf32>
    %618 = arith.subf %617, %611 : vector<2x32xf32>
    %619 = arith.mulf %618, %616 : vector<2x32xf32>
    %620 = arith.mulf %611, %591 : vector<2x32xf32>
    %621 = arith.addf %619, %620 : vector<2x32xf32>
    %622 = vector.broadcast %590 : vector<2x1xf32> to vector<2x32xf32>
    %623 = arith.mulf %622, %621 : vector<2x32xf32>
    %cst_231 = arith.constant 1.000000e+00 : f32
    %624 = vector.broadcast %cst_231 : f32 to vector<2x1xf32>
    %625 = arith.subf %624, %590 : vector<2x1xf32>
    %626 = vector.broadcast %625 : vector<2x1xf32> to vector<2x32xf32>
    %627 = arith.mulf %626, %591 : vector<2x32xf32>
    %628 = arith.addf %623, %627 : vector<2x32xf32>
    %629 = vector.broadcast %590 : vector<2x1xf32> to vector<2x32xf32>
    %630 = arith.mulf %629, %621 : vector<2x32xf32>
    %c0_232 = arith.constant 0 : index
    %c0_233 = arith.constant 0 : index
    %631 = vector.load %arg9[%c0_232, %c0_233] : memref<2x32xf32, #tpu.memory_space<vmem>>, vector<2x32xf32>
    tpu.vector_store %arg9[%c0_232, %c0_233], %628 {strides = array<i32>} : memref<2x32xf32, #tpu.memory_space<vmem>>, vector<2x32xf32>,
    %c6_234 = arith.constant 6 : index
    %c0_235 = arith.constant 0 : index
    %c0_236 = arith.constant 0 : index
    %632 = vector.load %arg7[%c6_234, %c0_235, %c0_236] : memref<8x2x32xf32, #tpu.memory_space<vmem>>, vector<1x2x32xf32>
    %633 = vector.shape_cast %632 : vector<1x2x32xf32> to vector<2x32xf32>
    %634 = vector.shape_cast %630 : vector<2x32xf32> to vector<1x2x32xf32>
    tpu.vector_store %arg7[%c6_234, %c0_235, %c0_236], %634 {strides = array<i32>} : memref<8x2x32xf32, #tpu.memory_space<vmem>>, vector<1x2x32xf32>,
    %c1_237 = arith.constant 1 : index
    %c0_238 = arith.constant 0 : index
    %c96_239 = arith.constant 96 : index
    %635 = vector.load %arg2[%c1_237, %c0_238, %c96_239] : memref<8x2x192xf32, #tpu.memory_space<vmem>>, vector<1x2x96xf32>
    %636 = vector.shape_cast %635 : vector<1x2x96xf32> to vector<2x96xf32>
    %c1_240 = arith.constant 1 : index
    %c0_241 = arith.constant 0 : index
    %c0_242 = arith.constant 0 : index
    %637 = vector.load %arg4[%c1_240, %c0_241, %c0_242] : memref<8x2x1xf32, #tpu.memory_space<vmem>>, vector<1x2x1xf32>
    %638 = vector.shape_cast %637 : vector<1x2x1xf32> to vector<2x1xf32>
    %c0_243 = arith.constant 0 : index
    %c0_244 = arith.constant 0 : index
    %639 = vector.load %arg10[%c0_243, %c0_244] : memref<2x32xf32, #tpu.memory_space<vmem>>, vector<2x32xf32>
    %640 = arith.truncf %639 : vector<2x32xf32> to vector<2x32xbf16>
    %cst_245 = arith.constant dense<0.000000e+00> : vector<2x96xf32>
    %641 = tpu.matmul %640, %6, %cst_245 {dimension_numbers = #tpu.dot_dimension_numbers<[1], [0], [0], [1], [0, 0, 1, 1], [], []>} : vector<2x32xbf16>, vector<32x96xbf16>, vector<2x96xf32> -> vector<2x96xf32>
    %642 = vector.broadcast %10 : vector<1x96xf32> to vector<2x96xf32>
    %643 = arith.addf %641, %642 : vector<2x96xf32>
    %644 = vector.extract_strided_slice %636 {offsets = [0, 0], sizes = [2, 32], strides = [1, 1]} : vector<2x96xf32> to vector<2x32xf32>
    %645 = vector.extract_strided_slice %643 {offsets = [0, 0], sizes = [2, 32], strides = [1, 1]} : vector<2x96xf32> to vector<2x32xf32>
    %646 = arith.addf %644, %645 : vector<2x32xf32>
    %647 = arith.negf %646 : vector<2x32xf32>
    %648 = math.exp %647 : vector<2x32xf32>
    %cst_246 = arith.constant 1.000000e+00 : f32
    %649 = vector.broadcast %cst_246 : f32 to vector<2x32xf32>
    %650 = arith.addf %649, %648 : vector<2x32xf32>
    %651 = arith.divf %649, %650 : vector<2x32xf32>
    %652 = vector.extract_strided_slice %636 {offsets = [0, 32], sizes = [2, 32], strides = [1, 1]} : vector<2x96xf32> to vector<2x32xf32>
    %653 = vector.extract_strided_slice %643 {offsets = [0, 32], sizes = [2, 32], strides = [1, 1]} : vector<2x96xf32> to vector<2x32xf32>
    %654 = arith.addf %652, %653 : vector<2x32xf32>
    %655 = arith.negf %654 : vector<2x32xf32>
    %656 = math.exp %655 : vector<2x32xf32>
    %cst_247 = arith.constant 1.000000e+00 : f32
    %657 = vector.broadcast %cst_247 : f32 to vector<2x32xf32>
    %658 = arith.addf %657, %656 : vector<2x32xf32>
    %659 = arith.divf %657, %658 : vector<2x32xf32>
    %660 = vector.extract_strided_slice %636 {offsets = [0, 64], sizes = [2, 32], strides = [1, 1]} : vector<2x96xf32> to vector<2x32xf32>
    %661 = vector.extract_strided_slice %643 {offsets = [0, 64], sizes = [2, 32], strides = [1, 1]} : vector<2x96xf32> to vector<2x32xf32>
    %662 = arith.mulf %651, %661 : vector<2x32xf32>
    %663 = arith.addf %660, %662 : vector<2x32xf32>
    %664 = math.tanh %663 : vector<2x32xf32>
    %cst_248 = arith.constant 1.000000e+00 : f32
    %665 = vector.broadcast %cst_248 : f32 to vector<2x32xf32>
    %666 = arith.subf %665, %659 : vector<2x32xf32>
    %667 = arith.mulf %666, %664 : vector<2x32xf32>
    %668 = arith.mulf %659, %639 : vector<2x32xf32>
    %669 = arith.addf %667, %668 : vector<2x32xf32>
    %670 = vector.broadcast %638 : vector<2x1xf32> to vector<2x32xf32>
    %671 = arith.mulf %670, %669 : vector<2x32xf32>
    %cst_249 = arith.constant 1.000000e+00 : f32
    %672 = vector.broadcast %cst_249 : f32 to vector<2x1xf32>
    %673 = arith.subf %672, %638 : vector<2x1xf32>
    %674 = vector.broadcast %673 : vector<2x1xf32> to vector<2x32xf32>
    %675 = arith.mulf %674, %639 : vector<2x32xf32>
    %676 = arith.addf %671, %675 : vector<2x32xf32>
    %677 = vector.broadcast %638 : vector<2x1xf32> to vector<2x32xf32>
    %678 = arith.mulf %677, %669 : vector<2x32xf32>
    %c0_250 = arith.constant 0 : index
    %c0_251 = arith.constant 0 : index
    %679 = vector.load %arg10[%c0_250, %c0_251] : memref<2x32xf32, #tpu.memory_space<vmem>>, vector<2x32xf32>
    tpu.vector_store %arg10[%c0_250, %c0_251], %676 {strides = array<i32>} : memref<2x32xf32, #tpu.memory_space<vmem>>, vector<2x32xf32>,
    %c1_252 = arith.constant 1 : index
    %c0_253 = arith.constant 0 : index
    %c0_254 = arith.constant 0 : index
    %680 = vector.load %arg8[%c1_252, %c0_253, %c0_254] : memref<8x2x32xf32, #tpu.memory_space<vmem>>, vector<1x2x32xf32>
    %681 = vector.shape_cast %680 : vector<1x2x32xf32> to vector<2x32xf32>
    %682 = vector.shape_cast %678 : vector<2x32xf32> to vector<1x2x32xf32>
    tpu.vector_store %arg8[%c1_252, %c0_253, %c0_254], %682 {strides = array<i32>} : memref<8x2x32xf32, #tpu.memory_space<vmem>>, vector<1x2x32xf32>,
    %c7_255 = arith.constant 7 : index
    %c0_256 = arith.constant 0 : index
    %c0_257 = arith.constant 0 : index
    %683 = vector.load %arg1[%c7_255, %c0_256, %c0_257] : memref<8x2x192xf32, #tpu.memory_space<vmem>>, vector<1x2x96xf32>
    %684 = vector.shape_cast %683 : vector<1x2x96xf32> to vector<2x96xf32>
    %c7_258 = arith.constant 7 : index
    %c0_259 = arith.constant 0 : index
    %c0_260 = arith.constant 0 : index
    %685 = vector.load %arg3[%c7_258, %c0_259, %c0_260] : memref<8x2x1xf32, #tpu.memory_space<vmem>>, vector<1x2x1xf32>
    %686 = vector.shape_cast %685 : vector<1x2x1xf32> to vector<2x1xf32>
    %c0_261 = arith.constant 0 : index
    %c0_262 = arith.constant 0 : index
    %687 = vector.load %arg9[%c0_261, %c0_262] : memref<2x32xf32, #tpu.memory_space<vmem>>, vector<2x32xf32>
    %688 = arith.truncf %687 : vector<2x32xf32> to vector<2x32xbf16>
    %cst_263 = arith.constant dense<0.000000e+00> : vector<2x96xf32>
    %689 = tpu.matmul %688, %4, %cst_263 {dimension_numbers = #tpu.dot_dimension_numbers<[1], [0], [0], [1], [0, 0, 1, 1], [], []>} : vector<2x32xbf16>, vector<32x96xbf16>, vector<2x96xf32> -> vector<2x96xf32>
    %690 = vector.broadcast %8 : vector<1x96xf32> to vector<2x96xf32>
    %691 = arith.addf %689, %690 : vector<2x96xf32>
    %692 = vector.extract_strided_slice %684 {offsets = [0, 0], sizes = [2, 32], strides = [1, 1]} : vector<2x96xf32> to vector<2x32xf32>
    %693 = vector.extract_strided_slice %691 {offsets = [0, 0], sizes = [2, 32], strides = [1, 1]} : vector<2x96xf32> to vector<2x32xf32>
    %694 = arith.addf %692, %693 : vector<2x32xf32>
    %695 = arith.negf %694 : vector<2x32xf32>
    %696 = math.exp %695 : vector<2x32xf32>
    %cst_264 = arith.constant 1.000000e+00 : f32
    %697 = vector.broadcast %cst_264 : f32 to vector<2x32xf32>
    %698 = arith.addf %697, %696 : vector<2x32xf32>
    %699 = arith.divf %697, %698 : vector<2x32xf32>
    %700 = vector.extract_strided_slice %684 {offsets = [0, 32], sizes = [2, 32], strides = [1, 1]} : vector<2x96xf32> to vector<2x32xf32>
    %701 = vector.extract_strided_slice %691 {offsets = [0, 32], sizes = [2, 32], strides = [1, 1]} : vector<2x96xf32> to vector<2x32xf32>
    %702 = arith.addf %700, %701 : vector<2x32xf32>
    %703 = arith.negf %702 : vector<2x32xf32>
    %704 = math.exp %703 : vector<2x32xf32>
    %cst_265 = arith.constant 1.000000e+00 : f32
    %705 = vector.broadcast %cst_265 : f32 to vector<2x32xf32>
    %706 = arith.addf %705, %704 : vector<2x32xf32>
    %707 = arith.divf %705, %706 : vector<2x32xf32>
    %708 = vector.extract_strided_slice %684 {offsets = [0, 64], sizes = [2, 32], strides = [1, 1]} : vector<2x96xf32> to vector<2x32xf32>
    %709 = vector.extract_strided_slice %691 {offsets = [0, 64], sizes = [2, 32], strides = [1, 1]} : vector<2x96xf32> to vector<2x32xf32>
    %710 = arith.mulf %699, %709 : vector<2x32xf32>
    %711 = arith.addf %708, %710 : vector<2x32xf32>
    %712 = math.tanh %711 : vector<2x32xf32>
    %cst_266 = arith.constant 1.000000e+00 : f32
    %713 = vector.broadcast %cst_266 : f32 to vector<2x32xf32>
    %714 = arith.subf %713, %707 : vector<2x32xf32>
    %715 = arith.mulf %714, %712 : vector<2x32xf32>
    %716 = arith.mulf %707, %687 : vector<2x32xf32>
    %717 = arith.addf %715, %716 : vector<2x32xf32>
    %718 = vector.broadcast %686 : vector<2x1xf32> to vector<2x32xf32>
    %719 = arith.mulf %718, %717 : vector<2x32xf32>
    %cst_267 = arith.constant 1.000000e+00 : f32
    %720 = vector.broadcast %cst_267 : f32 to vector<2x1xf32>
    %721 = arith.subf %720, %686 : vector<2x1xf32>
    %722 = vector.broadcast %721 : vector<2x1xf32> to vector<2x32xf32>
    %723 = arith.mulf %722, %687 : vector<2x32xf32>
    %724 = arith.addf %719, %723 : vector<2x32xf32>
    %725 = vector.broadcast %686 : vector<2x1xf32> to vector<2x32xf32>
    %726 = arith.mulf %725, %717 : vector<2x32xf32>
    %c0_268 = arith.constant 0 : index
    %c0_269 = arith.constant 0 : index
    %727 = vector.load %arg9[%c0_268, %c0_269] : memref<2x32xf32, #tpu.memory_space<vmem>>, vector<2x32xf32>
    tpu.vector_store %arg9[%c0_268, %c0_269], %724 {strides = array<i32>} : memref<2x32xf32, #tpu.memory_space<vmem>>, vector<2x32xf32>,
    %c7_270 = arith.constant 7 : index
    %c0_271 = arith.constant 0 : index
    %c0_272 = arith.constant 0 : index
    %728 = vector.load %arg7[%c7_270, %c0_271, %c0_272] : memref<8x2x32xf32, #tpu.memory_space<vmem>>, vector<1x2x32xf32>
    %729 = vector.shape_cast %728 : vector<1x2x32xf32> to vector<2x32xf32>
    %730 = vector.shape_cast %726 : vector<2x32xf32> to vector<1x2x32xf32>
    tpu.vector_store %arg7[%c7_270, %c0_271, %c0_272], %730 {strides = array<i32>} : memref<8x2x32xf32, #tpu.memory_space<vmem>>, vector<1x2x32xf32>,
    %c0_273 = arith.constant 0 : index
    %c0_274 = arith.constant 0 : index
    %c96_275 = arith.constant 96 : index
    %731 = vector.load %arg2[%c0_273, %c0_274, %c96_275] : memref<8x2x192xf32, #tpu.memory_space<vmem>>, vector<1x2x96xf32>
    %732 = vector.shape_cast %731 : vector<1x2x96xf32> to vector<2x96xf32>
    %c0_276 = arith.constant 0 : index
    %c0_277 = arith.constant 0 : index
    %c0_278 = arith.constant 0 : index
    %733 = vector.load %arg4[%c0_276, %c0_277, %c0_278] : memref<8x2x1xf32, #tpu.memory_space<vmem>>, vector<1x2x1xf32>
    %734 = vector.shape_cast %733 : vector<1x2x1xf32> to vector<2x1xf32>
    %c0_279 = arith.constant 0 : index
    %c0_280 = arith.constant 0 : index
    %735 = vector.load %arg10[%c0_279, %c0_280] : memref<2x32xf32, #tpu.memory_space<vmem>>, vector<2x32xf32>
    %736 = arith.truncf %735 : vector<2x32xf32> to vector<2x32xbf16>
    %cst_281 = arith.constant dense<0.000000e+00> : vector<2x96xf32>
    %737 = tpu.matmul %736, %6, %cst_281 {dimension_numbers = #tpu.dot_dimension_numbers<[1], [0], [0], [1], [0, 0, 1, 1], [], []>} : vector<2x32xbf16>, vector<32x96xbf16>, vector<2x96xf32> -> vector<2x96xf32>
    %738 = vector.broadcast %10 : vector<1x96xf32> to vector<2x96xf32>
    %739 = arith.addf %737, %738 : vector<2x96xf32>
    %740 = vector.extract_strided_slice %732 {offsets = [0, 0], sizes = [2, 32], strides = [1, 1]} : vector<2x96xf32> to vector<2x32xf32>
    %741 = vector.extract_strided_slice %739 {offsets = [0, 0], sizes = [2, 32], strides = [1, 1]} : vector<2x96xf32> to vector<2x32xf32>
    %742 = arith.addf %740, %741 : vector<2x32xf32>
    %743 = arith.negf %742 : vector<2x32xf32>
    %744 = math.exp %743 : vector<2x32xf32>
    %cst_282 = arith.constant 1.000000e+00 : f32
    %745 = vector.broadcast %cst_282 : f32 to vector<2x32xf32>
    %746 = arith.addf %745, %744 : vector<2x32xf32>
    %747 = arith.divf %745, %746 : vector<2x32xf32>
    %748 = vector.extract_strided_slice %732 {offsets = [0, 32], sizes = [2, 32], strides = [1, 1]} : vector<2x96xf32> to vector<2x32xf32>
    %749 = vector.extract_strided_slice %739 {offsets = [0, 32], sizes = [2, 32], strides = [1, 1]} : vector<2x96xf32> to vector<2x32xf32>
    %750 = arith.addf %748, %749 : vector<2x32xf32>
    %751 = arith.negf %750 : vector<2x32xf32>
    %752 = math.exp %751 : vector<2x32xf32>
    %cst_283 = arith.constant 1.000000e+00 : f32
    %753 = vector.broadcast %cst_283 : f32 to vector<2x32xf32>
    %754 = arith.addf %753, %752 : vector<2x32xf32>
    %755 = arith.divf %753, %754 : vector<2x32xf32>
    %756 = vector.extract_strided_slice %732 {offsets = [0, 64], sizes = [2, 32], strides = [1, 1]} : vector<2x96xf32> to vector<2x32xf32>
    %757 = vector.extract_strided_slice %739 {offsets = [0, 64], sizes = [2, 32], strides = [1, 1]} : vector<2x96xf32> to vector<2x32xf32>
    %758 = arith.mulf %747, %757 : vector<2x32xf32>
    %759 = arith.addf %756, %758 : vector<2x32xf32>
    %760 = math.tanh %759 : vector<2x32xf32>
    %cst_284 = arith.constant 1.000000e+00 : f32
    %761 = vector.broadcast %cst_284 : f32 to vector<2x32xf32>
    %762 = arith.subf %761, %755 : vector<2x32xf32>
    %763 = arith.mulf %762, %760 : vector<2x32xf32>
    %764 = arith.mulf %755, %735 : vector<2x32xf32>
    %765 = arith.addf %763, %764 : vector<2x32xf32>
    %766 = vector.broadcast %734 : vector<2x1xf32> to vector<2x32xf32>
    %767 = arith.mulf %766, %765 : vector<2x32xf32>
    %cst_285 = arith.constant 1.000000e+00 : f32
    %768 = vector.broadcast %cst_285 : f32 to vector<2x1xf32>
    %769 = arith.subf %768, %734 : vector<2x1xf32>
    %770 = vector.broadcast %769 : vector<2x1xf32> to vector<2x32xf32>
    %771 = arith.mulf %770, %735 : vector<2x32xf32>
    %772 = arith.addf %767, %771 : vector<2x32xf32>
    %773 = vector.broadcast %734 : vector<2x1xf32> to vector<2x32xf32>
    %774 = arith.mulf %773, %765 : vector<2x32xf32>
    %c0_286 = arith.constant 0 : index
    %c0_287 = arith.constant 0 : index
    %775 = vector.load %arg10[%c0_286, %c0_287] : memref<2x32xf32, #tpu.memory_space<vmem>>, vector<2x32xf32>
    tpu.vector_store %arg10[%c0_286, %c0_287], %772 {strides = array<i32>} : memref<2x32xf32, #tpu.memory_space<vmem>>, vector<2x32xf32>,
    %c0_288 = arith.constant 0 : index
    %c0_289 = arith.constant 0 : index
    %c0_290 = arith.constant 0 : index
    %776 = vector.load %arg8[%c0_288, %c0_289, %c0_290] : memref<8x2x32xf32, #tpu.memory_space<vmem>>, vector<1x2x32xf32>
    %777 = vector.shape_cast %776 : vector<1x2x32xf32> to vector<2x32xf32>
    %778 = vector.shape_cast %774 : vector<2x32xf32> to vector<1x2x32xf32>
    tpu.vector_store %arg8[%c0_288, %c0_289, %c0_290], %778 {strides = array<i32>} : memref<8x2x32xf32, #tpu.memory_space<vmem>>, vector<1x2x32xf32>,
    return
  }
  func.func @transform_0(%arg0: i32) -> (i32, i32, i32) {
    %c0_i32 = arith.constant 0 : i32
    %c0_i32_0 = arith.constant 0 : i32
    %c0_i32_1 = arith.constant 0 : i32
    return %arg0, %c0_i32, %c0_i32_0 : i32, i32, i32
  }
  func.func @transform_1(%arg0: i32) -> (i32, i32, i32) {
    %c0_i32 = arith.constant 0 : i32
    %0 = arith.subi %c0_i32, %arg0 : i32
    %c0_i32_0 = arith.constant 0 : i32
    %c0_i32_1 = arith.constant 0 : i32
    %c0_i32_2 = arith.constant 0 : i32
    return %0, %c0_i32_0, %c0_i32_1 : i32, i32, i32
  }
  func.func @transform_2(%arg0: i32) -> (i32, i32, i32) {
    %c0_i32 = arith.constant 0 : i32
    %c0_i32_0 = arith.constant 0 : i32
    %c0_i32_1 = arith.constant 0 : i32
    return %arg0, %c0_i32, %c0_i32_0 : i32, i32, i32
  }
  func.func @transform_3(%arg0: i32) -> (i32, i32, i32) {
    %c0_i32 = arith.constant 0 : i32
    %0 = arith.subi %c0_i32, %arg0 : i32
    %c0_i32_0 = arith.constant 0 : i32
    %c0_i32_1 = arith.constant 0 : i32
    %c0_i32_2 = arith.constant 0 : i32
    return %0, %c0_i32_0, %c0_i32_1 : i32, i32, i32
  }
  func.func @transform_4(%arg0: i32) -> (i32, i32, i32) {
    %c0_i32 = arith.constant 0 : i32
    %c0_i32_0 = arith.constant 0 : i32
    %c0_i32_1 = arith.constant 0 : i32
    %c0_i32_2 = arith.constant 0 : i32
    return %c0_i32, %c0_i32_0, %c0_i32_1 : i32, i32, i32
  }
  func.func @transform_5(%arg0: i32) -> (i32, i32, i32) {
    %c0_i32 = arith.constant 0 : i32
    %c0_i32_0 = arith.constant 0 : i32
    %c0_i32_1 = arith.constant 0 : i32
    %c0_i32_2 = arith.constant 0 : i32
    return %c0_i32, %c0_i32_0, %c0_i32_1 : i32, i32, i32
  }
  func.func @transform_6(%arg0: i32) -> (i32, i32, i32) {
    %c0_i32 = arith.constant 0 : i32
    %c0_i32_0 = arith.constant 0 : i32
    %c0_i32_1 = arith.constant 0 : i32
    return %arg0, %c0_i32, %c0_i32_0 : i32, i32, i32
  }
  func.func @transform_7(%arg0: i32) -> (i32, i32, i32) {
    %c0_i32 = arith.constant 0 : i32
    %0 = arith.subi %c0_i32, %arg0 : i32
    %c0_i32_0 = arith.constant 0 : i32
    %c0_i32_1 = arith.constant 0 : i32
    %c0_i32_2 = arith.constant 0 : i32
    return %0, %c0_i32_0, %c0_i32_1 : i32, i32, i32
  }
}

</mosaic_0001>

<bundles_post_ra>
// kernel: encoder_forward.6
= control target key start
LH: loop header
LB: loop body
LE: loop exit
PB: predicated region body
PF: predicated region fallthrough
CT: control target
= control target key end

     0   :  { %v128_v1 = vmov 0   ;;  %vm58_vm0 = vcmask 261120   ;;  %v23_v6 = vlaneseq  ;;  %vm106_vm1 = vcmask 523264   ;;  %s179_s1 = inlined_call_operand.vmem [shape: bf16[32,192], index: 1, kind: input, shape index: {}]   ;;  %s180_s0 = inlined_call_operand.vmem [shape: bf16[16,32], index: 0, kind: input, shape index: {}]   ;;  %s181_s2 = inlined_call_operand.vmem [shape: f32[1,192], index: 2, kind: input, shape index: {}]   ;;  %s182_s3 = inlined_call_operand.vmem [shape: f32[16,192], index: 3, kind: output, shape index: {}]  }
   0x1   :  { %v121_v0 = vld [vmem:[%s179_s1 + $0x4] ss:$8 sps:$4 sm:$0xff]   ;;  %94 = vmatprep.mubr.bf16.mxu0 %v128_v1  ;;  %v123_v2 = vld [vmem:[%s179_s1] ss:$8 sps:$4 sm:$0xff]   ;;  %v124_v3 = vld [vmem:[%s179_s1 + $0x14] ss:$8 sps:$4 sm:$0xff]  }
   0x2   :  { %62 = vmatprep.subr.bf16.mxu0 %v121_v0  ;;  %v126_v4 = vld [vmem:[%s179_s1 + $0x10] ss:$8 sps:$4 sm:$0xff]   ;;  %v127_v5 = vld [vmem:[%s180_s0] sm:$0xff]   ;;  %v24_v7 = vshrl.u32 %v23_v6, 7 }
   0x3   :  { %63 = vmatpush1.bf16.msra.mxu0 %v123_v2  ;;  %v21_v9 = vld [vmem:[%s181_s2] sm:$0x3] }
   0x4   :  { %64 = vmatprep.subr.bf16.mxu0 %v124_v3  ;;  %v25_v8 = vsub.s32 0, %v24_v7  ;;  %v29_v10 = vsub.s32 1, %v24_v7 }
   0x6   :  { %v26_v11 = vrot.slane %v21_v9, %v25_v8  ;;  %v30_v12 = vrot.slane %v21_v9, %v29_v10 }
   0x7   :  { %65 = vmatpush1.bf16.msra.mxu0 %v126_v4 }
   0xa   :  { %119 = vmatmul.mubr.msk.bf16.vlgmr.msra.gmra.mrb[0].mxu0 %vm58_vm0, %v127_v5 }
  0xdd   :  { %v96_v13 = vpop.f32.mrb[0].mxu0 }
  0xde   :  { %v97_v14 = vadd.f32 %v96_v13, %v26_v11  ;;  %v98_v15 = vpop.f32.mrb[1].mxu0 }
  0xdf   :  { %v99_v16 = vadd.f32 %v98_v15, %v30_v12  ;;  %v100_v17 = vpop.f32.mrb[2].mxu0 }
  0xe0   :  { %105 = vst [vmem:[%s182_s3] sm:$0xff] %v97_v14  ;;  %v101_v18 = vadd.f32 %v100_v17, %v26_v11  ;;  %v102_v19 = vpop.f32.mrb[3].mxu0 }
  0xe1   :  { %107 = vst.msk [vmem:[%s182_s3 + $0x8] sm:$0xff] %vm106_vm1, %v99_v16  ;;  %v103_v20 = vadd.f32 %v102_v19, %v30_v12 }
  0xe2   :  { %108 = vst [vmem:[%s182_s3 + $0x10] sm:$0xff] %v101_v18 }
  0xe3   :  { %109 = vst.msk [vmem:[%s182_s3 + $0x18] sm:$0xff] %vm106_vm1, %v103_v20 }

// kernel: encoder_forward.8
= control target key start
LH: loop header
LB: loop body
LE: loop exit
PB: predicated region body
PF: predicated region fallthrough
CT: control target
= control target key end

     0   :  { %s724_s0 = inlined_call_operand.vmem [shape: s32[4,8], index: 0, kind: input, shape index: {}]   ;;  %s725_s2 = inlined_call_operand.vmem [shape: f32[4,8,96], index: 2, kind: input, shape index: {}]   ;;  %s726_s3 = inlined_call_operand.vmem [shape: bf16[32,96], index: 3, kind: input, shape index: {}]   ;;  %s727_s4 = inlined_call_operand.vmem [shape: f32[1,96], index: 4, kind: input, shape index: {}]   ;;  %s728_s5 = inlined_call_operand.vmem [shape: f32[9,2,32], index: 5, kind: output, shape index: {}]   ;;  %s729_s1 = inlined_call_operand.vmem [shape: s32[4,8], index: 1, kind: input, shape index: {}]  }
   0x1   :  { %s10_s20 = sshll.u32 %s724_s0, 4  ;;  %s14_s23 = sshll.u32 %s729_s1, 4  ;;  %s11_s20 = int_to_ptr.vmem [resolvable:$true] %s10_s20  ;;  %s15_s23 = int_to_ptr.vmem [resolvable:$true] %s14_s23 }
   0x2   :  { %s497_s24 = scalar_lea.vmem %s11_s20, 64  ;;  %p502_p1 = scmp.lt.s32.totalorder %s11_s20, %s11_s20 }
   0x3   :  { %p498_p0 = scmp.ne.s32.totalorder %s11_s20, %s497_s24  ;;  %p503_p2 = scmp.lt.s32.totalorder %s497_s24, %s497_s24 }
   0x5   :  { %p504_p3 = por %p503_p2, %p502_p1 }
   0x7   :  { %p505_p4 = pnand %p504_p3, %p498_p0 }
   0x9   :  { %508 = shalt.err (!%p505_p4)  }
   0xa   :  { %s531_s25 = smov [#allocation4]   ;;  %s509_s26 = scalar_lea.vmem %s15_s23, 64 }
   0xb   :  { %13 = dma.vmem_to_smem %s11_s20, 64, %s531_s25, [#allocation3] }
   0xc   :  { %p510_p5 = scmp.ne.s32.totalorder %s15_s23, %s509_s26  ;;  %p514_p6 = scmp.lt.s32.totalorder %s15_s23, %s15_s23 }
   0xd   :  { %p515_p7 = scmp.lt.s32.totalorder %s509_s26, %s509_s26 }
   0xf   :  { %p516_p8 = por %p515_p7, %p514_p6 }
  0x11   :  { %p517_p9 = pnand %p516_p8, %p510_p5 }
  0x13   :  { %520 = shalt.err (!%p517_p9)  }
  0x14   :  { %s532_s0 = smov [#allocation5]  }
  0x15   :  { %17 = dma.vmem_to_smem %s15_s23, 64, %s532_s0, [#allocation3] }
  0x16   :  { %525 = dma.done.wait [#allocation3], 128 }
  0x17   :  { %526 = vsyncadd [#allocation3], 4294967168 }
  0x18   :  { %19 = sfence }
  0x19   :  { %s575_s1 = smov 0  }
  0x1a LB: > { %s432_s27 = sadd.s32 4294967295, %s529_s1   ;;  %p435_p10 = scmp.ge.s32.totalorder %s529_s1, 1  ;;  %s529_s1 = sphi %s575_s1, %s25_s1  }
  0x1b   : > { %p143_p11 = scmp.lt.s32.totalorder %s529_s1, 5 }
  0x1d   : > { %p144_p12 = pnand %p435_p10, %p143_p11 }
  0x1e   : > { %p161_p13 = scmp.lt.s32.totalorder (!%p144_p12), %s432_s27, 3  ;;  %p437_p0 = scmp.ne.s32.totalorder (!%p144_p12), %s432_s27, 0 }
  0x1f   : > { %147 = sbr.rel (%p144_p12) target bundleno = 785 (0x311), region = 32 }
  0x26   : > { %s162_s28 = scalar_select %p161_p13, %s432_s27, 3 }
  0x27   : > { %169 = sbr.rel (%p437_p0) target bundleno = 46 (0x2e), region = 36  ;;  %vm170_vm0 = vcmask (!%p437_p0), 254976   ;;  %v533_v0 = vmov (!%p437_p0), 0.0  }
  0x28   : > { %s436_s29 = sshll.u32 %s162_s28, 3  ;;  %171 = vst.msk [vmem:[%s728_s5] sm:$0x3] (!%p437_p0), %vm170_vm0, %v533_v0  ;;  %172 = vst.msk [vmem:[%s728_s5 + $0x2] sm:$0x3] (!%p437_p0), %vm170_vm0, %v533_v0 }
  0x29   : > { %s586_s7 = scalar_lea.vmem %s725_s2, %s436_s29  ;;  %173 = vst.msk [vmem:[%s728_s5 + $0x4] sm:$0x3] (!%p437_p0), %vm170_vm0, %v533_v0  ;;  %174 = vst.msk [vmem:[%s728_s5 + $0x6] sm:$0x3] (!%p437_p0), %vm170_vm0, %v533_v0 }
  0x2a   : > { %175 = vst.msk [vmem:[%s728_s5 + $0x8] sm:$0x3] (!%p437_p0), %vm170_vm0, %v533_v0  ;;  %176 = vst.msk [vmem:[%s728_s5 + $0xa] sm:$0x3] (!%p437_p0), %vm170_vm0, %v533_v0 }
  0x2b   : > { %177 = vst.msk [vmem:[%s728_s5 + $0xc] sm:$0x3] (!%p437_p0), %vm170_vm0, %v533_v0  ;;  %178 = vst.msk [vmem:[%s728_s5 + $0xe] sm:$0x3] (!%p437_p0), %vm170_vm0, %v533_v0 }
  0x2c   : > { %179 = vst.msk [vmem:[%s728_s5 + $0x10] sm:$0x3] (!%p437_p0), %vm170_vm0, %v533_v0 }
  0x2e PF: > { %v489_v1 = vld [vmem:[%s726_s3] sm:$0xff]   ;;  %v534_v2 = vmov 0.0   ;;  %v490_v3 = vld [vmem:[%s726_s3 + $0x8] sm:$0xff]   ;;  %vm535_vm1 = vmmov 0   ;;  %s621_s30 = sshll.u32 %s432_s27, 7  ;;  %vm185_vm2 = vcmask 253952  }
  0x2f   : > { %465 = vmatprep.subr.bf16.mxu0 %v534_v2  ;;  %469 = vmatprep.mubr.msk.bf16.mxu0 %vm535_vm1, %v534_v2  ;;  %s181_s6 = sld [smem:[#allocation5 + %s621_s30]]  ;;  %s187_s8 = sadd.s32 1, %s621_s30  ;;  %vm255_vm3 = vcmask 261120   ;;  %v447_v14 = vld [vmem:[%s727_s4] ss:$0 sm:$0xff]  ;;  %vm340_vm4 = vcmask 254977  }
  0x30   : > { %466 = vmatpush3.bf16.msra.mxu0 %v489_v1  ;;  %s188_s9 = sld [smem:[#allocation5 + %s187_s8]]  ;;  %s193_s27 = sadd.s32 2, %s621_s30  ;;  %v230_v20 = vld [vmem:[%s586_s7] sm:$0xff]  ;;  %vm345_vm5 = vcmask 256002   ;;  %vm350_vm6 = vcmask 257027   ;;  %vm355_vm7 = vcmask 258052  }
  0x31   : > { %467 = vmatprep.subr.bf16.mxu0 %v534_v2  ;;  %s194_s10 = sld [smem:[#allocation5 + %s193_s27]]  ;;  %s199_s11 = sadd.s32 3, %s621_s30  ;;  %vm360_vm8 = vcmask 259077   ;;  %vm365_vm9 = vcmask 260102   ;;  %vm370_vm10 = vcmask 261127  }
  0x32   : > { %s200_s12 = sld [smem:[#allocation5 + %s199_s11]]  ;;  %s205_s13 = sadd.s32 4, %s621_s30 }
  0x33   : > { %s206_s14 = sld [smem:[#allocation5 + %s205_s13]]  ;;  %s730_s15 = sadd.s32 5, %s621_s30 }
  0x34   : > { %468 = vmatpush3.bf16.msra.mxu0 %v490_v3  ;;  %s212_s16 = sld [smem:[#allocation5 + %s730_s15]]  ;;  %s217_s17 = sadd.s32 6, %s621_s30 }
  0x35   : > { %s439_s18 = sshll.u32 %s181_s6, 1  ;;  %s218_s19 = sld [smem:[#allocation5 + %s217_s17]] }
  0x36   : > { %s183_s22 = scalar_lea.vmem %s728_s5, %s439_s18  ;;  %s440_s23 = sshll.u32 %s188_s9, 1 }
  0x37   : > { %v184_v4 = vld [vmem:[%s183_s22] sm:$0x1]  ;;  %s190_s26 = scalar_lea.vmem %s728_s5, %s440_s23  ;;  %s441_s0 = sshll.u32 %s194_s10, 1 }
  0x38   : > { %186 = vst.msk [vmem:[#allocation2] sm:$0x1] %vm185_vm2, %v184_v4  ;;  %v191_v5 = vld [vmem:[%s190_s26] sm:$0x1]  ;;  %s196_s6 = scalar_lea.vmem %s728_s5, %s441_s0  ;;  %s442_s15 = sshll.u32 %s200_s12, 1 }
  0x39   : > { %192 = vst.msk [vmem:[#allocation2 + $0x1] sm:$0x1] %vm185_vm2, %v191_v5  ;;  %v197_v6 = vld [vmem:[%s196_s6] sm:$0x1]  ;;  %s202_s20 = scalar_lea.vmem %s728_s5, %s442_s15  ;;  %s443_s21 = sshll.u32 %s206_s14, 1 }
  0x3a   : > { %198 = vst.msk [vmem:[#allocation2 + $0x2] sm:$0x1] %vm185_vm2, %v197_v6  ;;  %v203_v7 = vld [vmem:[%s202_s20] sm:$0x1]  ;;  %s208_s23 = scalar_lea.vmem %s728_s5, %s443_s21  ;;  %s444_s24 = sshll.u32 %s212_s16, 1 }
  0x3b   : > { %204 = vst.msk [vmem:[#allocation2 + $0x3] sm:$0x1] %vm185_vm2, %v203_v7  ;;  %v209_v8 = vld [vmem:[%s208_s23 + $0x1] sm:$0x1]  ;;  %s214_s26 = scalar_lea.vmem %s728_s5, %s444_s24  ;;  %s445_s0 = sshll.u32 %s218_s19, 1 }
  0x3c   : > { %210 = vst.msk [vmem:[#allocation2 + $0x4] sm:$0x1] %vm185_vm2, %v209_v8  ;;  %v215_v9 = vld [vmem:[%s214_s26 + $0x1] sm:$0x1]  ;;  %s220_s28 = scalar_lea.vmem %s728_s5, %s445_s0  ;;  %s223_s29 = sadd.s32 7, %s621_s30 }
  0x3d   : > { %216 = vst.msk [vmem:[#allocation2 + $0x5] sm:$0x1] %vm185_vm2, %v215_v9  ;;  %v221_v10 = vld [vmem:[%s220_s28 + $0x1] sm:$0x1]  ;;  %s224_s16 = sld [smem:[#allocation5 + %s223_s29]]  ;;  %s536_s10 = smov 64  }
  0x3e   : > { %222 = vst.msk [vmem:[#allocation2 + $0x6] sm:$0x1] %vm185_vm2, %v221_v10  ;;  %s537_s7 = smov 96   ;;  %s538_s22 = smov 32  }
  0x3f   : > { %s329_s23 = sld [smem:[#allocation4 + %s621_s30]]  ;;  %s731_s0 = sadd.s32 5, %s621_s30 }
  0x40   : > { %s337_s24 = sld [smem:[#allocation4 + %s187_s8]] }
  0x41   : > { %s342_s12 = sld [smem:[#allocation4 + %s193_s27]] }
  0x42   : > { %s347_s25 = sld [smem:[#allocation4 + %s199_s11]] }
  0x43   : > { %s446_s6 = sshll.u32 %s224_s16, 1  ;;  %s352_s26 = sld [smem:[#allocation4 + %s205_s13]] }
  0x44   : > { %s226_s19 = scalar_lea.vmem %s728_s5, %s446_s6  ;;  %s357_s14 = sld [smem:[#allocation4 + %s731_s0]] }
  0x45   : > { %v227_v11 = vld [vmem:[%s226_s19 + $0x1] sm:$0x1]  ;;  %s362_s15 = sld [smem:[#allocation4 + %s217_s17]]  ;;  %s452_s16 = sshll.u32 %s329_s23, 1 }
  0x46   : > { %228 = vst.msk [vmem:[#allocation2 + $0x7] sm:$0x1] %vm185_vm2, %v227_v11  ;;  %s367_s28 = sld [smem:[#allocation4 + %s223_s29]]  ;;  %s453_s6 = sshll.u32 %s337_s24, 1 }
  0x47   : > { %s454_s18 = sshll.u32 %s342_s12, 1  ;;  %s335_s8 = scalar_lea.vmem %s728_s5, %s452_s16 }
  0x48   : > { %s455_s9 = sshll.u32 %s347_s25, 1  ;;  %s339_s11 = scalar_lea.vmem %s728_s5, %s453_s6 }
  0x49   : > { %s344_s17 = scalar_lea.vmem %s728_s5, %s454_s18  ;;  %s349_s23 = scalar_lea.vmem %s728_s5, %s455_s9 }
  0x4a   : > { %s457_s30 = sshll.u32 %s357_s14, 1 }
  0x4b   : > { %s458_s24 = sshll.u32 %s362_s15, 1  ;;  %s359_s14 = scalar_lea.vmem %s728_s5, %s457_s30 }
  0x4c   : > { %s459_s0 = sshll.u32 %s367_s28, 1  ;;  %s364_s15 = scalar_lea.vmem %s728_s5, %s458_s24 }
  0x4d   : > { %v229_v12 = vld [vmem:[#allocation2] sm:$0xff] }
  0x4e   : > { %v231_v13 = vpack.c.bf16 %v229_v12, %v229_v12 }
  0x50   : > { %470 = vmatmul.mubr.msk.bf16.vlgmr.msra.gmra.mrb[0].mxu0 %vm255_vm3, %v231_v13 }
 0x123   : > { %v293_v15 = vpop.f32.mrb[0].mxu0 }
 0x124   : > { %v294_v16 = vadd.f32 %v447_v14, %v293_v15  ;;  %v471_v17 = vpop.f32.mrb[1].mxu0 }
 0x125   : > { %v296_v18 = vpop.f32.mrb[2].mxu0 }
 0x126   : > { %307 = vrot.lane.b32.xlu0 %v294_v16, %s536_s10  ;;  %v472_v19 = vpop.f32.mrb[3].mxu0  ;;  %v299_v21 = vadd.f32 %v294_v16, %v230_v20 }
 0x128   : > { %v451_v22 = vmul.f32 -1.442695, %v299_v21 }
 0x12a   : > { %491 = vpow2.f32 %v451_v22 }
 0x134   : > { %v492_v23 = vpop.eup %491 }
 0x135   : > { %v303_v24 = vadd.f32 1.0, %v492_v23 }
 0x137   : > { %493 = vrcp.f32 %v303_v24 }
 0x141   : > { %v494_v25 = vpop.eup %493 }
 0x142   : > { %v317_v32 = vsub.f32 1.0, %v494_v25 }
 0x198   : > { %v308_v26 = vpop.permute.xlu0 %307 }
 0x199   : > { %v310_v27 = vmul.f32 %v494_v25, %v308_v26 }
 0x19b   : > { %312 = vrot.lane.b32.xlu0 %v310_v27, %s536_s10  ;;  %s456_s10 = sshll.u32 %s352_s26, 1 }
 0x19c   : > { %s354_s26 = scalar_lea.vmem %s728_s5, %s456_s10 }
 0x20d   : > { %v313_v28 = vpop.permute.xlu0 %312 }
 0x20e   : > { %v315_v29 = vadd.f32 %v313_v28, %v230_v20 }
 0x210   : > { %495 = vtanh.f32 %v315_v29 }
 0x21a   : > { %v496_v30 = vpop.eup %495 }
 0x21b   : > { %319 = vrot.lane.b32.xlu1 %v496_v30, %s537_s7 }
 0x21f   : > { %324 = vrot.lane.b32.xlu1 %v229_v12, %s538_s22 }
 0x28d   : > { %v320_v31 = vpop.permute.xlu1 %319 }
 0x28e   : > { %v322_v34 = vmul.f32 %v320_v31, %v317_v32 }
 0x291   : > { %v325_v33 = vpop.permute.xlu1 %324 }
 0x292   : > { %v327_v35 = vmul.f32 %v494_v25, %v325_v33 }
 0x294   : > { %v328_v36 = vadd.f32 %v327_v35, %v322_v34 }
 0x296   : > { %331 = vrot.lane.b32.xlu0 %v328_v36, %s537_s7 }
 0x308   : > { %v332_v37 = vpop.permute.xlu0 %331 }
 0x309   : > { %336 = vst.msk [vmem:[%s335_s8] sm:$0x1] %vm185_vm2, %v332_v37  ;;  %s369_s8 = scalar_lea.vmem %s728_s5, %s459_s0 }
 0x30a   : > { %341 = vst.msk [vmem:[%s339_s11 - $0x1] sm:$0x2] %vm340_vm4, %v332_v37 }
 0x30b   : > { %346 = vst.msk [vmem:[%s344_s17 - $0x2] sm:$0x4] %vm345_vm5, %v332_v37 }
 0x30c   : > { %351 = vst.msk [vmem:[%s349_s23 - $0x3] sm:$0x8] %vm350_vm6, %v332_v37 }
 0x30d   : > { %356 = vst.msk [vmem:[%s354_s26 - $0x3] sm:$0x10] %vm355_vm7, %v332_v37 }
 0x30e   : > { %361 = vst.msk [vmem:[%s359_s14 - $0x4] sm:$0x20] %vm360_vm8, %v332_v37 }
 0x30f   : > { %366 = vst.msk [vmem:[%s364_s15 - $0x5] sm:$0x40] %vm365_vm9, %v332_v37 }
 0x310   : > { %371 = vst.msk [vmem:[%s369_s8 - $0x6] sm:$0x80] %vm370_vm10, %v332_v37 }
 0x311 PF: > { %s25_s1 = sadd.s32 1, %s529_s1  }
 0x312   : > { %p22_p1 = scmp.ge.s32.totalorder %s25_s1, 6  }
 0x314   :  { %24 = sbr.rel (!%p22_p1) target bundleno = 26 (0x1a), region = 78 }

// kernel: encoder_forward.9
= control target key start
LH: loop header
LB: loop body
LE: loop exit
PB: predicated region body
PF: predicated region fallthrough
CT: control target
= control target key end

     0   :  { %v144_v0 = vmov 0.0   ;;  %vm145_vm0 = vmmov 0   ;;  %vm61_vm1 = vcmask 523264   ;;  %vm106_vm2 = vcmask 261120   ;;  %s190_s1 = inlined_call_operand.vmem [shape: bf16[64,32], index: 1, kind: input, shape index: {}]   ;;  %s191_s0 = inlined_call_operand.vmem [shape: bf16[16,64], index: 0, kind: input, shape index: {}]   ;;  %s192_s2 = inlined_call_operand.vmem [shape: f32[1,32], index: 2, kind: input, shape index: {}]   ;;  %s193_s3 = inlined_call_operand.vmem [shape: f32[16,32], index: 3, kind: output, shape index: {}]  }
   0x1   :  { %125 = vmatprep.subr.bf16.mxu0 %v144_v0  ;;  %v139_v1 = vld [vmem:[%s190_s1] sm:$0xff]   ;;  %133 = vmatprep.mubr.msk.bf16.mxu0 %vm145_vm0, %v144_v0  ;;  %v140_v2 = vld [vmem:[%s190_s1 + $0x8] sm:$0xff]   ;;  %v141_v3 = vld [vmem:[%s190_s1 + $0x10] sm:$0xff]  }
   0x2   :  { %126 = vmatpush3.bf16.msra.mxu0 %v139_v1  ;;  %v142_v4 = vld [vmem:[%s190_s1 + $0x18] sm:$0xff]   ;;  %v143_v5 = vld [vmem:[%s191_s0] sm:$0xff]  }
   0x3   :  { %127 = vmatprep.subr.bf16.mxu0 %v144_v0  ;;  %v113_v6 = vld [vmem:[%s192_s2] ss:$0 sm:$0xff] }
   0x6   :  { %128 = vmatpush3.bf16.msra.mxu0 %v140_v2 }
   0x7   :  { %129 = vmatprep.subr.bf16.mxu0 %v144_v0 }
   0xa   :  { %130 = vmatpush3.bf16.msra.mxu0 %v141_v3 }
   0xb   :  { %131 = vmatprep.subr.bf16.mxu0 %v144_v0 }
   0xe   :  { %132 = vmatpush3.bf16.msra.mxu0 %v142_v4 }
  0x11   :  { %134 = vmatmul.mubr.msk.bf16.vlgmr.msra.gmra.mrb[0].mxu0 %vm61_vm1, %v143_v5 }
  0xe4   :  { %v99_v7 = vpop.f32.mrb[0].mxu0 }
  0xe5   :  { %v100_v8 = vadd.f32 %v113_v6, %v99_v7  ;;  %v135_v9 = vpop.f32.mrb[1].mxu0 }
  0xe6   :  { %v102_v10 = vpop.f32.mrb[2].mxu0 }
  0xe7   :  { %107 = vst.msk [vmem:[%s193_s3] sm:$0xff] %vm106_vm2, %v100_v8  ;;  %v103_v11 = vadd.f32 %v113_v6, %v102_v10  ;;  %v136_v12 = vpop.f32.mrb[3].mxu0 }
  0xe9   :  { %108 = vst.msk [vmem:[%s193_s3 + $0x8] sm:$0xff] %vm106_vm2, %v103_v11 }

// kernel: encoder_forward.7
= control target key start
LH: loop header
LB: loop body
LE: loop exit
PB: predicated region body
PF: predicated region fallthrough
CT: control target
= control target key end

     0   :  { %s858_s0 = inlined_call_operand.vmem [shape: s32[4,8], index: 0, kind: input, shape index: {}]   ;;  %s859_s2 = inlined_call_operand.vmem [shape: f32[4,8,96], index: 2, kind: input, shape index: {}]   ;;  %s860_s3 = inlined_call_operand.vmem [shape: bf16[32,96], index: 3, kind: input, shape index: {}]   ;;  %s861_s4 = inlined_call_operand.vmem [shape: f32[1,96], index: 4, kind: input, shape index: {}]   ;;  %s862_s5 = inlined_call_operand.vmem [shape: f32[9,2,32], index: 5, kind: output, shape index: {}]   ;;  %s863_s1 = inlined_call_operand.vmem [shape: s32[4,8], index: 1, kind: input, shape index: {}]  }
   0x1   :  { %865 = sst [smem:[#allocation9_spill]] %s859_s2  ;;  %s10_s20 = sshll.u32 %s858_s0, 4  ;;  %s11_s20 = int_to_ptr.vmem [resolvable:$true] %s10_s20 }
   0x2   :  { %866 = sst [smem:[#allocation10_spill]] %s860_s3  ;;  %s14_s23 = sshll.u32 %s863_s1, 4  ;;  %s15_s23 = int_to_ptr.vmem [resolvable:$true] %s14_s23 }
   0x3   :  { %867 = sst [smem:[#allocation11_spill]] %s861_s4  ;;  %s606_s24 = scalar_lea.vmem %s11_s20, 64 }
   0x4   :  { %p607_p0 = scmp.ne.s32.totalorder %s11_s20, %s606_s24  ;;  %p611_p1 = scmp.lt.s32.totalorder %s11_s20, %s11_s20 }
   0x5   :  { %p612_p2 = scmp.lt.s32.totalorder %s606_s24, %s606_s24 }
   0x7   :  { %p613_p3 = por %p612_p2, %p611_p1 }
   0x9   :  { %p614_p4 = pnand %p613_p3, %p607_p0 }
   0xb   :  { %617 = shalt.err (!%p614_p4)  }
   0xc   :  { %s640_s25 = smov [#allocation5]   ;;  %s618_s26 = scalar_lea.vmem %s15_s23, 64 }
   0xd   :  { %13 = dma.vmem_to_smem %s11_s20, 64, %s640_s25, [#allocation4] }
   0xe   :  { %p619_p5 = scmp.ne.s32.totalorder %s15_s23, %s618_s26  ;;  %p623_p6 = scmp.lt.s32.totalorder %s15_s23, %s15_s23 }
   0xf   :  { %p624_p7 = scmp.lt.s32.totalorder %s618_s26, %s618_s26 }
  0x11   :  { %p625_p8 = por %p624_p7, %p623_p6 }
  0x13   :  { %p626_p9 = pnand %p625_p8, %p619_p5 }
  0x15   :  { %629 = shalt.err (!%p626_p9)  }
  0x16   :  { %s641_s0 = smov [#allocation6]  }
  0x17   :  { %17 = dma.vmem_to_smem %s15_s23, 64, %s641_s0, [#allocation4] }
  0x18   :  { %634 = dma.done.wait [#allocation4], 128 }
  0x19   :  { %635 = vsyncadd [#allocation4], 4294967168 }
  0x1a   :  { %19 = sfence }
  0x1b   :  { %s684_s1 = smov 0  }
  0x1c LB: > { %868 = sst [smem:[#allocation8_spill]] %s638_s1  ;;  %s690_s27 = sadd.s32 4294967295, %s638_s1   ;;  %s638_s1 = sphi %s684_s1, %s25_s1  }
  0x1d   : > { %p536_p10 = scmp.ge.s32.totalorder %s638_s1, 1  ;;  %p143_p11 = scmp.lt.s32.totalorder %s638_s1, 5 }
  0x1f   : > { %p144_p12 = pnand %p536_p10, %p143_p11 }
  0x20   : > { %p161_p13 = scmp.lt.s32.totalorder (!%p144_p12), %s690_s27, 3  ;;  %s869_s2 = sld [smem:[#allocation9_spill]] (!%p144_p12) }
  0x21   : > { %147 = sbr.rel (%p144_p12) target bundleno = 856 (0x358), region = 32  ;;  %p538_p0 = scmp.ne.s32.totalorder (!%p144_p12), %s690_s27, 0 }
  0x28   : > { %s162_s28 = scalar_select %p161_p13, %s690_s27, 3 }
  0x29   : > { %169 = sbr.rel (%p538_p0) target bundleno = 51 (0x33), region = 36  ;;  %vm170_vm0 = vcmask (!%p538_p0), 254976   ;;  %v642_v0 = vmov (!%p538_p0), 0.0  }
  0x2a   : > { %s537_s29 = sshll.u32 %s162_s28, 3  ;;  %171 = vst.msk [vmem:[%s862_s5] sm:$0x3] (!%p538_p0), %vm170_vm0, %v642_v0  ;;  %172 = vst.msk [vmem:[%s862_s5 + $0x2] sm:$0x3] (!%p538_p0), %vm170_vm0, %v642_v0 }
  0x2b   : > { %s699_s7 = scalar_lea.vmem %s869_s2, %s537_s29  ;;  %173 = vst.msk [vmem:[%s862_s5 + $0x4] sm:$0x3] (!%p538_p0), %vm170_vm0, %v642_v0  ;;  %174 = vst.msk [vmem:[%s862_s5 + $0x6] sm:$0x3] (!%p538_p0), %vm170_vm0, %v642_v0 }
  0x2c   : > { %175 = vst.msk [vmem:[%s862_s5 + $0x8] sm:$0x3] (!%p538_p0), %vm170_vm0, %v642_v0  ;;  %176 = vst.msk [vmem:[%s862_s5 + $0xa] sm:$0x3] (!%p538_p0), %vm170_vm0, %v642_v0 }
  0x2d   : > { %177 = vst.msk [vmem:[%s862_s5 + $0xc] sm:$0x3] (!%p538_p0), %vm170_vm0, %v642_v0  ;;  %178 = vst.msk [vmem:[%s862_s5 + $0xe] sm:$0x3] (!%p538_p0), %vm170_vm0, %v642_v0 }
  0x2e   : > { %179 = vst.msk [vmem:[%s862_s5 + $0x10] sm:$0x3] (!%p538_p0), %vm170_vm0, %v642_v0  ;;  %180 = vst.msk [vmem:[#allocation2] sm:$0x3] (!%p538_p0), %vm170_vm0, %v642_v0 }
  0x2f   : > { %181 = vst.msk [vmem:[#allocation2 + $0x2] sm:$0x3] (!%p538_p0), %vm170_vm0, %v642_v0  ;;  %182 = vst.msk [vmem:[#allocation2 + $0x4] sm:$0x3] (!%p538_p0), %vm170_vm0, %v642_v0 }
  0x30   : > { %183 = vst.msk [vmem:[#allocation2 + $0x6] sm:$0x3] %vm170_vm0, %v642_v0  ;;  %184 = vst.msk [vmem:[#allocation2 + $0x8] sm:$0x3] %vm170_vm0, %v642_v0 }
  0x31   : > { %185 = vst.msk [vmem:[#allocation2 + $0xa] sm:$0x3] %vm170_vm0, %v642_v0  ;;  %186 = vst.msk [vmem:[#allocation2 + $0xc] sm:$0x3] %vm170_vm0, %v642_v0 }
  0x32   : > { %187 = vst.msk [vmem:[#allocation2 + $0xe] sm:$0x3] %vm170_vm0, %v642_v0  ;;  %188 = vst.msk [vmem:[#allocation2 + $0x10] sm:$0x3] %vm170_vm0, %v642_v0 }
  0x33 PF: > { %s870_s3 = sld [smem:[#allocation10_spill]]  ;;  %v643_v2 = vmov 0.0   ;;  %vm644_vm1 = vmmov 0   ;;  %s754_s30 = sshll.u32 %s690_s27, 7  ;;  %vm194_vm2 = vcmask 253952   ;;  %vm264_vm3 = vcmask 261120  }
  0x34   : > { %574 = vmatprep.subr.bf16.mxu0 %v643_v2  ;;  %578 = vmatprep.mubr.msk.bf16.mxu0 %vm644_vm1, %v643_v2  ;;  %s190_s6 = sld [smem:[#allocation5 + %s754_s30]]  ;;  %s758_s8 = sadd.s32 1, %s754_s30  ;;  %v239_v20 = vld [vmem:[%s699_s7] sm:$0xff]  ;;  %vm355_vm4 = vcmask 254977   ;;  %vm370_vm5 = vcmask 256002   ;;  %vm385_vm6 = vcmask 257027  }
  0x35   : > { %s197_s9 = sld [smem:[#allocation5 + %s758_s8]]  ;;  %s762_s10 = sadd.s32 2, %s754_s30  ;;  %vm400_vm7 = vcmask 258052   ;;  %vm415_vm8 = vcmask 259077   ;;  %vm430_vm9 = vcmask 260102   ;;  %vm445_vm10 = vcmask 261127  }
  0x36   : > { %s203_s11 = sld [smem:[#allocation5 + %s762_s10]]  ;;  %s766_s12 = sadd.s32 3, %s754_s30 }
  0x37   : > { %s209_s27 = sld [smem:[#allocation5 + %s766_s12]]  ;;  %s770_s13 = sadd.s32 4, %s754_s30 }
  0x38   : > { %s215_s14 = sld [smem:[#allocation5 + %s770_s13]]  ;;  %s774_s15 = sadd.s32 5, %s754_s30 }
  0x39   : > { %v598_v1 = vld [vmem:[%s870_s3] sm:$0xff]   ;;  %v599_v3 = vld [vmem:[%s870_s3 + $0x8] sm:$0xff]   ;;  %s221_s16 = sld [smem:[#allocation5 + %s774_s15]]  ;;  %s778_s17 = sadd.s32 6, %s754_s30 }
  0x3a   : > { %575 = vmatpush3.bf16.msra.mxu0 %v598_v1  ;;  %s540_s18 = sshll.u32 %s190_s6, 1  ;;  %s227_s19 = sld [smem:[#allocation5 + %s778_s17]] }
  0x3b   : > { %576 = vmatprep.subr.bf16.mxu0 %v643_v2  ;;  %s541_s20 = sshll.u32 %s197_s9, 1  ;;  %s192_s21 = scalar_lea.vmem [#allocation2], %s540_s18 }
  0x3c   : > { %v193_v4 = vld [vmem:[%s192_s21] sm:$0x1]  ;;  %s542_s22 = sshll.u32 %s203_s11, 1  ;;  %s199_s23 = scalar_lea.vmem [#allocation2], %s541_s20 }
  0x3d   : > { %195 = vst.msk [vmem:[#allocation3] sm:$0x1] %vm194_vm2, %v193_v4  ;;  %v200_v5 = vld [vmem:[%s199_s23] sm:$0x1]  ;;  %s543_s24 = sshll.u32 %s209_s27, 1  ;;  %s205_s25 = scalar_lea.vmem [#allocation2], %s542_s22 }
  0x3e   : > { %577 = vmatpush3.bf16.msra.mxu0 %v599_v3  ;;  %201 = vst.msk [vmem:[#allocation3 + $0x1] sm:$0x1] %vm194_vm2, %v200_v5  ;;  %v206_v6 = vld [vmem:[%s205_s25] sm:$0x1]  ;;  %s544_s26 = sshll.u32 %s215_s14, 1  ;;  %s211_s0 = scalar_lea.vmem [#allocation2], %s543_s24 }
  0x3f   : > { %207 = vst.msk [vmem:[#allocation3 + $0x2] sm:$0x1] %vm194_vm2, %v206_v6  ;;  %v212_v7 = vld [vmem:[%s211_s0] sm:$0x1]  ;;  %s545_s28 = sshll.u32 %s221_s16, 1  ;;  %s217_s29 = scalar_lea.vmem [#allocation2], %s544_s26 }
  0x40   : > { %213 = vst.msk [vmem:[#allocation3 + $0x3] sm:$0x1] %vm194_vm2, %v212_v7  ;;  %v218_v8 = vld [vmem:[%s217_s29 + $0x1] sm:$0x1]  ;;  %s546_s6 = sshll.u32 %s227_s19, 1  ;;  %s223_s9 = scalar_lea.vmem [#allocation2], %s545_s28 }
  0x41   : > { %219 = vst.msk [vmem:[#allocation3 + $0x4] sm:$0x1] %vm194_vm2, %v218_v8  ;;  %v224_v9 = vld [vmem:[%s223_s9 + $0x1] sm:$0x1]  ;;  %s787_s11 = sadd.s32 7, %s754_s30  ;;  %s229_s27 = scalar_lea.vmem [#allocation2], %s546_s6 }
  0x42   : > { %225 = vst.msk [vmem:[#allocation3 + $0x5] sm:$0x1] %vm194_vm2, %v224_v9  ;;  %v230_v10 = vld [vmem:[%s229_s27 + $0x1] sm:$0x1]  ;;  %s233_s14 = sld [smem:[#allocation5 + %s787_s11]]  ;;  %s645_s21 = smov 64  }
  0x43   : > { %231 = vst.msk [vmem:[#allocation3 + $0x6] sm:$0x1] %vm194_vm2, %v230_v10  ;;  %s871_s4 = sld [smem:[#allocation11_spill]]  ;;  %s646_s22 = smov 96  }
  0x44   : > { %s647_s23 = smov 32   ;;  %s346_s7 = sld [smem:[#allocation6 + %s754_s30]] }
  0x45   : > { %s338_s24 = sld [smem:[#allocation5 + %s754_s30]] }
  0x46   : > { %s352_s25 = sld [smem:[#allocation5 + %s758_s8]] }
  0x47   : > { %s367_s26 = sld [smem:[#allocation5 + %s762_s10]] }
  0x48   : > { %s547_s16 = sshll.u32 %s233_s14, 1  ;;  %s382_s0 = sld [smem:[#allocation5 + %s766_s12]] }
  0x49   : > { %s235_s18 = scalar_lea.vmem [#allocation2], %s547_s16  ;;  %v548_v14 = vld [vmem:[%s871_s4] ss:$0 sm:$0xff]  ;;  %s397_s28 = sld [smem:[#allocation5 + %s770_s13]] }
  0x4a   : > { %v236_v11 = vld [vmem:[%s235_s18 + $0x1] sm:$0x1]  ;;  %s554_s29 = sshll.u32 %s346_s7, 1  ;;  %s412_s6 = sld [smem:[#allocation5 + %s774_s15]] }
  0x4b   : > { %237 = vst.msk [vmem:[#allocation3 + $0x7] sm:$0x1] %vm194_vm2, %v236_v11  ;;  %s805_s9 = sld [smem:[#allocation5 + %s778_s17]]  ;;  %s553_s14 = sshll.u32 %s338_s24, 1 }
  0x4c   : > { %s808_s27 = sld [smem:[#allocation5 + %s787_s11]]  ;;  %s555_s16 = sshll.u32 %s352_s25, 1 }
  0x4d   : > { %s811_s18 = sld [smem:[#allocation6 + %s758_s8]]  ;;  %s557_s19 = sshll.u32 %s367_s26, 1 }
  0x4e   : > { %s344_s30 = scalar_lea.vmem %s862_s5, %s553_s14  ;;  %s354_s3 = scalar_lea.vmem %s862_s5, %s555_s16 }
  0x4f   : > { %s561_s4 = sshll.u32 %s397_s28, 1  ;;  %s369_s8 = scalar_lea.vmem %s862_s5, %s557_s19 }
  0x50   : > { %s563_s26 = sshll.u32 %s412_s6, 1  ;;  %s399_s28 = scalar_lea.vmem %s862_s5, %s561_s4 }
  0x51   : > { %s432_s2 = sld [smem:[#allocation6 + %s778_s17]] }
  0x52   : > { %v238_v12 = vld [vmem:[#allocation3] sm:$0xff]  ;;  %s567_s16 = sshll.u32 %s808_s27, 1  ;;  %s372_s27 = sld [smem:[#allocation6 + %s762_s10]] }
  0x53   : > { %v240_v13 = vpack.c.bf16 %v238_v12, %v238_v12  ;;  %s556_s4 = sshll.u32 %s811_s18, 1  ;;  %s387_s18 = sld [smem:[#allocation6 + %s766_s12]] }
  0x55   : > { %579 = vmatmul.mubr.msk.bf16.vlgmr.msra.gmra.mrb[0].mxu0 %vm264_vm3, %v240_v13 }
  0x58   : > { %s558_s24 = sshll.u32 %s372_s27, 1 }
  0x59   : > { %s374_s25 = scalar_lea.vmem [#allocation2], %s558_s24  ;;  %s560_s10 = sshll.u32 %s387_s18, 1 }
 0x128   : > { %v302_v15 = vpop.f32.mrb[0].mxu0 }
 0x129   : > { %v303_v16 = vadd.f32 %v548_v14, %v302_v15  ;;  %v580_v17 = vpop.f32.mrb[1].mxu0 }
 0x12a   : > { %v305_v18 = vpop.f32.mrb[2].mxu0 }
 0x12b   : > { %316 = vrot.lane.b32.xlu0 %v303_v16, %s645_s21  ;;  %v581_v19 = vpop.f32.mrb[3].mxu0  ;;  %v308_v21 = vadd.f32 %v303_v16, %v239_v20 }
 0x12d   : > { %v552_v22 = vmul.f32 -1.442695, %v308_v21 }
 0x12f   : > { %600 = vpow2.f32 %v552_v22 }
 0x139   : > { %v601_v23 = vpop.eup %600 }
 0x13a   : > { %v312_v24 = vadd.f32 1.0, %v601_v23 }
 0x13c   : > { %602 = vrcp.f32 %v312_v24 }
 0x146   : > { %v603_v25 = vpop.eup %602 }
 0x147   : > { %v326_v32 = vsub.f32 1.0, %v603_v25 }
 0x19d   : > { %v317_v26 = vpop.permute.xlu0 %316 }
 0x19e   : > { %v319_v27 = vmul.f32 %v603_v25, %v317_v26 }
 0x1a0   : > { %321 = vrot.lane.b32.xlu0 %v319_v27, %s645_s21  ;;  %s414_s21 = scalar_lea.vmem %s862_s5, %s563_s26  ;;  %s389_s26 = scalar_lea.vmem [#allocation2], %s560_s10 }
 0x212   : > { %v322_v28 = vpop.permute.xlu0 %321 }
 0x213   : > { %v324_v29 = vadd.f32 %v322_v28, %v239_v20 }
 0x215   : > { %604 = vtanh.f32 %v324_v29 }
 0x21f   : > { %v605_v30 = vpop.eup %604 }
 0x220   : > { %328 = vrot.lane.b32.xlu1 %v605_v30, %s646_s22 }
 0x224   : > { %333 = vrot.lane.b32.xlu1 %v238_v12, %s647_s23  ;;  %s559_s23 = sshll.u32 %s382_s0, 1  ;;  %s565_s0 = sshll.u32 %s805_s9, 1 }
 0x292   : > { %v329_v31 = vpop.permute.xlu1 %328 }
 0x293   : > { %v331_v34 = vmul.f32 %v329_v31, %v326_v32 }
 0x296   : > { %v334_v33 = vpop.permute.xlu1 %333 }
 0x297   : > { %v336_v35 = vmul.f32 %v603_v25, %v334_v33 }
 0x299   : > { %v337_v36 = vadd.f32 %v336_v35, %v331_v34 }
 0x29b   : > { %340 = vrot.lane.b32.xlu0 %v337_v36, %s646_s22  ;;  %v361_v37 = vrot.slane %v337_v36, 1  ;;  %v376_v38 = vrot.slane %v337_v36, 2  ;;  %v391_v39 = vrot.slane %v337_v36, 3  ;;  %v406_v40 = vrot.slane %v337_v36, 4 }
 0x29c   : > { %v421_v41 = vrot.slane %v337_v36, 5  ;;  %v436_v42 = vrot.slane %v337_v36, 6  ;;  %v451_v43 = vrot.slane %v337_v36, 7 }
 0x29d   : > { %362 = vrot.lane.b32.xlu1 %v361_v37, %s646_s22 }
 0x29f   : > { %377 = vrot.lane.b32.xlu0 %v376_v38, %s646_s22 }
 0x2a1   : > { %392 = vrot.lane.b32.xlu1 %v391_v39, %s646_s22 }
 0x2a3   : > { %407 = vrot.lane.b32.xlu0 %v406_v40, %s646_s22 }
 0x2a5   : > { %422 = vrot.lane.b32.xlu1 %v421_v41, %s646_s22 }
 0x2a7   : > { %437 = vrot.lane.b32.xlu0 %v436_v42, %s646_s22 }
 0x2a9   : > { %452 = vrot.lane.b32.xlu1 %v451_v43, %s646_s22  ;;  %s348_s22 = scalar_lea.vmem [#allocation2], %s554_s29  ;;  %s384_s29 = scalar_lea.vmem %s862_s5, %s559_s23 }
 0x2aa   : > { %v349_v44 = vld [vmem:[%s348_s22] sm:$0x1] }
 0x30d   : > { %v341_v45 = vpop.permute.xlu0 %340 }
 0x30e   : > { %345 = vst.msk [vmem:[%s344_s30] sm:$0x1] %vm194_vm2, %v341_v45  ;;  %v350_v46 = vadd.f32 %v349_v44, %v341_v45  ;;  %s429_s30 = scalar_lea.vmem %s862_s5, %s565_s0 }
 0x30f   : > { %356 = vst.msk [vmem:[%s354_s3 - $0x1] sm:$0x2] %vm355_vm4, %v341_v45  ;;  %s444_s3 = scalar_lea.vmem %s862_s5, %s567_s16  ;;  %v363_v48 = vpop.permute.xlu1 %362 }
 0x310   : > { %371 = vst.msk [vmem:[%s369_s8 - $0x2] sm:$0x4] %vm370_vm5, %v341_v45  ;;  %s402_s8 = sld [smem:[#allocation6 + %s770_s13]]  ;;  %s566_s13 = sshll.u32 %s432_s2, 1 }
 0x311   : > { %351 = vst.msk [vmem:[%s348_s22] sm:$0x1] %vm194_vm2, %v350_v46  ;;  %s359_s22 = scalar_lea.vmem [#allocation2], %s556_s4  ;;  %v378_v50 = vpop.permute.xlu0 %377  ;;  %s434_s16 = scalar_lea.vmem [#allocation2], %s566_s13 }
 0x312   : > { %386 = vst.msk [vmem:[%s384_s29 - $0x3] sm:$0x8] %vm385_vm6, %v341_v45  ;;  %s417_s29 = sld [smem:[#allocation6 + %s774_s15]] }
 0x313   : > { %401 = vst.msk [vmem:[%s399_s28 - $0x3] sm:$0x10] %vm400_vm7, %v341_v45  ;;  %v393_v54 = vpop.permute.xlu1 %392  ;;  %s447_s28 = sld [smem:[#allocation6 + %s787_s11]] }
 0x314   : > { %416 = vst.msk [vmem:[%s414_s21 - $0x4] sm:$0x20] %vm415_vm8, %v341_v45 }
 0x315   : > { %431 = vst.msk [vmem:[%s429_s30 - $0x5] sm:$0x40] %vm430_vm9, %v341_v45  ;;  %v408_v56 = vpop.permute.xlu0 %407 }
 0x316   : > { %446 = vst.msk [vmem:[%s444_s3 - $0x6] sm:$0x80] %vm445_vm10, %v341_v45  ;;  %s562_s20 = sshll.u32 %s402_s8, 1 }
 0x317   : > { %s404_s12 = scalar_lea.vmem [#allocation2], %s562_s20  ;;  %v423_v60 = vpop.permute.xlu1 %422 }
 0x318   : > { %v360_v47 = vld [vmem:[%s359_s22] sm:$0x1]  ;;  %s564_s0 = sshll.u32 %s417_s29, 1 }
 0x319   : > { %v365_v49 = vadd.f32 %v363_v48, %v360_v47  ;;  %s419_s14 = scalar_lea.vmem [#allocation2], %s564_s0  ;;  %v438_v62 = vpop.permute.xlu0 %437  ;;  %s568_s15 = sshll.u32 %s447_s28, 1 }
 0x31a   : > { %s449_s6 = scalar_lea.vmem [#allocation2], %s568_s15 }
 0x31b   : > { %366 = vst.msk [vmem:[%s359_s22] sm:$0x1] %vm194_vm2, %v365_v49  ;;  %v453_v2 = vpop.permute.xlu1 %452 }
 0x322   : > { %v375_v51 = vld [vmem:[%s374_s25] sm:$0x1] }
 0x323   : > { %v380_v52 = vadd.f32 %v378_v50, %v375_v51 }
 0x325   : > { %381 = vst.msk [vmem:[%s374_s25] sm:$0x1] %vm194_vm2, %v380_v52 }
 0x32c   : > { %v390_v53 = vld [vmem:[%s389_s26] sm:$0x1] }
 0x32d   : > { %v395_v55 = vadd.f32 %v393_v54, %v390_v53 }
 0x32f   : > { %396 = vst.msk [vmem:[%s389_s26] sm:$0x1] %vm194_vm2, %v395_v55 }
 0x336   : > { %v405_v57 = vld [vmem:[%s404_s12 + $0x1] sm:$0x1] }
 0x337   : > { %v410_v58 = vadd.f32 %v408_v56, %v405_v57 }
 0x339   : > { %411 = vst.msk [vmem:[%s404_s12 + $0x1] sm:$0x1] %vm194_vm2, %v410_v58 }
 0x340   : > { %v420_v59 = vld [vmem:[%s419_s14 + $0x1] sm:$0x1] }
 0x341   : > { %v425_v61 = vadd.f32 %v423_v60, %v420_v59 }
 0x343   : > { %426 = vst.msk [vmem:[%s419_s14 + $0x1] sm:$0x1] %vm194_vm2, %v425_v61 }
 0x34a   : > { %v435_v63 = vld [vmem:[%s434_s16 + $0x1] sm:$0x1] }
 0x34b   : > { %v440_v0 = vadd.f32 %v438_v62, %v435_v63 }
 0x34d   : > { %441 = vst.msk [vmem:[%s434_s16 + $0x1] sm:$0x1] %vm194_vm2, %v440_v0 }
 0x354   : > { %v450_v1 = vld [vmem:[%s449_s6 + $0x1] sm:$0x1] }
 0x355   : > { %v455_v3 = vadd.f32 %v453_v2, %v450_v1 }
 0x357   : > { %456 = vst.msk [vmem:[%s449_s6 + $0x1] sm:$0x1] %vm194_vm2, %v455_v3 }
 0x358 PF: > { %s872_s17 = sld [smem:[#allocation8_spill]] }
 0x35e   : > { %s25_s1 = sadd.s32 1, %s872_s17  }
 0x35f   : > { %p22_p1 = scmp.ge.s32.totalorder %s25_s1, 6  }
 0x361   :  { %24 = sbr.rel (!%p22_p1) target bundleno = 28 (0x1c), region = 86 }

// kernel: encoder_forward.11
= control target key start
LH: loop header
LB: loop body
LE: loop exit
PB: predicated region body
PF: predicated region fallthrough
CT: control target
= control target key end

     0   :  { %vm91_vm0 = vcmask 254976   ;;  %v2460_v0 = vmov 0.0   ;;  %vm2461_vm1 = vmmov 0   ;;  %vm128_vm2 = vcmask 261120   ;;  %s2463_s30 = smov 64   ;;  %s2465_s12 = smov 96   ;;  %s3077_s4 = inlined_call_operand.vmem [shape: bf16[2,32,96], index: 4, kind: input, shape index: {}]   ;;  %s3078_s5 = inlined_call_operand.vmem [shape: f32[2,1,96], index: 5, kind: input, shape index: {}]   ;;  %s3079_s0 = inlined_call_operand.vmem [shape: f32[8,2,192], index: 0, kind: input, shape index: {}, may-alias: {0,1}]   ;;  %s3080_s2 = inlined_call_operand.vmem [shape: f32[8,2,1], index: 2, kind: input, shape index: {}, may-alias: {2,3}]   ;;  %s3081_s6 = inlined_call_operand.vmem [shape: f32[8,2,32], index: 6, kind: output, shape index: {0}]   ;;  %s3082_s1 = inlined_call_operand.vmem [shape: f32[8,2,192], index: 1, kind: input, shape index: {}, may-alias: {0,1}]   ;;  %s3083_s3 = inlined_call_operand.vmem [shape: f32[8,2,1], index: 3, kind: input, shape index: {}, may-alias: {2,3}]   ;;  %s3084_s7 = inlined_call_operand.vmem [shape: f32[8,2,32], index: 7, kind: output, shape index: {1}]  }
   0x1   :  { %2185 = vmatprep.subr.bf16.mxu0 %v2460_v0  ;;  %v2511_v1 = vld [vmem:[%s3077_s4] sm:$0xff]   ;;  %2189 = vmatprep.mubr.msk.bf16.mxu0 %vm2461_vm1, %v2460_v0  ;;  %92 = vst.msk [vmem:[#allocation2] sm:$0x3] %vm91_vm0, %v2460_v0  ;;  %93 = vst.msk [vmem:[#allocation3] sm:$0x3] %vm91_vm0, %v2460_v0  ;;  %v2526_v2 = vld [vmem:[%s3077_s4 + $0x8] sm:$0xff]   ;;  %v183_v7 = vlaneseq }
   0x2   :  { %2193 = vmatprep.subr.bf16.mxu1 %v2460_v0  ;;  %2197 = vmatprep.mubr.msk.bf16.mxu1 %vm2461_vm1, %v2460_v0  ;;  %v2462_v5 = vmov 1983009808   ;;  %v2545_v10 = vld [vmem:[%s3078_s5] ss:$0 sm:$0xff]  ;;  %v2464_v26 = vmov 0   ;;  %s2466_s13 = smov 32  }
   0x3   :  { %2186 = vmatpush3.bf16.msra.mxu0 %v2511_v1  ;;  %v181_v6 = vunpack.c.l.s4 %v2462_v5  ;;  %v184_v9 = vshrl.u32 %v183_v7, 7  ;;  %v106_v18 = vld [vmem:[%s3079_s0] sm:$0x3]  ;;  %2321 = vset.pattern.permute.xlu1 %v2464_v26  ;;  %v2568_v40 = vld [vmem:[%s3077_s4 + $0x10] sm:$0xff]   ;;  %v2574_v41 = vld [vmem:[%s3077_s4 + $0x18] sm:$0xff]  }
   0x4   :  { %2187 = vmatprep.subr.bf16.mxu0 %v2460_v0  ;;  %v107_v27 = vld [vmem:[%s3080_s2] sm:$0x3]  ;;  %2320 = vset.pattern.permute.xlu0 %v2464_v26  ;;  %v2063_v62 = vld [vmem:[%s3079_s0 + $0x4] sm:$0x3] }
   0x5   :  { %v182_v8 = vunpack.c.0.s8 %v181_v6  ;;  %v233_v32 = vsub.f32 1.0, %v107_v27  ;;  %2194 = vmatpush3.bf16.msra.mxu1 %v2568_v40 }
   0x6   :  { %2195 = vmatprep.subr.bf16.mxu1 %v2460_v0 }
   0x7   :  { %2188 = vmatpush3.bf16.msra.mxu0 %v2526_v2  ;;  %v2547_v11 = vsub.s32 %v182_v8, %v184_v9  ;;  %v2617_v9 = vld [vmem:[%s3078_s5 + $0x1] ss:$0 sm:$0xff] }
   0x8   :  { %v2530_v3 = vld [vmem:[#allocation2] sm:$0x3]  ;;  %2201 = vmatprep.subr.bf16.mxu0 %v2460_v0  ;;  %v2576_v42 = vld [vmem:[#allocation3] sm:$0x3] }
   0x9   :  { %v109_v4 = vpack.c.bf16 %v2530_v3, %v2530_v3  ;;  %v210_v31 = vrot.slane %v2530_v3, %v2547_v11  ;;  %v249_v43 = vpack.c.bf16 %v2576_v42, %v2576_v42  ;;  %2196 = vmatpush3.bf16.msra.mxu1 %v2574_v41 }
   0xa   :  { %2209 = vmatprep.subr.bf16.mxu1 %v2460_v0 }
   0xb   :  { %2190 = vmatmul.mubr.msk.bf16.vlgmr.msra.gmra.mrb[0].mxu0 %vm128_vm2, %v109_v4 }
   0xc   :  { %2202 = vmatpush3.bf16.msra.mxu0 %v2511_v1  ;;  %2205 = vmatprep.mubr.msk.bf16.mxu0 %vm2461_vm1, %v2460_v0 }
   0xd   :  { %2203 = vmatprep.subr.bf16.mxu0 %v2460_v0  ;;  %2198 = vmatmul.mubr.msk.bf16.vlgmr.msra.gmra.mrb[0].mxu1 %vm128_vm2, %v249_v43 }
   0xe   :  { %2210 = vmatpush3.bf16.msra.mxu1 %v2568_v40  ;;  %2213 = vmatprep.mubr.msk.bf16.mxu1 %vm2461_vm1, %v2460_v0 }
   0xf   :  { %2211 = vmatprep.subr.bf16.mxu1 %v2460_v0 }
  0x10   :  { %2204 = vmatpush3.bf16.msra.mxu0 %v2526_v2 }
  0x11   :  { %2217 = vmatprep.subr.bf16.mxu0 %v2460_v0 }
  0x12   :  { %2212 = vmatpush3.bf16.msra.mxu1 %v2574_v41 }
  0x13   :  { %2225 = vmatprep.subr.bf16.mxu1 %v2460_v0 }
  0xde   :  { %v166_v12 = vpop.f32.mrb[0].mxu0 }
  0xdf   :  { %v167_v13 = vadd.f32 %v2545_v10, %v166_v12  ;;  %v2191_v14 = vpop.f32.mrb[1].mxu0  ;;  %v2064_v12 = vld [vmem:[%s3080_s2 + $0x2] sm:$0x3] }
  0xe0   :  { %v169_v15 = vpop.f32.mrb[2].mxu0  ;;  %v305_v52 = vpop.f32.mrb[0].mxu1 }
  0xe1   :  { %v2192_v16 = vpop.f32.mrb[3].mxu0  ;;  %v186_v17 = vrot.slane %v167_v13, %v2547_v11  ;;  %v172_v19 = vadd.f32 %v167_v13, %v106_v18  ;;  %v2199_v53 = vpop.f32.mrb[1].mxu1  ;;  %v306_v14 = vadd.f32 %v2617_v9, %v305_v52  ;;  %v484_v15 = vsub.f32 1.0, %v2064_v12 }
  0xe2   :  { %v308_v55 = vpop.f32.mrb[2].mxu1 }
  0xe3   :  { %187 = vrot.lane.b32.xlu0 %v186_v17, %s2463_s30  ;;  %v2053_v20 = vmul.f32 -1.442695, %v172_v19  ;;  %v2200_v58 = vpop.f32.mrb[3].mxu1  ;;  %v318_v16 = vrot.slane %v306_v14, %v2547_v11  ;;  %v2054_v17 = vld [vmem:[%s3082_s1 + $0x1c] sm:$0xf] }
  0xe5   :  { %2326 = vpow2.f32 %v2053_v20 }
  0xef   :  { %v2327_v21 = vpop.eup %2326 }
  0xf0   :  { %v176_v22 = vadd.f32 1.0, %v2327_v21 }
  0xf2   :  { %2328 = vrcp.f32 %v176_v22 }
  0xfc   :  { %v2329_v23 = vpop.eup %2328 }
  0xfd   :  { %v197_v34 = vsub.f32 1.0, %v2329_v23 }
 0x155   :  { %v188_v24 = vpop.permute.xlu0 %187 }
 0x156   :  { %v190_v25 = vmul.f32 %v2329_v23, %v188_v24 }
 0x158   :  { %192 = vrot.lane.b32.xlu0 %v190_v25, %s2463_s30 }
 0x15c   :  { %218 = vperm.xlu0 %2320, %v107_v27  }
 0x1ca   :  { %v193_v28 = vpop.permute.xlu0 %192 }
 0x1cb   :  { %v195_v29 = vadd.f32 %v193_v28, %v106_v18  ;;  %v2055_v18 = vld [vmem:[%s3083_s3 + $0xe] sm:$0x3] }
 0x1cd   :  { %2330 = vtanh.f32 %v195_v29 }
 0x1d7   :  { %v2331_v30 = vpop.eup %2330 }
 0x1d8   :  { %199 = vrot.lane.b32.xlu1 %v2331_v30, %s2465_s12 }
 0x1db   :  { %v219_v45 = vpop.permute.xlu0 %218 }
 0x1dc   :  { %211 = vrot.lane.b32.xlu1 %v210_v31, %s2466_s13 }
 0x1e0   :  { %236 = vperm.xlu1 %2321, %v233_v32  }
 0x24a   :  { %v200_v33 = vpop.permute.xlu1 %199 }
 0x24b   :  { %v202_v36 = vmul.f32 %v200_v33, %v197_v34 }
 0x24e   :  { %v212_v35 = vpop.permute.xlu1 %211 }
 0x24f   :  { %v214_v37 = vmul.f32 %v2329_v23, %v212_v35 }
 0x251   :  { %v215_v38 = vadd.f32 %v214_v37, %v202_v36 }
 0x253   :  { %v228_v39 = vrot.slane %v215_v38, %v2547_v11 }
 0x255   :  { %229 = vrot.lane.b32.xlu1 %v228_v39, %s2465_s12 }
 0x25f   :  { %v237_v44 = vpop.permute.xlu1 %236 }
 0x260   :  { %v239_v47 = vmul.f32 %v237_v44, %v2530_v3 }
 0x2c7   :  { %v230_v46 = vpop.permute.xlu1 %229 }
 0x2c8   :  { %v232_v48 = vmul.f32 %v230_v46, %v219_v45  ;;  %v363_v46 = vsub.f32 1.0, %v2055_v18 }
 0x2ca   :  { %v240_v49 = vadd.f32 %v239_v47, %v232_v48  ;;  %243 = vst.msk [vmem:[%s3081_s6] sm:$0x3] %vm91_vm0, %v232_v48 }
 0x2cc   :  { %242 = vst.msk [vmem:[#allocation2] sm:$0x3] %vm91_vm0, %v240_v49  ;;  %v330_v49 = vrot.slane %v2054_v17, 2 }
 0x2d3   :  { %v2596_v50 = vld [vmem:[#allocation2] sm:$0x3] }
 0x2d4   :  { %v379_v51 = vpack.c.bf16 %v2596_v50, %v2596_v50  ;;  %v461_v13 = vrot.slane %v2596_v50, %v2547_v11 }
 0x2d6   :  { %2206 = vmatmul.mubr.msk.bf16.vlgmr.msra.gmra.mrb[4].mxu0 %vm128_vm2, %v379_v51 }
 0x2d7   :  { %2218 = vmatpush3.bf16.msra.mxu0 %v2511_v1  ;;  %2221 = vmatprep.mubr.msk.bf16.mxu0 %vm2461_vm1, %v2460_v0 }
 0x2d8   :  { %2219 = vmatprep.subr.bf16.mxu0 %v2460_v0 }
 0x2db   :  { %2220 = vmatpush3.bf16.msra.mxu0 %v2526_v2 }
 0x2dc   :  { %2233 = vmatprep.subr.bf16.mxu0 %v2460_v0 }
 0x3a9   :  { %v417_v54 = vpop.f32.mrb[4].mxu0 }
 0x3aa   :  { %v418_v56 = vadd.f32 %v2545_v10, %v417_v54  ;;  %v2207_v57 = vpop.f32.mrb[5].mxu0 }
 0x3ab   :  { %v420_v59 = vpop.f32.mrb[6].mxu0 }
 0x3ac   :  { %v437_v60 = vrot.slane %v418_v56, %v2547_v11  ;;  %v2208_v61 = vpop.f32.mrb[7].mxu0  ;;  %v423_v63 = vadd.f32 %v2063_v62, %v418_v56 }
 0x3ae   :  { %438 = vrot.lane.b32.xlu0 %v437_v60, %s2463_s30  ;;  %v2066_v3 = vmul.f32 -1.442695, %v423_v63 }
 0x3b0   :  { %2332 = vpow2.f32 %v2066_v3 }
 0x3ba   :  { %v2333_v4 = vpop.eup %2332 }
 0x3bb   :  { %v427_v5 = vadd.f32 1.0, %v2333_v4 }
 0x3bd   :  { %2334 = vrcp.f32 %v427_v5 }
 0x3c7   :  { %v2335_v6 = vpop.eup %2334 }
 0x3c8   :  { %v448_v23 = vsub.f32 1.0, %v2335_v6 }
 0x420   :  { %v439_v7 = vpop.permute.xlu0 %438 }
 0x421   :  { %v441_v8 = vmul.f32 %v2335_v6, %v439_v7 }
 0x423   :  { %443 = vrot.lane.b32.xlu1 %v441_v8, %s2463_s30 }
 0x427   :  { %462 = vrot.lane.b32.xlu1 %v461_v13, %s2466_s13 }
 0x42b   :  { %487 = vperm.xlu1 %2321, %v484_v15  }
 0x42f   :  { %319 = vrot.lane.b32.xlu1 %v318_v16, %s2465_s12 }
 0x433   :  { %343 = vrot.lane.b32.xlu1 %v2054_v17, %s2465_s12 }
 0x437   :  { %359 = vperm.xlu1 %2321, %v2055_v18   ;;  %v2074_v18 = vld [vmem:[%s3079_s0 + $0x8] sm:$0x3] }
 0x495   :  { %v444_v19 = vpop.permute.xlu1 %443 }
 0x496   :  { %v446_v20 = vadd.f32 %v2063_v62, %v444_v19 }
 0x498   :  { %2336 = vtanh.f32 %v446_v20 }
 0x499   :  { %v463_v22 = vpop.permute.xlu1 %462 }
 0x49a   :  { %v465_v25 = vmul.f32 %v2335_v6, %v463_v22 }
 0x4a2   :  { %v2337_v21 = vpop.eup %2336 }
 0x4a3   :  { %450 = vrot.lane.b32.xlu0 %v2337_v21, %s2465_s12 }
 0x4a7   :  { %469 = vperm.xlu0 %2320, %v2064_v12  }
 0x4aa   :  { %v488_v29 = vpop.permute.xlu1 %487 }
 0x4ab   :  { %v490_v37 = vmul.f32 %v488_v29, %v2596_v50 }
 0x4ae   :  { %v320_v30 = vpop.permute.xlu1 %319 }
 0x4af   :  { %v322_v31 = vadd.f32 %v2054_v17, %v320_v30  ;;  %v332_v50 = vadd.f32 %v330_v49, %v320_v30 }
 0x4b1   :  { %v2060_v32 = vmul.f32 -1.442695, %v322_v31  ;;  %v2061_v51 = vmul.f32 -1.442695, %v332_v50  ;;  %v2075_v31 = vld [vmem:[%s3080_s2 + $0x4] sm:$0x3] }
 0x4b2   :  { %v344_v54 = vpop.permute.xlu1 %343 }
 0x4b3   :  { %2338 = vpow2.f32 %v2060_v32  ;;  %v345_v55 = vrot.slane %v344_v54, 2 }
 0x4b6   :  { %v360_v3 = vpop.permute.xlu1 %359 }
 0x4bd   :  { %v2339_v33 = vpop.eup %2338 }
 0x4be   :  { %v326_v34 = vadd.f32 1.0, %v2339_v33 }
 0x4c0   :  { %2340 = vrcp.f32 %v326_v34  ;;  %v717_v34 = vsub.f32 1.0, %v2075_v31 }
 0x4c1   :  { %2342 = vpow2.f32 %v2061_v51 }
 0x4ca   :  { %v2341_v39 = vpop.eup %2340 }
 0x4cb   :  { %v2343_v52 = vpop.eup %2342 }
 0x4cc   :  { %v336_v53 = vadd.f32 1.0, %v2343_v52 }
 0x4ce   :  { %2344 = vrcp.f32 %v336_v53 }
 0x4d8   :  { %v2345_v58 = vpop.eup %2344 }
 0x4d9   :  { %v353_v59 = vsub.f32 1.0, %v2345_v58  ;;  %v355_v60 = vmul.f32 %v2345_v58, %v2576_v42 }
 0x515   :  { %v451_v24 = vpop.permute.xlu0 %450 }
 0x516   :  { %v453_v26 = vmul.f32 %v451_v24, %v448_v23 }
 0x518   :  { %v466_v27 = vadd.f32 %v465_v25, %v453_v26 }
 0x51a   :  { %v479_v28 = vrot.slane %v466_v27, %v2547_v11 }
 0x51c   :  { %480 = vrot.lane.b32.xlu0 %v479_v28, %s2465_s12 }
 0x520   :  { %339 = vrot.lane.b32.xlu0 %v318_v16, %s2466_s13 }
 0x526   :  { %v470_v35 = vpop.permute.xlu0 %469 }
 0x58e   :  { %v481_v36 = vpop.permute.xlu0 %480 }
 0x58f   :  { %v483_v38 = vmul.f32 %v481_v36, %v470_v35  ;;  %v2068_v35 = vld [vmem:[%s3082_s1 + $0x18] sm:$0xf]  ;;  %v2069_v36 = vld [vmem:[%s3083_s3 + $0xc] sm:$0x3] }
 0x591   :  { %v491_v43 = vadd.f32 %v490_v37, %v483_v38  ;;  %2067 = vst.msk [vmem:[%s3081_s6 + $0x2] sm:$0x3] %vm91_vm0, %v483_v38 }
 0x592   :  { %v340_v44 = vpop.permute.xlu0 %339 }
 0x593   :  { %492 = vst.msk [vmem:[#allocation2] sm:$0x3] %vm91_vm0, %v491_v43  ;;  %v342_v45 = vmul.f32 %v2341_v39, %v340_v44 }
 0x595   :  { %348 = vrot.lane.b32.xlu0 %v342_v45, %s2466_s13 }
 0x599   :  { %366 = vperm.xlu0 %2320, %v363_v46  }
 0x59a   :  { %v2646_v47 = vld [vmem:[#allocation2] sm:$0x3] }
 0x59b   :  { %v612_v48 = vpack.c.bf16 %v2646_v47, %v2646_v47  ;;  %v694_v26 = vrot.slane %v2646_v47, %v2547_v11 }
 0x59d   :  { %2222 = vmatmul.mubr.msk.bf16.vlgmr.msra.gmra.mrb[8].mxu0 %vm128_vm2, %v612_v48 }
 0x59e   :  { %2234 = vmatpush3.bf16.msra.mxu0 %v2511_v1  ;;  %2237 = vmatprep.mubr.msk.bf16.mxu0 %vm2461_vm1, %v2460_v0 }
 0x59f   :  { %2235 = vmatprep.subr.bf16.mxu0 %v2460_v0 }
 0x5a2   :  { %2236 = vmatpush3.bf16.msra.mxu0 %v2526_v2 }
 0x5a3   :  { %2249 = vmatprep.subr.bf16.mxu0 %v2460_v0 }
 0x607   :  { %v349_v56 = vpop.permute.xlu0 %348 }
 0x608   :  { %v351_v57 = vadd.f32 %v349_v56, %v345_v55 }
 0x60a   :  { %2346 = vtanh.f32 %v351_v57 }
 0x614   :  { %v2347_v61 = vpop.eup %2346 }
 0x615   :  { %v354_v62 = vmul.f32 %v2347_v61, %v353_v59  ;;  %v596_v59 = vsub.f32 1.0, %v2069_v36 }
 0x617   :  { %v356_v63 = vadd.f32 %v355_v60, %v354_v62  ;;  %v563_v62 = vrot.slane %v2068_v35, 2 }
 0x618   :  { %v367_v4 = vpop.permute.xlu0 %366 }
 0x619   :  { %v362_v5 = vmul.f32 %v360_v3, %v356_v63  ;;  %v369_v6 = vmul.f32 %v367_v4, %v2576_v42 }
 0x61b   :  { %v370_v7 = vadd.f32 %v369_v6, %v362_v5  ;;  %2062 = vst.msk [vmem:[%s3084_s7 + $0xe] sm:$0x3] %vm91_vm0, %v362_v5 }
 0x61d   :  { %371 = vst.msk [vmem:[#allocation3] sm:$0x3] %vm91_vm0, %v370_v7 }
 0x624   :  { %v2664_v8 = vld [vmem:[#allocation3] sm:$0x3] }
 0x625   :  { %v500_v12 = vpack.c.bf16 %v2664_v8, %v2664_v8 }
 0x627   :  { %2214 = vmatmul.mubr.msk.bf16.vlgmr.msra.gmra.mrb[4].mxu1 %vm128_vm2, %v500_v12 }
 0x628   :  { %2226 = vmatpush3.bf16.msra.mxu1 %v2568_v40  ;;  %2229 = vmatprep.mubr.msk.bf16.mxu1 %vm2461_vm1, %v2460_v0 }
 0x629   :  { %2227 = vmatprep.subr.bf16.mxu1 %v2460_v0 }
 0x62c   :  { %2228 = vmatpush3.bf16.msra.mxu1 %v2574_v41 }
 0x62d   :  { %2241 = vmatprep.subr.bf16.mxu1 %v2460_v0 }
 0x670   :  { %v650_v42 = vpop.f32.mrb[8].mxu0 }
 0x671   :  { %v651_v13 = vadd.f32 %v2545_v10, %v650_v42  ;;  %v2223_v14 = vpop.f32.mrb[9].mxu0 }
 0x672   :  { %v653_v15 = vpop.f32.mrb[10].mxu0 }
 0x673   :  { %v670_v16 = vrot.slane %v651_v13, %v2547_v11  ;;  %v2224_v17 = vpop.f32.mrb[11].mxu0  ;;  %v656_v19 = vadd.f32 %v2074_v18, %v651_v13 }
 0x675   :  { %671 = vrot.lane.b32.xlu1 %v670_v16, %s2463_s30  ;;  %v2077_v20 = vmul.f32 -1.442695, %v656_v19 }
 0x677   :  { %2348 = vpow2.f32 %v2077_v20 }
 0x681   :  { %v2349_v21 = vpop.eup %2348 }
 0x682   :  { %v660_v22 = vadd.f32 1.0, %v2349_v21 }
 0x684   :  { %2350 = vrcp.f32 %v660_v22 }
 0x68e   :  { %v2351_v23 = vpop.eup %2350 }
 0x68f   :  { %v681_v44 = vsub.f32 1.0, %v2351_v23 }
 0x6e7   :  { %v672_v24 = vpop.permute.xlu1 %671 }
 0x6e8   :  { %v674_v25 = vmul.f32 %v2351_v23, %v672_v24 }
 0x6ea   :  { %676 = vrot.lane.b32.xlu0 %v674_v25, %s2463_s30 }
 0x6ee   :  { %695 = vrot.lane.b32.xlu0 %v694_v26, %s2466_s13 }
 0x6fa   :  { %v538_v27 = vpop.f32.mrb[4].mxu1 }
 0x6fb   :  { %v539_v28 = vadd.f32 %v2617_v9, %v538_v27  ;;  %v2215_v29 = vpop.f32.mrb[5].mxu1 }
 0x6fc   :  { %v541_v30 = vpop.f32.mrb[6].mxu1 }
 0x6fd   :  { %v551_v32 = vrot.slane %v539_v28, %v2547_v11  ;;  %v2216_v33 = vpop.f32.mrb[7].mxu1 }
 0x6ff   :  { %572 = vrot.lane.b32.xlu0 %v551_v32, %s2466_s13 }
 0x703   :  { %720 = vperm.xlu0 %2320, %v717_v34  }
 0x707   :  { %576 = vrot.lane.b32.xlu0 %v2068_v35, %s2465_s12 }
 0x70b   :  { %592 = vperm.xlu0 %2320, %v2069_v36  }
 0x75c   :  { %v677_v37 = vpop.permute.xlu0 %676 }
 0x75d   :  { %v679_v38 = vadd.f32 %v2074_v18, %v677_v37 }
 0x75f   :  { %2352 = vtanh.f32 %v679_v38 }
 0x760   :  { %v696_v43 = vpop.permute.xlu0 %695 }
 0x761   :  { %v698_v46 = vmul.f32 %v2351_v23, %v696_v43 }
 0x769   :  { %v2353_v39 = vpop.eup %2352 }
 0x76a   :  { %683 = vrot.lane.b32.xlu1 %v2353_v39, %s2465_s12 }
 0x76e   :  { %552 = vrot.lane.b32.xlu1 %v551_v32, %s2465_s12 }
 0x771   :  { %v573_v57 = vpop.permute.xlu0 %572 }
 0x772   :  { %702 = vperm.xlu1 %2321, %v2075_v31  }
 0x782   :  { %v721_v61 = vpop.permute.xlu0 %720 }
 0x783   :  { %v723_v3 = vmul.f32 %v721_v61, %v2646_v47 }
 0x786   :  { %v577_v14 = vpop.permute.xlu0 %576 }
 0x787   :  { %v578_v15 = vrot.slane %v577_v14, 2 }
 0x78a   :  { %v593_v24 = vpop.permute.xlu0 %592 }
 0x7dc   :  { %v684_v45 = vpop.permute.xlu1 %683 }
 0x7dd   :  { %v686_v48 = vmul.f32 %v684_v45, %v681_v44 }
 0x7df   :  { %v699_v49 = vadd.f32 %v698_v46, %v686_v48  ;;  %v2085_v46 = vld [vmem:[%s3079_s0 + $0xc] sm:$0x3] }
 0x7e0   :  { %v553_v50 = vpop.permute.xlu1 %552 }
 0x7e1   :  { %v555_v51 = vadd.f32 %v2068_v35, %v553_v50  ;;  %v712_v52 = vrot.slane %v699_v49, %v2547_v11  ;;  %v565_v5 = vadd.f32 %v563_v62, %v553_v50 }
 0x7e3   :  { %v2071_v53 = vmul.f32 -1.442695, %v555_v51  ;;  %713 = vrot.lane.b32.xlu1 %v712_v52, %s2465_s12  ;;  %v2072_v7 = vmul.f32 -1.442695, %v565_v5  ;;  %v2086_v5 = vld [vmem:[%s3080_s2 + $0x6] sm:$0x3] }
 0x7e5   :  { %2354 = vpow2.f32 %v2071_v53 }
 0x7ef   :  { %v2355_v54 = vpop.eup %2354 }
 0x7f0   :  { %v559_v55 = vadd.f32 1.0, %v2355_v54 }
 0x7f1   :  { %v703_v60 = vpop.permute.xlu1 %702 }
 0x7f2   :  { %2356 = vrcp.f32 %v559_v55  ;;  %v2079_v55 = vld [vmem:[%s3082_s1 + $0x14] sm:$0xf] }
 0x7f3   :  { %2358 = vpow2.f32 %v2072_v7 }
 0x7fc   :  { %v2357_v56 = vpop.eup %2356 }
 0x7fd   :  { %v575_v58 = vmul.f32 %v2357_v56, %v573_v57  ;;  %v2359_v47 = vpop.eup %2358 }
 0x7fe   :  { %v569_v13 = vadd.f32 1.0, %v2359_v47 }
 0x7ff   :  { %581 = vrot.lane.b32.xlu1 %v575_v58, %s2466_s13 }
 0x800   :  { %2360 = vrcp.f32 %v569_v13  ;;  %v796_v13 = vrot.slane %v2079_v55, 2 }
 0x803   :  { %599 = vperm.xlu1 %2321, %v596_v59  }
 0x80a   :  { %v2361_v18 = vpop.eup %2360 }
 0x80b   :  { %v586_v19 = vsub.f32 1.0, %v2361_v18  ;;  %v588_v21 = vmul.f32 %v2361_v18, %v2664_v8 }
 0x855   :  { %v714_v63 = vpop.permute.xlu1 %713 }
 0x856   :  { %v716_v4 = vmul.f32 %v714_v63, %v703_v60  ;;  %v2080_v63 = vld [vmem:[%s3083_s3 + $0xa] sm:$0x3] }
 0x858   :  { %v724_v6 = vadd.f32 %v723_v3, %v716_v4  ;;  %2078 = vst.msk [vmem:[%s3081_s6 + $0x4] sm:$0x3] %vm91_vm0, %v716_v4  ;;  %v829_v4 = vsub.f32 1.0, %v2080_v63 }
 0x85a   :  { %725 = vst.msk [vmem:[#allocation2] sm:$0x3] %vm91_vm0, %v724_v6  ;;  %v950_v6 = vsub.f32 1.0, %v2086_v5 }
 0x861   :  { %v2709_v12 = vld [vmem:[#allocation2] sm:$0x3] }
 0x862   :  { %v845_v42 = vpack.c.bf16 %v2709_v12, %v2709_v12  ;;  %v927_v45 = vrot.slane %v2709_v12, %v2547_v11 }
 0x864   :  { %2238 = vmatmul.mubr.msk.bf16.vlgmr.msra.gmra.mrb[12].mxu0 %vm128_vm2, %v845_v42 }
 0x865   :  { %2250 = vmatpush3.bf16.msra.mxu0 %v2511_v1  ;;  %2253 = vmatprep.mubr.msk.bf16.mxu0 %vm2461_vm1, %v2460_v0 }
 0x866   :  { %2251 = vmatprep.subr.bf16.mxu0 %v2460_v0 }
 0x869   :  { %2252 = vmatpush3.bf16.msra.mxu0 %v2526_v2 }
 0x86a   :  { %2265 = vmatprep.subr.bf16.mxu0 %v2460_v0 }
 0x871   :  { %v582_v16 = vpop.permute.xlu1 %581 }
 0x872   :  { %v584_v17 = vadd.f32 %v582_v16, %v578_v15 }
 0x874   :  { %2362 = vtanh.f32 %v584_v17 }
 0x87e   :  { %v2363_v20 = vpop.eup %2362 }
 0x87f   :  { %v587_v22 = vmul.f32 %v2363_v20, %v586_v19 }
 0x881   :  { %v589_v23 = vadd.f32 %v588_v21, %v587_v22 }
 0x882   :  { %v600_v25 = vpop.permute.xlu1 %599 }
 0x883   :  { %v595_v26 = vmul.f32 %v593_v24, %v589_v23  ;;  %v602_v27 = vmul.f32 %v600_v25, %v2664_v8 }
 0x885   :  { %v603_v28 = vadd.f32 %v602_v27, %v595_v26  ;;  %2073 = vst.msk [vmem:[%s3084_s7 + $0xc] sm:$0x3] %vm91_vm0, %v595_v26 }
 0x887   :  { %604 = vst.msk [vmem:[#allocation3] sm:$0x3] %vm91_vm0, %v603_v28 }
 0x88e   :  { %v2727_v29 = vld [vmem:[#allocation3] sm:$0x3] }
 0x88f   :  { %v733_v30 = vpack.c.bf16 %v2727_v29, %v2727_v29 }
 0x891   :  { %2230 = vmatmul.mubr.msk.bf16.vlgmr.msra.gmra.mrb[8].mxu1 %vm128_vm2, %v733_v30 }
 0x892   :  { %2242 = vmatpush3.bf16.msra.mxu1 %v2568_v40  ;;  %2245 = vmatprep.mubr.msk.bf16.mxu1 %vm2461_vm1, %v2460_v0 }
 0x893   :  { %2243 = vmatprep.subr.bf16.mxu1 %v2460_v0 }
 0x896   :  { %2244 = vmatpush3.bf16.msra.mxu1 %v2574_v41 }
 0x897   :  { %2257 = vmatprep.subr.bf16.mxu1 %v2460_v0 }
 0x937   :  { %v883_v8 = vpop.f32.mrb[12].mxu0 }
 0x938   :  { %v884_v31 = vadd.f32 %v2545_v10, %v883_v8  ;;  %v2239_v32 = vpop.f32.mrb[13].mxu0 }
 0x939   :  { %v886_v33 = vpop.f32.mrb[14].mxu0 }
 0x93a   :  { %v903_v34 = vrot.slane %v884_v31, %v2547_v11  ;;  %v2240_v35 = vpop.f32.mrb[15].mxu0  ;;  %v889_v48 = vadd.f32 %v2085_v46, %v884_v31 }
 0x93c   :  { %904 = vrot.lane.b32.xlu0 %v903_v34, %s2463_s30  ;;  %v2088_v49 = vmul.f32 -1.442695, %v889_v48 }
 0x93e   :  { %2364 = vpow2.f32 %v2088_v49 }
 0x948   :  { %v2365_v50 = vpop.eup %2364 }
 0x949   :  { %v893_v51 = vadd.f32 1.0, %v2365_v50 }
 0x94b   :  { %2366 = vrcp.f32 %v893_v51 }
 0x955   :  { %v2367_v52 = vpop.eup %2366 }
 0x956   :  { %v914_v18 = vsub.f32 1.0, %v2367_v52 }
 0x964   :  { %v771_v36 = vpop.f32.mrb[8].mxu1 }
 0x965   :  { %v772_v37 = vadd.f32 %v2617_v9, %v771_v36  ;;  %v2231_v38 = vpop.f32.mrb[9].mxu1 }
 0x966   :  { %v774_v39 = vpop.f32.mrb[10].mxu1 }
 0x967   :  { %v784_v43 = vrot.slane %v772_v37, %v2547_v11  ;;  %v2232_v44 = vpop.f32.mrb[11].mxu1 }
 0x969   :  { %785 = vrot.lane.b32.xlu1 %v784_v43, %s2465_s12 }
 0x96d   :  { %805 = vrot.lane.b32.xlu1 %v784_v43, %s2466_s13 }
 0x971   :  { %928 = vrot.lane.b32.xlu1 %v927_v45, %s2466_s13 }
 0x9ae   :  { %v905_v53 = vpop.permute.xlu0 %904 }
 0x9af   :  { %v907_v54 = vmul.f32 %v2367_v52, %v905_v53 }
 0x9b1   :  { %909 = vrot.lane.b32.xlu0 %v907_v54, %s2463_s30 }
 0x9db   :  { %v786_v56 = vpop.permute.xlu1 %785 }
 0x9dc   :  { %v788_v57 = vadd.f32 %v2079_v55, %v786_v56  ;;  %v798_v14 = vadd.f32 %v796_v13, %v786_v56  ;;  %v2096_v13 = vld [vmem:[%s3079_s0 + $0x10] sm:$0x3] }
 0x9de   :  { %v2082_v58 = vmul.f32 -1.442695, %v788_v57  ;;  %v2083_v15 = vmul.f32 -1.442695, %v798_v14 }
 0x9df   :  { %v806_v62 = vpop.permute.xlu1 %805 }
 0x9e0   :  { %2368 = vpow2.f32 %v2082_v58 }
 0x9e3   :  { %v929_v17 = vpop.permute.xlu1 %928 }
 0x9e4   :  { %v931_v21 = vmul.f32 %v2367_v52, %v929_v17 }
 0x9ea   :  { %v2369_v59 = vpop.eup %2368 }
 0x9eb   :  { %v792_v60 = vadd.f32 1.0, %v2369_v59 }
 0x9ed   :  { %2370 = vrcp.f32 %v792_v60 }
 0x9f7   :  { %v2371_v61 = vpop.eup %2370 }
 0x9f8   :  { %v808_v3 = vmul.f32 %v2371_v61, %v806_v62 }
 0x9fa   :  { %814 = vrot.lane.b32.xlu1 %v808_v3, %s2466_s13 }
 0x9fe   :  { %832 = vperm.xlu1 %2321, %v829_v4  }
 0xa02   :  { %953 = vperm.xlu1 %2321, %v950_v6  }
 0xa23   :  { %v910_v7 = vpop.permute.xlu0 %909 }
 0xa24   :  { %v912_v42 = vadd.f32 %v2085_v46, %v910_v7 }
 0xa26   :  { %2372 = vtanh.f32 %v912_v42 }
 0xa27   :  { %2374 = vpow2.f32 %v2083_v15 }
 0xa30   :  { %v2373_v47 = vpop.eup %2372 }
 0xa31   :  { %916 = vrot.lane.b32.xlu0 %v2373_v47, %s2465_s12  ;;  %v2375_v16 = vpop.eup %2374 }
 0xa32   :  { %v802_v20 = vadd.f32 1.0, %v2375_v16 }
 0xa34   :  { %2376 = vrcp.f32 %v802_v20 }
 0xa35   :  { %809 = vrot.lane.b32.xlu0 %v2079_v55, %s2465_s12 }
 0xa39   :  { %825 = vperm.xlu0 %2320, %v2080_v63  }
 0xa3d   :  { %935 = vperm.xlu0 %2320, %v2086_v5  }
 0xa3e   :  { %v2377_v30 = vpop.eup %2376 }
 0xa3f   :  { %v819_v8 = vsub.f32 1.0, %v2377_v30  ;;  %v821_v33 = vmul.f32 %v2377_v30, %v2727_v29 }
 0xa6c   :  { %v815_v27 = vpop.permute.xlu1 %814 }
 0xa7d   :  { %v833_v34 = vpop.permute.xlu1 %832 }
 0xa7e   :  { %v835_v37 = vmul.f32 %v833_v34, %v2727_v29 }
 0xa81   :  { %v954_v45 = vpop.permute.xlu1 %953 }
 0xa82   :  { %v956_v48 = vmul.f32 %v954_v45, %v2709_v12 }
 0xaa3   :  { %v917_v19 = vpop.permute.xlu0 %916 }
 0xaa4   :  { %v919_v22 = vmul.f32 %v917_v19, %v914_v18 }
 0xaa6   :  { %v932_v23 = vadd.f32 %v931_v21, %v919_v22  ;;  %v2097_v22 = vld [vmem:[%s3080_s2 + $0x8] sm:$0x3] }
 0xaa7   :  { %v810_v24 = vpop.permute.xlu0 %809 }
 0xaa8   :  { %v811_v25 = vrot.slane %v810_v24, 2  ;;  %v945_v26 = vrot.slane %v932_v23, %v2547_v11  ;;  %v1183_v24 = vsub.f32 1.0, %v2097_v22 }
 0xaaa   :  { %v817_v28 = vadd.f32 %v815_v27, %v811_v25  ;;  %946 = vrot.lane.b32.xlu0 %v945_v26, %s2465_s12 }
 0xaac   :  { %2378 = vtanh.f32 %v817_v28 }
 0xab6   :  { %v2379_v31 = vpop.eup %2378 }
 0xab7   :  { %v820_v32 = vmul.f32 %v2379_v31, %v819_v8 }
 0xab8   :  { %v826_v36 = vpop.permute.xlu0 %825 }
 0xab9   :  { %v822_v35 = vadd.f32 %v821_v33, %v820_v32 }
 0xabb   :  { %v828_v38 = vmul.f32 %v826_v36, %v822_v35 }
 0xabc   :  { %v936_v29 = vpop.permute.xlu0 %935 }
 0xabd   :  { %v836_v39 = vadd.f32 %v835_v37, %v828_v38  ;;  %2084 = vst.msk [vmem:[%s3084_s7 + $0xa] sm:$0x3] %vm91_vm0, %v828_v38 }
 0xabf   :  { %837 = vst.msk [vmem:[#allocation3] sm:$0x3] %vm91_vm0, %v836_v39 }
 0xac6   :  { %v2773_v43 = vld [vmem:[#allocation3] sm:$0x3] }
 0xac7   :  { %v966_v44 = vpack.c.bf16 %v2773_v43, %v2773_v43 }
 0xac9   :  { %2246 = vmatmul.mubr.msk.bf16.vlgmr.msra.gmra.mrb[12].mxu1 %vm128_vm2, %v966_v44 }
 0xaca   :  { %2258 = vmatpush3.bf16.msra.mxu1 %v2568_v40  ;;  %2261 = vmatprep.mubr.msk.bf16.mxu1 %vm2461_vm1, %v2460_v0 }
 0xacb   :  { %2259 = vmatprep.subr.bf16.mxu1 %v2460_v0 }
 0xace   :  { %2260 = vmatpush3.bf16.msra.mxu1 %v2574_v41 }
 0xacf   :  { %2273 = vmatprep.subr.bf16.mxu1 %v2460_v0 }
 0xb1c   :  { %v947_v46 = vpop.permute.xlu0 %946 }
 0xb1d   :  { %v949_v49 = vmul.f32 %v947_v46, %v936_v29 }
 0xb1f   :  { %v957_v50 = vadd.f32 %v956_v48, %v949_v49  ;;  %2089 = vst.msk [vmem:[%s3081_s6 + $0x6] sm:$0x3] %vm91_vm0, %v949_v49 }
 0xb21   :  { %958 = vst.msk [vmem:[#allocation2] sm:$0x3] %vm91_vm0, %v957_v50 }
 0xb28   :  { %v2790_v51 = vld [vmem:[#allocation2] sm:$0x3] }
 0xb29   :  { %v1078_v52 = vpack.c.bf16 %v2790_v51, %v2790_v51  ;;  %v1160_v23 = vrot.slane %v2790_v51, %v2547_v11 }
 0xb2b   :  { %2254 = vmatmul.mubr.msk.bf16.vlgmr.msra.gmra.mrb[16].mxu0 %vm128_vm2, %v1078_v52 }
 0xb2c   :  { %2266 = vmatpush3.bf16.msra.mxu0 %v2511_v1  ;;  %2269 = vmatprep.mubr.msk.bf16.mxu0 %vm2461_vm1, %v2460_v0  ;;  %v2090_v1 = vld [vmem:[%s3082_s1 + $0x10] sm:$0xf] }
 0xb2d   :  { %2267 = vmatprep.subr.bf16.mxu0 %v2460_v0  ;;  %v1029_v25 = vrot.slane %v2090_v1, 2 }
 0xb30   :  { %2268 = vmatpush3.bf16.msra.mxu0 %v2526_v2 }
 0xb31   :  { %2281 = vmatprep.subr.bf16.mxu0 %v2460_v0 }
 0xb9c   :  { %v1004_v12 = vpop.f32.mrb[12].mxu1 }
 0xb9d   :  { %v1005_v53 = vadd.f32 %v2617_v9, %v1004_v12  ;;  %v2247_v54 = vpop.f32.mrb[13].mxu1 }
 0xb9e   :  { %v1007_v55 = vpop.f32.mrb[14].mxu1 }
 0xb9f   :  { %v1017_v56 = vrot.slane %v1005_v53, %v2547_v11  ;;  %v2248_v57 = vpop.f32.mrb[15].mxu1 }
 0xba1   :  { %1038 = vrot.lane.b32.xlu0 %v1017_v56, %s2466_s13  ;;  %1018 = vrot.lane.b32.xlu1 %v1017_v56, %s2465_s12 }
 0xba5   :  { %1042 = vrot.lane.b32.xlu0 %v2090_v1, %s2465_s12 }
 0xbfe   :  { %v1116_v2 = vpop.f32.mrb[16].mxu0 }
 0xbff   :  { %v1117_v58 = vadd.f32 %v2545_v10, %v1116_v2  ;;  %v2255_v59 = vpop.f32.mrb[17].mxu0  ;;  %v2091_v10 = vld [vmem:[%s3083_s3 + $0x8] sm:$0x3] }
 0xc00   :  { %v1119_v60 = vpop.f32.mrb[18].mxu0  ;;  %v1062_v21 = vsub.f32 1.0, %v2091_v10 }
 0xc01   :  { %v1136_v61 = vrot.slane %v1117_v58, %v2547_v11  ;;  %v2256_v62 = vpop.f32.mrb[19].mxu0  ;;  %v1122_v14 = vadd.f32 %v2096_v13, %v1117_v58 }
 0xc03   :  { %1137 = vrot.lane.b32.xlu1 %v1136_v61, %s2463_s30  ;;  %v2099_v15 = vmul.f32 -1.442695, %v1122_v14 }
 0xc13   :  { %v1019_v63 = vpop.permute.xlu1 %1018  ;;  %v1039_v42 = vpop.permute.xlu0 %1038 }
 0xc14   :  { %v1021_v3 = vadd.f32 %v2090_v1, %v1019_v63  ;;  %v1031_v26 = vadd.f32 %v1029_v25, %v1019_v63 }
 0xc16   :  { %v2093_v4 = vmul.f32 -1.442695, %v1021_v3  ;;  %v2094_v27 = vmul.f32 -1.442695, %v1031_v26 }
 0xc17   :  { %v1043_v30 = vpop.permute.xlu0 %1042 }
 0xc18   :  { %2380 = vpow2.f32 %v2093_v4  ;;  %v1044_v31 = vrot.slane %v1043_v30, 2  ;;  %v2101_v4 = vld [vmem:[%s3082_s1 + $0xc] sm:$0xf] }
 0xc19   :  { %v1262_v26 = vrot.slane %v2101_v4, 2 }
 0xc22   :  { %v2381_v5 = vpop.eup %2380 }
 0xc23   :  { %v1025_v6 = vadd.f32 1.0, %v2381_v5 }
 0xc25   :  { %2382 = vrcp.f32 %v1025_v6 }
 0xc26   :  { %2384 = vpow2.f32 %v2099_v15 }
 0xc2f   :  { %v2383_v7 = vpop.eup %2382 }
 0xc30   :  { %v1041_v47 = vmul.f32 %v2383_v7, %v1039_v42  ;;  %v2385_v16 = vpop.eup %2384  ;;  %v2102_v7 = vld [vmem:[%s3083_s3 + $0x6] sm:$0x3] }
 0xc31   :  { %v1126_v17 = vadd.f32 1.0, %v2385_v16 }
 0xc32   :  { %1047 = vrot.lane.b32.xlu1 %v1041_v47, %s2466_s13  ;;  %v2872_v47 = vld [vmem:[%s3077_s4] sm:$0xff]  }
 0xc33   :  { %2386 = vrcp.f32 %v1126_v17 }
 0xc34   :  { %2388 = vpow2.f32 %v2094_v27 }
 0xc36   :  { %1058 = vperm.xlu1 %2321, %v2091_v10   ;;  %v2881_v10 = vld [vmem:[%s3077_s4 + $0x8] sm:$0xff]  }
 0xc3d   :  { %v2387_v18 = vpop.eup %2386 }
 0xc3e   :  { %v2389_v28 = vpop.eup %2388  ;;  %v1147_v54 = vsub.f32 1.0, %v2387_v18 }
 0xc3f   :  { %v1035_v8 = vadd.f32 1.0, %v2389_v28 }
 0xc41   :  { %2390 = vrcp.f32 %v1035_v8 }
 0xc4b   :  { %v2391_v34 = vpop.eup %2390 }
 0xc4c   :  { %v1052_v35 = vsub.f32 1.0, %v2391_v34  ;;  %v1054_v38 = vmul.f32 %v2391_v34, %v2773_v43 }
 0xc75   :  { %v1138_v19 = vpop.permute.xlu1 %1137 }
 0xc76   :  { %v1140_v20 = vmul.f32 %v2387_v18, %v1138_v19 }
 0xc78   :  { %1142 = vrot.lane.b32.xlu0 %v1140_v20, %s2463_s30 }
 0xc7c   :  { %1065 = vperm.xlu0 %2320, %v1062_v21   ;;  %v1295_v21 = vsub.f32 1.0, %v2102_v7 }
 0xc80   :  { %1161 = vrot.lane.b32.xlu0 %v1160_v23, %s2466_s13  ;;  %v2889_v23 = vld [vmem:[%s3078_s5] ss:$0 sm:$0xff] }
 0xc84   :  { %1186 = vperm.xlu0 %2320, %v1183_v24  }
 0xca4   :  { %v1048_v32 = vpop.permute.xlu1 %1047 }
 0xca5   :  { %v1050_v33 = vadd.f32 %v1048_v32, %v1044_v31 }
 0xca7   :  { %2392 = vtanh.f32 %v1050_v33 }
 0xcb1   :  { %v2393_v36 = vpop.eup %2392 }
 0xcb2   :  { %v1053_v37 = vmul.f32 %v2393_v36, %v1052_v35 }
 0xcb4   :  { %v1055_v39 = vadd.f32 %v1054_v38, %v1053_v37 }
 0xcb5   :  { %v1059_v44 = vpop.permute.xlu1 %1058 }
 0xcb6   :  { %v1061_v29 = vmul.f32 %v1059_v44, %v1055_v39 }
 0xcb8   :  { %2095 = vst.msk [vmem:[%s3084_s7 + $0x8] sm:$0x3] %vm91_vm0, %v1061_v29 }
 0xcea   :  { %v1143_v45 = vpop.permute.xlu0 %1142 }
 0xceb   :  { %v1145_v46 = vadd.f32 %v2096_v13, %v1143_v45 }
 0xced   :  { %2394 = vtanh.f32 %v1145_v46 }
 0xcf7   :  { %v2395_v48 = vpop.eup %2394 }
 0xcf8   :  { %1149 = vrot.lane.b32.xlu1 %v2395_v48, %s2465_s12 }
 0xcfb   :  { %v1066_v49 = vpop.permute.xlu0 %1065 }
 0xcfc   :  { %v1068_v50 = vmul.f32 %v1066_v49, %v2773_v43  ;;  %1168 = vperm.xlu1 %2321, %v2097_v22  }
 0xcfe   :  { %v1069_v52 = vadd.f32 %v1068_v50, %v1061_v29 }
 0xcff   :  { %v1162_v43 = vpop.permute.xlu0 %1161 }
 0xd00   :  { %1070 = vst.msk [vmem:[#allocation3] sm:$0x3] %vm91_vm0, %v1069_v52  ;;  %v1164_v56 = vmul.f32 %v2387_v18, %v1162_v43 }
 0xd03   :  { %v1187_v63 = vpop.permute.xlu0 %1186 }
 0xd04   :  { %v1189_v5 = vmul.f32 %v1187_v63, %v2790_v51 }
 0xd07   :  { %v2834_v12 = vld [vmem:[#allocation3] sm:$0x3] }
 0xd08   :  { %v1199_v53 = vpack.c.bf16 %v2834_v12, %v2834_v12 }
 0xd0a   :  { %2262 = vmatmul.mubr.msk.bf16.vlgmr.msra.gmra.mrb[16].mxu1 %vm128_vm2, %v1199_v53 }
 0xd0b   :  { %2274 = vmatpush3.bf16.msra.mxu1 %v2568_v40  ;;  %2277 = vmatprep.mubr.msk.bf16.mxu1 %vm2461_vm1, %v2460_v0 }
 0xd0c   :  { %2275 = vmatprep.subr.bf16.mxu1 %v2460_v0 }
 0xd0f   :  { %2276 = vmatpush3.bf16.msra.mxu1 %v2574_v41 }
 0xd10   :  { %2289 = vmatprep.subr.bf16.mxu1 %v2460_v0 }
 0xd6a   :  { %v1150_v55 = vpop.permute.xlu1 %1149 }
 0xd6b   :  { %v1152_v57 = vmul.f32 %v1150_v55, %v1147_v54  ;;  %v2909_v55 = vld [vmem:[%s3077_s4 + $0x10] sm:$0xff]  }
 0xd6d   :  { %v1165_v1 = vadd.f32 %v1164_v56, %v1152_v57  ;;  %v2107_v56 = vld [vmem:[%s3079_s0 + $0x14] sm:$0x3] }
 0xd6f   :  { %v1178_v2 = vrot.slane %v1165_v1, %v2547_v11 }
 0xd71   :  { %1179 = vrot.lane.b32.xlu1 %v1178_v2, %s2465_s12 }
 0xd7b   :  { %v1169_v60 = vpop.permute.xlu1 %1168 }
 0xddd   :  { %v1237_v40 = vpop.f32.mrb[16].mxu1 }
 0xdde   :  { %v1238_v58 = vadd.f32 %v2617_v9, %v1237_v40  ;;  %v2263_v59 = vpop.f32.mrb[17].mxu1 }
 0xddf   :  { %v1240_v61 = vpop.f32.mrb[18].mxu1 }
 0xde0   :  { %v1250_v41 = vrot.slane %v1238_v58, %v2547_v11  ;;  %v2264_v62 = vpop.f32.mrb[19].mxu1  ;;  %v2108_v61 = vld [vmem:[%s3080_s2 + $0xa] sm:$0x3] }
 0xde1   :  { %v1416_v62 = vsub.f32 1.0, %v2108_v61 }
 0xde2   :  { %1251 = vrot.lane.b32.xlu0 %v1250_v41, %s2465_s12  ;;  %1271 = vrot.lane.b32.xlu1 %v1250_v41, %s2466_s13 }
 0xde3   :  { %v1180_v3 = vpop.permute.xlu1 %1179 }
 0xde4   :  { %v1182_v6 = vmul.f32 %v1180_v3, %v1169_v60 }
 0xde6   :  { %v1190_v9 = vadd.f32 %v1189_v5, %v1182_v6  ;;  %2100 = vst.msk [vmem:[%s3081_s6 + $0x8] sm:$0x3] %vm91_vm0, %v1182_v6  ;;  %1275 = vrot.lane.b32.xlu0 %v2101_v4, %s2465_s12  ;;  %v2936_v6 = vld [vmem:[%s3078_s5 + $0x1] ss:$0 sm:$0xff] }
 0xde8   :  { %1191 = vst.msk [vmem:[#allocation2] sm:$0x3] %vm91_vm0, %v1190_v9 }
 0xdea   :  { %1291 = vperm.xlu0 %2320, %v2102_v7  }
 0xdef   :  { %v2864_v42 = vld [vmem:[#allocation2] sm:$0x3] }
 0xdf0   :  { %v1311_v51 = vpack.c.bf16 %v2864_v42, %v2864_v42  ;;  %v1393_v41 = vrot.slane %v2864_v42, %v2547_v11 }
 0xdf2   :  { %2270 = vmatmul.mubr.msk.bf16.vlgmr.msra.gmra.mrb[20].mxu0 %vm128_vm2, %v1311_v51 }
 0xdf3   :  { %2282 = vmatpush3.bf16.msra.mxu0 %v2872_v47  ;;  %2285 = vmatprep.mubr.msk.bf16.mxu0 %vm2461_vm1, %v2460_v0 }
 0xdf4   :  { %2283 = vmatprep.subr.bf16.mxu0 %v2460_v0 }
 0xdf7   :  { %2284 = vmatpush3.bf16.msra.mxu0 %v2881_v10 }
 0xdf8   :  { %2297 = vmatprep.subr.bf16.mxu0 %v2460_v0 }
 0xe54   :  { %v1252_v13 = vpop.permute.xlu0 %1251  ;;  %v1272_v19 = vpop.permute.xlu1 %1271 }
 0xe55   :  { %v1254_v14 = vadd.f32 %v2101_v4, %v1252_v13  ;;  %v1264_v8 = vadd.f32 %v1262_v26, %v1252_v13 }
 0xe57   :  { %v2104_v15 = vmul.f32 -1.442695, %v1254_v14  ;;  %v2105_v31 = vmul.f32 -1.442695, %v1264_v8 }
 0xe58   :  { %v1276_v34 = vpop.permute.xlu0 %1275 }
 0xe59   :  { %2396 = vpow2.f32 %v2104_v15  ;;  %v1277_v35 = vrot.slane %v1276_v34, 2  ;;  %v2112_v15 = vld [vmem:[%s3082_s1 + $0x8] sm:$0xf] }
 0xe63   :  { %v2397_v16 = vpop.eup %2396 }
 0xe64   :  { %v1258_v17 = vadd.f32 1.0, %v2397_v16  ;;  %v2113_v16 = vld [vmem:[%s3083_s3 + $0x4] sm:$0x3] }
 0xe66   :  { %2398 = vrcp.f32 %v1258_v17 }
 0xe67   :  { %2400 = vpow2.f32 %v2105_v31 }
 0xe69   :  { %v1292_v48 = vpop.permute.xlu0 %1291 }
 0xe70   :  { %v2399_v18 = vpop.eup %2398 }
 0xe71   :  { %v1274_v20 = vmul.f32 %v2399_v18, %v1272_v19  ;;  %v2401_v32 = vpop.eup %2400 }
 0xe72   :  { %v1268_v33 = vadd.f32 1.0, %v2401_v32 }
 0xe73   :  { %1280 = vrot.lane.b32.xlu1 %v1274_v20, %s2466_s13 }
 0xe74   :  { %2402 = vrcp.f32 %v1268_v33 }
 0xe77   :  { %1298 = vperm.xlu1 %2321, %v1295_v21  }
 0xe7e   :  { %v2403_v38 = vpop.eup %2402 }
 0xe7f   :  { %v1285_v39 = vsub.f32 1.0, %v2403_v38  ;;  %v1287_v29 = vmul.f32 %v2403_v38, %v2834_v12 }
 0xec5   :  { %v1349_v22 = vpop.f32.mrb[20].mxu0 }
 0xec6   :  { %v1350_v24 = vadd.f32 %v2889_v23, %v1349_v22  ;;  %v2271_v25 = vpop.f32.mrb[21].mxu0 }
 0xec7   :  { %v1352_v27 = vpop.f32.mrb[22].mxu0 }
 0xec8   :  { %v1369_v28 = vrot.slane %v1350_v24, %v2547_v11  ;;  %v2272_v30 = vpop.f32.mrb[23].mxu0  ;;  %v1355_v57 = vadd.f32 %v2107_v56, %v1350_v24 }
 0xeca   :  { %1370 = vrot.lane.b32.xlu0 %v1369_v28, %s2463_s30  ;;  %v2110_v1 = vmul.f32 -1.442695, %v1355_v57 }
 0xee5   :  { %v1281_v36 = vpop.permute.xlu1 %1280 }
 0xee6   :  { %v1283_v37 = vadd.f32 %v1281_v36, %v1277_v35 }
 0xee8   :  { %2404 = vtanh.f32 %v1283_v37 }
 0xee9   :  { %2406 = vpow2.f32 %v2110_v1 }
 0xef2   :  { %v2405_v44 = vpop.eup %2404 }
 0xef3   :  { %v1286_v45 = vmul.f32 %v2405_v44, %v1285_v39  ;;  %v2407_v2 = vpop.eup %2406  ;;  %v1528_v39 = vsub.f32 1.0, %v2113_v16 }
 0xef4   :  { %v1359_v40 = vadd.f32 1.0, %v2407_v2 }
 0xef5   :  { %v1288_v46 = vadd.f32 %v1287_v29, %v1286_v45  ;;  %v1495_v29 = vrot.slane %v2112_v15, 2 }
 0xef6   :  { %v1299_v49 = vpop.permute.xlu1 %1298  ;;  %2408 = vrcp.f32 %v1359_v40 }
 0xef7   :  { %v1294_v50 = vmul.f32 %v1292_v48, %v1288_v46  ;;  %v1301_v52 = vmul.f32 %v1299_v49, %v2834_v12  ;;  %v2918_v12 = vld [vmem:[%s3077_s4 + $0x18] sm:$0xff]  }
 0xef9   :  { %v1302_v53 = vadd.f32 %v1301_v52, %v1294_v50  ;;  %2106 = vst.msk [vmem:[%s3084_s7 + $0x6] sm:$0x3] %vm91_vm0, %v1294_v50 }
 0xefb   :  { %1303 = vst.msk [vmem:[#allocation3] sm:$0x3] %vm91_vm0, %v1302_v53 }
 0xf00   :  { %v2409_v58 = vpop.eup %2408 }
 0xf01   :  { %v1380_v18 = vsub.f32 1.0, %v2409_v58 }
 0xf02   :  { %v2901_v43 = vld [vmem:[#allocation3] sm:$0x3] }
 0xf03   :  { %v1432_v54 = vpack.c.bf16 %v2901_v43, %v2901_v43 }
 0xf05   :  { %2278 = vmatmul.mubr.msk.bf16.vlgmr.msra.gmra.mrb[20].mxu1 %vm128_vm2, %v1432_v54 }
 0xf06   :  { %2290 = vmatpush3.bf16.msra.mxu1 %v2909_v55  ;;  %2293 = vmatprep.mubr.msk.bf16.mxu1 %vm2461_vm1, %v2460_v0 }
 0xf07   :  { %2291 = vmatprep.subr.bf16.mxu1 %v2460_v0 }
 0xf0a   :  { %2292 = vmatpush3.bf16.msra.mxu1 %v2918_v12 }
 0xf0b   :  { %2305 = vmatprep.subr.bf16.mxu1 %v2460_v0 }
 0xf3c   :  { %v1371_v59 = vpop.permute.xlu0 %1370 }
 0xf3d   :  { %v1373_v60 = vmul.f32 %v2409_v58, %v1371_v59 }
 0xf3f   :  { %1375 = vrot.lane.b32.xlu1 %v1373_v60, %s2463_s30 }
 0xf43   :  { %1394 = vrot.lane.b32.xlu1 %v1393_v41, %s2466_s13 }
 0xf47   :  { %1419 = vperm.xlu1 %2321, %v1416_v62  }
 0xfb1   :  { %v1376_v63 = vpop.permute.xlu1 %1375 }
 0xfb2   :  { %v1378_v3 = vadd.f32 %v2107_v56, %v1376_v63 }
 0xfb4   :  { %2410 = vtanh.f32 %v1378_v3 }
 0xfb5   :  { %v1395_v17 = vpop.permute.xlu1 %1394 }
 0xfb6   :  { %v1397_v20 = vmul.f32 %v2409_v58, %v1395_v17  ;;  %v2119_v17 = vld [vmem:[%s3080_s2 + $0xc] sm:$0x3] }
 0xfbe   :  { %v2411_v4 = vpop.eup %2410 }
 0xfbf   :  { %1382 = vrot.lane.b32.xlu0 %v2411_v4, %s2465_s12 }
 0xfc3   :  { %1401 = vperm.xlu0 %2320, %v2108_v61  }
 0xfc6   :  { %v1420_v25 = vpop.permute.xlu1 %1419 }
 0xfc7   :  { %v1422_v33 = vmul.f32 %v1420_v25, %v2864_v42 }
 0xfd8   :  { %v1470_v5 = vpop.f32.mrb[20].mxu1 }
 0xfd9   :  { %v1471_v9 = vadd.f32 %v2936_v6, %v1470_v5  ;;  %v2279_v7 = vpop.f32.mrb[21].mxu1 }
 0xfda   :  { %v1473_v51 = vpop.f32.mrb[22].mxu1 }
 0xfdb   :  { %v1483_v13 = vrot.slane %v1471_v9, %v2547_v11  ;;  %v2280_v14 = vpop.f32.mrb[23].mxu1 }
 0xfdd   :  { %1484 = vrot.lane.b32.xlu1 %v1483_v13, %s2465_s12 }
 0xfe1   :  { %1508 = vrot.lane.b32.xlu1 %v2112_v15, %s2465_s12 }
 0xfe5   :  { %1524 = vperm.xlu1 %2321, %v2113_v16  }
0x1031   :  { %v1383_v19 = vpop.permute.xlu0 %1382 }
0x1032   :  { %v1385_v21 = vmul.f32 %v1383_v19, %v1380_v18 }
0x1034   :  { %v1398_v22 = vadd.f32 %v1397_v20, %v1385_v21 }
0x1036   :  { %v1411_v24 = vrot.slane %v1398_v22, %v2547_v11 }
0x1038   :  { %1412 = vrot.lane.b32.xlu0 %v1411_v24, %s2465_s12 }
0x103c   :  { %1504 = vrot.lane.b32.xlu0 %v1483_v13, %s2466_s13 }
0x1042   :  { %v1402_v31 = vpop.permute.xlu0 %1401 }
0x104f   :  { %v1485_v26 = vpop.permute.xlu1 %1484 }
0x1050   :  { %v1487_v27 = vadd.f32 %v2112_v15, %v1485_v26  ;;  %v1497_v45 = vadd.f32 %v1495_v29, %v1485_v26 }
0x1052   :  { %v2115_v28 = vmul.f32 -1.442695, %v1487_v27  ;;  %v2116_v46 = vmul.f32 -1.442695, %v1497_v45 }
0x1053   :  { %v1509_v50 = vpop.permute.xlu1 %1508 }
0x1054   :  { %2412 = vpow2.f32 %v2115_v28  ;;  %v1510_v52 = vrot.slane %v1509_v50, 2  ;;  %v1649_v28 = vsub.f32 1.0, %v2119_v17 }
0x105e   :  { %v2413_v30 = vpop.eup %2412 }
0x105f   :  { %v1491_v8 = vadd.f32 1.0, %v2413_v30 }
0x1061   :  { %2414 = vrcp.f32 %v1491_v8 }
0x1062   :  { %2416 = vpow2.f32 %v2116_v46 }
0x106b   :  { %v2415_v36 = vpop.eup %2414 }
0x106c   :  { %v2417_v48 = vpop.eup %2416 }
0x106d   :  { %v1501_v49 = vadd.f32 1.0, %v2417_v48 }
0x106f   :  { %2418 = vrcp.f32 %v1501_v49 }
0x10aa   :  { %v1413_v32 = vpop.permute.xlu0 %1412 }
0x10ab   :  { %v1415_v34 = vmul.f32 %v1413_v32, %v1402_v31 }
0x10ad   :  { %v1423_v35 = vadd.f32 %v1422_v33, %v1415_v34  ;;  %2111 = vst.msk [vmem:[%s3081_s6 + $0xa] sm:$0x3] %vm91_vm0, %v1415_v34 }
0x10ae   :  { %v1505_v37 = vpop.permute.xlu0 %1504 }
0x10af   :  { %1424 = vst.msk [vmem:[#allocation2] sm:$0x3] %vm91_vm0, %v1423_v35  ;;  %v1507_v38 = vmul.f32 %v2415_v36, %v1505_v37  ;;  %v2123_v35 = vld [vmem:[%s3082_s1 + $0x4] sm:$0xf] }
0x10b1   :  { %1513 = vrot.lane.b32.xlu0 %v1507_v38, %s2466_s13 }
0x10b5   :  { %1531 = vperm.xlu0 %2320, %v1528_v39  }
0x10b6   :  { %v2958_v44 = vld [vmem:[#allocation2] sm:$0x3] }
0x10b7   :  { %v1544_v42 = vpack.c.bf16 %v2958_v44, %v2958_v44  ;;  %v1626_v16 = vrot.slane %v2958_v44, %v2547_v11 }
0x10b9   :  { %2286 = vmatmul.mubr.msk.bf16.vlgmr.msra.gmra.mrb[24].mxu0 %vm128_vm2, %v1544_v42  ;;  %v2124_v42 = vld [vmem:[%s3083_s3 + $0x2] sm:$0x3] }
0x10ba   :  { %2298 = vmatpush3.bf16.msra.mxu0 %v2872_v47  ;;  %2301 = vmatprep.mubr.msk.bf16.mxu0 %vm2461_vm1, %v2460_v0  ;;  %v2419_v47 = vpop.eup %2418 }
0x10bb   :  { %2299 = vmatprep.subr.bf16.mxu0 %v2460_v0  ;;  %v1518_v56 = vsub.f32 1.0, %v2419_v47  ;;  %v1520_v1 = vmul.f32 %v2419_v47, %v2901_v43 }
0x10be   :  { %2300 = vmatpush3.bf16.msra.mxu0 %v2881_v10  ;;  %v1525_v10 = vpop.permute.xlu1 %1524 }
0x1123   :  { %v1514_v53 = vpop.permute.xlu0 %1513 }
0x1124   :  { %v1516_v54 = vadd.f32 %v1514_v53, %v1510_v52  ;;  %v1761_v52 = vsub.f32 1.0, %v2124_v42 }
0x1126   :  { %2420 = vtanh.f32 %v1516_v54  ;;  %v1728_v54 = vrot.slane %v2123_v35, 2 }
0x1130   :  { %v2421_v57 = vpop.eup %2420 }
0x1131   :  { %v1519_v2 = vmul.f32 %v2421_v57, %v1518_v56 }
0x1133   :  { %v1521_v40 = vadd.f32 %v1520_v1, %v1519_v2 }
0x1134   :  { %v1532_v58 = vpop.permute.xlu0 %1531 }
0x1135   :  { %v1527_v59 = vmul.f32 %v1525_v10, %v1521_v40  ;;  %v1534_v60 = vmul.f32 %v1532_v58, %v2901_v43 }
0x1137   :  { %v1535_v61 = vadd.f32 %v1534_v60, %v1527_v59  ;;  %2117 = vst.msk [vmem:[%s3084_s7 + $0x4] sm:$0x3] %vm91_vm0, %v1527_v59 }
0x1139   :  { %1536 = vst.msk [vmem:[#allocation3] sm:$0x3] %vm91_vm0, %v1535_v61 }
0x1140   :  { %v2975_v41 = vld [vmem:[#allocation3] sm:$0x3] }
0x1141   :  { %v1665_v62 = vpack.c.bf16 %v2975_v41, %v2975_v41 }
0x1143   :  { %2294 = vmatmul.mubr.msk.bf16.vlgmr.msra.gmra.mrb[24].mxu1 %vm128_vm2, %v1665_v62 }
0x1144   :  { %2306 = vmatpush3.bf16.msra.mxu1 %v2909_v55  ;;  %2309 = vmatprep.mubr.msk.bf16.mxu1 %vm2461_vm1, %v2460_v0  ;;  %v2118_v55 = vld [vmem:[%s3079_s0 + $0x18] sm:$0x3] }
0x1145   :  { %2307 = vmatprep.subr.bf16.mxu1 %v2460_v0 }
0x1148   :  { %2308 = vmatpush3.bf16.msra.mxu1 %v2918_v12 }
0x118c   :  { %v1582_v43 = vpop.f32.mrb[24].mxu0 }
0x118d   :  { %v1583_v63 = vadd.f32 %v2889_v23, %v1582_v43  ;;  %v2287_v3 = vpop.f32.mrb[25].mxu0 }
0x118e   :  { %v1585_v4 = vpop.f32.mrb[26].mxu0 }
0x118f   :  { %v1602_v5 = vrot.slane %v1583_v63, %v2547_v11  ;;  %v2288_v9 = vpop.f32.mrb[27].mxu0  ;;  %v1588_v7 = vadd.f32 %v2118_v55, %v1583_v63 }
0x1191   :  { %1603 = vrot.lane.b32.xlu1 %v1602_v5, %s2463_s30  ;;  %v2121_v51 = vmul.f32 -1.442695, %v1588_v7 }
0x1193   :  { %2422 = vpow2.f32 %v2121_v51 }
0x119d   :  { %v2423_v0 = vpop.eup %2422 }
0x119e   :  { %v1592_v13 = vadd.f32 1.0, %v2423_v0 }
0x11a0   :  { %2424 = vrcp.f32 %v1592_v13 }
0x11aa   :  { %v2425_v12 = vpop.eup %2424 }
0x11ab   :  { %v1613_v8 = vsub.f32 1.0, %v2425_v12 }
0x1203   :  { %v1604_v14 = vpop.permute.xlu1 %1603 }
0x1204   :  { %v1606_v15 = vmul.f32 %v2425_v12, %v1604_v14 }
0x1206   :  { %1608 = vrot.lane.b32.xlu0 %v1606_v15, %s2463_s30 }
0x120a   :  { %1627 = vrot.lane.b32.xlu0 %v1626_v16, %s2466_s13 }
0x120e   :  { %1634 = vperm.xlu0 %2320, %v2119_v17  }
0x1216   :  { %v1703_v18 = vpop.f32.mrb[24].mxu1 }
0x1217   :  { %v2295_v19 = vpop.f32.mrb[25].mxu1  ;;  %v1704_v25 = vadd.f32 %v2936_v6, %v1703_v18 }
0x1218   :  { %v1706_v20 = vpop.f32.mrb[26].mxu1 }
0x1219   :  { %v2296_v21 = vpop.f32.mrb[27].mxu1  ;;  %v1716_v27 = vrot.slane %v1704_v25, %v2547_v11 }
0x1278   :  { %v1609_v22 = vpop.permute.xlu0 %1608 }
0x1279   :  { %v1611_v24 = vadd.f32 %v2118_v55, %v1609_v22 }
0x127b   :  { %2426 = vtanh.f32 %v1611_v24 }
0x127c   :  { %v1628_v30 = vpop.permute.xlu0 %1627 }
0x127d   :  { %v1630_v32 = vmul.f32 %v2425_v12, %v1628_v30 }
0x1285   :  { %v2427_v26 = vpop.eup %2426 }
0x1286   :  { %1615 = vrot.lane.b32.xlu1 %v2427_v26, %s2465_s12 }
0x128a   :  { %1717 = vrot.lane.b32.xlu1 %v1716_v27, %s2465_s12 }
0x128d   :  { %v1635_v53 = vpop.permute.xlu0 %1634 }
0x128e   :  { %1652 = vperm.xlu1 %2321, %v1649_v28  }
0x1292   :  { %1737 = vrot.lane.b32.xlu1 %v1716_v27, %s2466_s13 }
0x12f8   :  { %v1616_v31 = vpop.permute.xlu1 %1615 }
0x12f9   :  { %v1618_v33 = vmul.f32 %v1616_v31, %v1613_v8 }
0x12fb   :  { %v1631_v34 = vadd.f32 %v1630_v32, %v1618_v33 }
0x12fc   :  { %v1718_v36 = vpop.permute.xlu1 %1717 }
0x12fd   :  { %v1720_v37 = vadd.f32 %v2123_v35, %v1718_v36  ;;  %v1644_v38 = vrot.slane %v1631_v34, %v2547_v11  ;;  %v1730_v1 = vadd.f32 %v1728_v54, %v1718_v36  ;;  %v1893_v36 = vld [vmem:[%s3082_s1] sm:$0xf] }
0x12ff   :  { %v2126_v39 = vmul.f32 -1.442695, %v1720_v37  ;;  %1645 = vrot.lane.b32.xlu0 %v1644_v38, %s2465_s12  ;;  %v2127_v40 = vmul.f32 -1.442695, %v1730_v1 }
0x1301   :  { %2428 = vpow2.f32 %v2126_v39 }
0x1303   :  { %1741 = vrot.lane.b32.xlu0 %v2123_v35, %s2465_s12 }
0x1307   :  { %1757 = vperm.xlu0 %2320, %v2124_v42  }
0x130b   :  { %v2429_v29 = vpop.eup %2428 }
0x130c   :  { %v1724_v45 = vadd.f32 1.0, %v2429_v29 }
0x130d   :  { %v1653_v46 = vpop.permute.xlu1 %1652 }
0x130e   :  { %2430 = vrcp.f32 %v1724_v45  ;;  %v1655_v56 = vmul.f32 %v1653_v46, %v2958_v44 }
0x130f   :  { %2432 = vpow2.f32 %v2127_v40 }
0x1311   :  { %v1738_v49 = vpop.permute.xlu1 %1737 }
0x1318   :  { %v2431_v48 = vpop.eup %2430 }
0x1319   :  { %v1740_v50 = vmul.f32 %v2431_v48, %v1738_v49  ;;  %v2433_v44 = vpop.eup %2432  ;;  %v2130_v49 = vld [vmem:[%s3080_s2 + $0xe] sm:$0x3] }
0x131a   :  { %v1734_v59 = vadd.f32 1.0, %v2433_v44 }
0x131b   :  { %1746 = vrot.lane.b32.xlu1 %v1740_v50, %s2466_s13 }
0x131c   :  { %2434 = vrcp.f32 %v1734_v59 }
0x131f   :  { %1764 = vperm.xlu1 %2321, %v1761_v52   ;;  %v1882_v52 = vsub.f32 1.0, %v2130_v49 }
0x1326   :  { %v2435_v63 = vpop.eup %2434 }
0x1327   :  { %v1751_v3 = vsub.f32 1.0, %v2435_v63  ;;  %v1753_v5 = vmul.f32 %v2435_v63, %v2975_v41 }
0x1371   :  { %v1646_v47 = vpop.permute.xlu0 %1645 }
0x1372   :  { %v1648_v57 = vmul.f32 %v1646_v47, %v1635_v53  ;;  %v1894_v53 = vld [vmem:[%s3083_s3] sm:$0x3] }
0x1373   :  { %v1992_v54 = vsub.f32 1.0, %v1894_v53 }
0x1374   :  { %v1656_v2 = vadd.f32 %v1655_v56, %v1648_v57  ;;  %2122 = vst.msk [vmem:[%s3081_s6 + $0xc] sm:$0x3] %vm91_vm0, %v1648_v57  ;;  %v1959_v56 = vrot.slane %v1893_v36, 2 }
0x1375   :  { %v1742_v60 = vpop.permute.xlu0 %1741 }
0x1376   :  { %1657 = vst.msk [vmem:[#allocation2] sm:$0x3] %vm91_vm0, %v1656_v2  ;;  %v1743_v61 = vrot.slane %v1742_v60, 2 }
0x137d   :  { %v3019_v10 = vld [vmem:[#allocation2] sm:$0x3] }
0x137e   :  { %v1777_v58 = vpack.c.bf16 %v3019_v10, %v3019_v10  ;;  %v1859_v34 = vrot.slane %v3019_v10, %v2547_v11 }
0x1380   :  { %2302 = vmatmul.mubr.msk.bf16.vlgmr.msra.gmra.mrb[28].mxu0 %vm128_vm2, %v1777_v58 }
0x1386   :  { %v1758_v7 = vpop.permute.xlu0 %1757 }
0x138d   :  { %v1747_v62 = vpop.permute.xlu1 %1746 }
0x138e   :  { %v1749_v43 = vadd.f32 %v1747_v62, %v1743_v61 }
0x1390   :  { %2436 = vtanh.f32 %v1749_v43 }
0x139a   :  { %v2437_v4 = vpop.eup %2436 }
0x139b   :  { %v1752_v9 = vmul.f32 %v2437_v4, %v1751_v3 }
0x139d   :  { %v1754_v55 = vadd.f32 %v1753_v5, %v1752_v9 }
0x139e   :  { %v1765_v51 = vpop.permute.xlu1 %1764 }
0x139f   :  { %v1760_v0 = vmul.f32 %v1758_v7, %v1754_v55  ;;  %v1767_v13 = vmul.f32 %v1765_v51, %v2975_v41 }
0x13a1   :  { %v1768_v12 = vadd.f32 %v1767_v13, %v1760_v0  ;;  %2128 = vst.msk [vmem:[%s3084_s7 + $0x2] sm:$0x3] %vm91_vm0, %v1760_v0 }
0x13a3   :  { %1769 = vst.msk [vmem:[#allocation3] sm:$0x3] %vm91_vm0, %v1768_v12 }
0x13aa   :  { %v3031_v14 = vld [vmem:[#allocation3] sm:$0x3] }
0x13ab   :  { %v1896_v15 = vpack.c.bf16 %v3031_v14, %v3031_v14 }
0x13ad   :  { %2310 = vmatmul.mubr.msk.bf16.vlgmr.msra.gmra.mrb[28].mxu1 %vm128_vm2, %v1896_v15 }
0x1453   :  { %v1815_v16 = vpop.f32.mrb[28].mxu0 }
0x1454   :  { %v1816_v17 = vadd.f32 %v2889_v23, %v1815_v16  ;;  %v2303_v18 = vpop.f32.mrb[29].mxu0  ;;  %v2129_v23 = vld [vmem:[%s3079_s0 + $0x1c] sm:$0x3] }
0x1455   :  { %v1818_v41 = vpop.f32.mrb[30].mxu0 }
0x1456   :  { %v1835_v19 = vrot.slane %v1816_v17, %v2547_v11  ;;  %v2304_v20 = vpop.f32.mrb[31].mxu0  ;;  %v1821_v28 = vadd.f32 %v2129_v23, %v1816_v17 }
0x1458   :  { %1836 = vrot.lane.b32.xlu0 %v1835_v19, %s2463_s30  ;;  %v2132_v30 = vmul.f32 -1.442695, %v1821_v28 }
0x145a   :  { %2438 = vpow2.f32 %v2132_v30 }
0x1464   :  { %v2439_v8 = vpop.eup %2438 }
0x1465   :  { %v1825_v31 = vadd.f32 1.0, %v2439_v8 }
0x1467   :  { %2440 = vrcp.f32 %v1825_v31 }
0x1471   :  { %v2441_v32 = vpop.eup %2440 }
0x1472   :  { %v1846_v58 = vsub.f32 1.0, %v2441_v32 }
0x1480   :  { %v1934_v21 = vpop.f32.mrb[28].mxu1 }
0x1481   :  { %v1935_v22 = vadd.f32 %v2936_v6, %v1934_v21  ;;  %v2311_v24 = vpop.f32.mrb[29].mxu1 }
0x1482   :  { %v1937_v25 = vpop.f32.mrb[30].mxu1 }
0x1483   :  { %v1947_v26 = vrot.slane %v1935_v22, %v2547_v11  ;;  %v2312_v27 = vpop.f32.mrb[31].mxu1 }
0x1485   :  { %1948 = vrot.lane.b32.xlu0 %v1947_v26, %s2465_s12 }
0x14ca   :  { %v1837_v33 = vpop.permute.xlu0 %1836 }
0x14cb   :  { %v1839_v6 = vmul.f32 %v2441_v32, %v1837_v33 }
0x14cd   :  { %1841 = vrot.lane.b32.xlu1 %v1839_v6, %s2463_s30 }
0x14d1   :  { %1968 = vrot.lane.b32.xlu1 %v1947_v26, %s2466_s13 }
0x14d5   :  { %1860 = vrot.lane.b32.xlu1 %v1859_v34, %s2466_s13 }
0x14f7   :  { %v1949_v35 = vpop.permute.xlu0 %1948 }
0x14f8   :  { %v1951_v37 = vadd.f32 %v1949_v35, %v1893_v36  ;;  %v1961_v57 = vadd.f32 %v1959_v56, %v1949_v35 }
0x14fa   :  { %v2135_v38 = vmul.f32 -1.442695, %v1951_v37  ;;  %v2136_v1 = vmul.f32 -1.442695, %v1961_v57 }
0x14fc   :  { %2442 = vpow2.f32 %v2135_v38 }
0x1506   :  { %v2443_v39 = vpop.eup %2442 }
0x1507   :  { %v1955_v42 = vadd.f32 1.0, %v2443_v39 }
0x1509   :  { %2444 = vrcp.f32 %v1955_v42 }
0x1513   :  { %v2445_v46 = vpop.eup %2444 }
0x153f   :  { %v1842_v29 = vpop.permute.xlu1 %1841 }
0x1540   :  { %v1844_v45 = vadd.f32 %v2129_v23, %v1842_v29 }
0x1542   :  { %2446 = vtanh.f32 %v1844_v45 }
0x1543   :  { %v1969_v48 = vpop.permute.xlu1 %1968  ;;  %2448 = vpow2.f32 %v2136_v1 }
0x1544   :  { %v1971_v50 = vmul.f32 %v2445_v46, %v1969_v48 }
0x1546   :  { %1977 = vrot.lane.b32.xlu1 %v1971_v50, %s2466_s13 }
0x1547   :  { %v1861_v40 = vpop.permute.xlu1 %1860 }
0x1548   :  { %v1863_v60 = vmul.f32 %v2441_v32, %v1861_v40 }
0x154a   :  { %1885 = vperm.xlu1 %2321, %v1882_v52  }
0x154c   :  { %v2447_v47 = vpop.eup %2446 }
0x154d   :  { %1848 = vrot.lane.b32.xlu0 %v2447_v47, %s2465_s12  ;;  %v2449_v2 = vpop.eup %2448 }
0x154e   :  { %1995 = vperm.xlu1 %2321, %v1992_v54   ;;  %v1965_v59 = vadd.f32 1.0, %v2449_v2 }
0x1550   :  { %2450 = vrcp.f32 %v1965_v59 }
0x1551   :  { %1972 = vrot.lane.b32.xlu0 %v1893_v36, %s2465_s12 }
0x1555   :  { %1867 = vperm.xlu0 %2320, %v2130_v49  }
0x1559   :  { %1988 = vperm.xlu0 %2320, %v1894_v53  }
0x155a   :  { %v2451_v9 = vpop.eup %2450 }
0x155b   :  { %v1982_v7 = vsub.f32 1.0, %v2451_v9  ;;  %v1984_v12 = vmul.f32 %v2451_v9, %v3031_v14 }
0x15b8   :  { %v1978_v4 = vpop.permute.xlu1 %1977 }
0x15bf   :  { %v1849_v44 = vpop.permute.xlu0 %1848 }
0x15c0   :  { %v1851_v61 = vmul.f32 %v1849_v44, %v1846_v58 }
0x15c2   :  { %v1864_v62 = vadd.f32 %v1863_v60, %v1851_v61 }
0x15c3   :  { %v1973_v43 = vpop.permute.xlu0 %1972 }
0x15c4   :  { %v1877_v63 = vrot.slane %v1864_v62, %v2547_v11  ;;  %v1974_v3 = vrot.slane %v1973_v43, 2 }
0x15c6   :  { %v1980_v5 = vadd.f32 %v1978_v4, %v1974_v3  ;;  %1878 = vrot.lane.b32.xlu0 %v1877_v63, %s2465_s12 }
0x15c8   :  { %2452 = vtanh.f32 %v1980_v5 }
0x15c9   :  { %v1886_v55 = vpop.permute.xlu1 %1885 }
0x15ca   :  { %v1888_v20 = vmul.f32 %v1886_v55, %v3019_v10 }
0x15cd   :  { %v1996_v15 = vpop.permute.xlu1 %1995 }
0x15ce   :  { %v1998_v18 = vmul.f32 %v1996_v15, %v3031_v14 }
0x15d2   :  { %v2453_v51 = vpop.eup %2452 }
0x15d3   :  { %v1983_v0 = vmul.f32 %v2453_v51, %v1982_v7 }
0x15d4   :  { %v1868_v13 = vpop.permute.xlu0 %1867 }
0x15d5   :  { %v1985_v16 = vadd.f32 %v1984_v12, %v1983_v0 }
0x15d8   :  { %v1989_v17 = vpop.permute.xlu0 %1988 }
0x15d9   :  { %v1991_v11 = vmul.f32 %v1989_v17, %v1985_v16 }
0x15db   :  { %v1999_v41 = vadd.f32 %v1998_v18, %v1991_v11  ;;  %2001 = vst.msk [vmem:[%s3084_s7] sm:$0x3] %vm91_vm0, %v1991_v11 }
0x15dd   :  { %2000 = vst.msk [vmem:[#allocation3] sm:$0x3] %vm91_vm0, %v1999_v41 }
0x1638   :  { %v1879_v19 = vpop.permute.xlu0 %1878 }
0x1639   :  { %v1881_v21 = vmul.f32 %v1879_v19, %v1868_v13 }
0x163b   :  { %v1889_v22 = vadd.f32 %v1888_v20, %v1881_v21  ;;  %2133 = vst.msk [vmem:[%s3081_s6 + $0xe] sm:$0x3] %vm91_vm0, %v1881_v21 }
0x163d   :  { %1890 = vst.msk [vmem:[#allocation2] sm:$0x3] %vm91_vm0, %v1889_v22 }

</bundles_post_ra>
